<compile_context>
chip_gen: v6e
topology: v6e:2x2x1
jax: 0.10.0
libtpu: 0.0.40
codegen_flags: <defaults>
</compile_context>

<pallas_src>
import functools
import math

import jax
import jax.numpy as jnp
from jax.experimental import pallas as pl
from jax.experimental.pallas import tpu as pltpu

# ---------------- small DiT_Llama config ----------------
INPUT_SIZE = 8
PATCH_SIZE = 1                 # patch_size=1 -> patch embed is a pointwise linear
IN_CHANNELS = 3
DIM = 48
N_LAYERS = 2
N_HEADS = 2
HEAD_DIM = DIM // N_HEADS      # 24 -> matches hardcoded precompute_freqs_cis(24, ...)
MULTIPLE_OF = 32
NORM_EPS = 1e-5
NUM_CLASSES = 16
# FeedForward hidden dim: int(2*(4*dim)/3) rounded up to multiple_of
FFN_HIDDEN = MULTIPLE_OF * ((int(2 * (4 * DIM) / 3) + MULTIPLE_OF - 1) // MULTIPLE_OF)  # 128
SEQ = 1 + INPUT_SIZE * INPUT_SIZE

assert HEAD_DIM % 4 == 0, "2d rope needs head dim to be divisible by 4"


# ---------------- the single fused DiT_Llama kernel ----------------
def _dit_fused_kernel(x_ref, pw_ref, tokb_ref, cos_ref, sin_ref,
                      wqkv_ref, wo_ref, w13_ref, w2_ref, vecs_ref,
                      hw_ref, hb_ref, o_ref, act_ref,
                      *, n_heads, head_dim, eps):
    """One (batch, layer) grid step of the whole model.

    grid = (B, N_LAYERS); batch is "parallel", layer is "arbitrary".  The
    running activation lives in the `act_ref` VMEM scratch (seeded at layer 0
    with the fused patch-embed + cls prepend); the HBM output (logits) is only
    written at the last layer.
    """
    li = pl.program_id(1)
    n_layers = pl.num_programs(1)

    @pl.when(li == 0)
    def _():
        # Patch embed (pointwise linear) fused with the cls-token prepend:
        # token row 0 is all zeros and tokb row 0 is the cls token, so a single
        # matmul + add produces the (S, D) activation including the cls slot.
        act_ref[...] = (jnp.dot(x_ref[0], pw_ref[...],
                                preferred_element_type=jnp.float32)
                        + tokb_ref[...])

    x = act_ref[...]                       # (S, D) resident activation (f32)

    vec = vecs_ref[li]                     # (8, D) per-layer vectors
    attn_norm_w = vec[0:1, :]
    ffn_norm_w = vec[1:2, :]
    g_attn = vec[2:3, :]                   # tanh(gate_sa)  * attention_norm2.w
    g_ffn = vec[3:4, :]                    # tanh(gate_ffn) * ffn_norm2.w

    def rms(v, w):
        ms = jnp.mean(v * v, axis=-1, keepdims=True)
        return v * jax.lax.rsqrt(ms + eps) * w

    # ---- attention branch ----
    # wqkv groups (per layer): [wq*scale, (wq*scale)@P, wk, wk@P, wv]
    # (P = pairwise "multiply by i", so RoPE = two full-width mults + add).
    xn = rms(x, attn_norm_w)
    qb = li * 5
    q0 = jnp.dot(xn, wqkv_ref[qb + 0], preferred_element_type=jnp.float32)
    qr = jnp.dot(xn, wqkv_ref[qb + 1], preferred_element_type=jnp.float32)
    k0 = jnp.dot(xn, wqkv_ref[qb + 2], preferred_element_type=jnp.float32)
    kr = jnp.dot(xn, wqkv_ref[qb + 3], preferred_element_type=jnp.float32)
    v = jnp.dot(xn, wqkv_ref[qb + 4], preferred_element_type=jnp.float32)

    cos = cos_ref[...]                     # (S, D), head-tiled; cls row = identity
    sin = sin_ref[...]
    q = q0 * cos + qr * sin                # softmax scale already folded into wq
    k = k0 * cos + kr * sin

    proj = jnp.zeros_like(x)
    for h in range(n_heads):               # static unroll; all heads in one step
        sl = slice(h * head_dim, (h + 1) * head_dim)
        s = jax.lax.dot_general(q[:, sl], k[:, sl], (((1,), (1,)), ((), ())),
                                preferred_element_type=jnp.float32)
        m = jnp.max(s, axis=-1, keepdims=True)
        p = jnp.exp(s - m)
        l = jnp.sum(p, axis=-1, keepdims=True)
        o_h = jnp.dot(p, v[:, sl], preferred_element_type=jnp.float32)
        o_h = o_h * pl.reciprocal(l, approx=True)
        # per-head row-block of wo (its own aligned tile): sum_h o_h @ wo_h
        proj = proj + jnp.dot(o_h, wo_ref[li * n_heads + h],
                              preferred_element_type=jnp.float32)

    # gated-residual epilogue: x + RMS(proj) * (tanh(gate_sa)*norm2_w)  (pre-folded)
    # TODO(synk): DropPath treated as identity (inference / eval semantics).
    ms_p = jnp.mean(proj * proj, axis=-1, keepdims=True)
    h_res = x + proj * jax.lax.rsqrt(ms_p + eps) * g_attn

    # ---- feed-forward branch: RMSNorm + (w1||w3) matmul + SwiGLU + w2 ----
    hn = rms(h_res, ffn_norm_w)
    g13 = jnp.dot(hn, w13_ref[li], preferred_element_type=jnp.float32)   # (S, 2F)
    f_hid = w2_ref.shape[1]
    h1 = g13[:, :f_hid]                   # lane-aligned slices (F = 128)
    h3 = g13[:, f_hid:]
    ff = jnp.dot(h1 * jax.nn.sigmoid(h1) * h3, w2_ref[li],
                 preferred_element_type=jnp.float32)
    ms_f = jnp.mean(ff * ff, axis=-1, keepdims=True)
    out = h_res + ff * jax.lax.rsqrt(ms_f + eps) * g_ffn

    act_ref[...] = out                     # carry to the next layer (VMEM only)

    @pl.when(li == n_layers - 1)
    def _():
        # classifier head on the cls token; single HBM write per batch element.
        logits = (jnp.dot(out[0:1, :], hw_ref[...],
                          preferred_element_type=jnp.float32) + hb_ref[...])
        o_ref[0] = logits.astype(o_ref.dtype)


def dit_fused_call(x_pad, fused):
    """Run patch-embed + all transformer layers + head in a single pallas_call."""
    b, s, c = x_pad.shape
    kernel = functools.partial(_dit_fused_kernel, n_heads=N_HEADS,
                               head_dim=HEAD_DIM, eps=NORM_EPS)
    out = pl.pallas_call(
        kernel,
        out_shape=jax.ShapeDtypeStruct((b, 1, NUM_CLASSES), jnp.float32),
        grid=(b, N_LAYERS),
        in_specs=[
            # per-batch token block (constant along the layer axis -> fetched once per batch)
            pl.BlockSpec((1, s, c), lambda bi, li: (bi, 0, 0)),
            # model-wide constants / weights: constant-index FULL-array blocks
            pl.BlockSpec((c, DIM), lambda bi, li: (0, 0)),                     # patch_w
            pl.BlockSpec((SEQ, DIM), lambda bi, li: (0, 0)),                   # cls/bias table
            pl.BlockSpec((SEQ, DIM), lambda bi, li: (0, 0)),                   # rope cos (full width)
            pl.BlockSpec((SEQ, DIM), lambda bi, li: (0, 0)),                   # rope sin (full width)
            pl.BlockSpec((N_LAYERS * 5, DIM, DIM), lambda bi, li: (0, 0, 0)),  # qkv(+rope) groups
            pl.BlockSpec((N_LAYERS * N_HEADS, HEAD_DIM, DIM),
                         lambda bi, li: (0, 0, 0)),                            # wo per-head rows
            pl.BlockSpec((N_LAYERS, DIM, 2 * FFN_HIDDEN),
                         lambda bi, li: (0, 0, 0)),                            # w1 || w3
            pl.BlockSpec((N_LAYERS, FFN_HIDDEN, DIM), lambda bi, li: (0, 0, 0)),  # w2
            pl.BlockSpec((N_LAYERS, 8, DIM), lambda bi, li: (0, 0, 0)),        # norms/gates (folded)
            pl.BlockSpec((DIM, NUM_CLASSES), lambda bi, li: (0, 0)),           # head_w
            pl.BlockSpec((1, NUM_CLASSES), lambda bi, li: (0, 0)),             # head_b
        ],
        out_specs=pl.BlockSpec((1, 1, NUM_CLASSES), lambda bi, li: (bi, 0, 0)),
        scratch_shapes=[pltpu.VMEM((SEQ, DIM), jnp.float32)],   # resident activation
        compiler_params=pltpu.CompilerParams(
            dimension_semantics=("parallel", "arbitrary")),
    )(x_pad, fused["patch_w"], fused["tok_bias"], fused["rope_cos"],
      fused["rope_sin"], fused["wqkv"], fused["wo"], fused["w13"], fused["w2"],
      fused["vecs"], fused["head_w"], fused["head_b"])
    return out.reshape(b, NUM_CLASSES)


# ---------------- forward pass ----------------
def dit_llama_forward(fused, x_nchw):
    b, c, hh, ww = x_nchw.shape
    # NCHW -> (B, H*W, C) tokens + one zero row for the cls slot.  These two ops
    # touch only the ~1.5 KB raw input; all activations stay inside the kernel.
    tokens = jnp.transpose(x_nchw, (0, 2, 3, 1)).reshape(b, hh * ww, c)
    x_pad = jnp.concatenate([jnp.zeros((b, 1, c), tokens.dtype), tokens], axis=1)
    return dit_fused_call(x_pad, fused)


# ---------------- RoPE tables & one-time weight repacking ----------------
def precompute_freqs_cos_sin(rope_dim=HEAD_DIM, end=INPUT_SIZE, theta=10000.0):
    """cos/sin of DiT_Llama.precompute_freqs_cis(rope_dim, end): (end, end, rope_dim//2)."""
    nf = rope_dim // 4
    freqs = 1.0 / (theta ** (jnp.arange(0, rope_dim, 4)[:nf].astype(jnp.float32) / rope_dim))
    t = jnp.arange(end, dtype=jnp.float32)
    ang = jnp.outer(t, freqs)                                    # (end, nf)
    ang_h = jnp.broadcast_to(ang[:, None, :, None], (end, end, nf, 1))
    ang_w = jnp.broadcast_to(ang[None, :, :, None], (end, end, nf, 1))
    ang2d = jnp.concatenate([ang_h, ang_w], axis=-1).reshape(end, end, 2 * nf)
    return jnp.cos(ang2d), jnp.sin(ang2d)


def _pair_rotation_matrix(d):
    """P with (x @ P)[2i] = -x[2i+1], (x @ P)[2i+1] = x[2i]  (complex 'mul by i')."""
    p = jnp.zeros((d, d), jnp.float32)
    even = jnp.arange(0, d, 2)
    p = p.at[even, even + 1].set(1.0)
    p = p.at[even + 1, even].set(-1.0)
    return p


def fuse_params(params):
    """One-time repacking of raw params into the kernel-ready fused layout."""
    hw = INPUT_SIZE * INPUT_SIZE
    cos12 = params["rope_cos2d"][:INPUT_SIZE, :INPUT_SIZE].reshape(hw, HEAD_DIM // 2)
    sin12 = params["rope_sin2d"][:INPUT_SIZE, :INPUT_SIZE].reshape(hw, HEAD_DIM // 2)
    # duplicate each angle onto its (re, im) lane pair; cls row = identity rotation
    cos_i = jnp.repeat(cos12, 2, axis=-1)
    sin_i = jnp.repeat(sin12, 2, axis=-1)
    cos_head = jnp.concatenate([jnp.ones((1, HEAD_DIM), jnp.float32), cos_i], axis=0)
    sin_head = jnp.concatenate([jnp.zeros((1, HEAD_DIM), jnp.float32), sin_i], axis=0)
    rope_cos = jnp.tile(cos_head, (1, N_HEADS))          # (S, DIM) full width
    rope_sin = jnp.tile(sin_head, (1, N_HEADS))
    assert rope_cos.shape == (SEQ, DIM)

    # row 0 = cls token, rows 1.. = patch-embed bias  (cls prepend via matmul+add)
    tok_bias = jnp.concatenate(
        [params["cls_token"].reshape(1, DIM),
         jnp.tile(params["patch_b"].reshape(1, DIM), (hw, 1))], axis=0)

    rot = _pair_rotation_matrix(DIM)   # block-diagonal, pairing never crosses heads
    scale = 1.0 / math.sqrt(HEAD_DIM)  # softmax scale folded into wq at fuse time

    wqkv_blocks, wo_blocks, w13, w2, vecs = [], [], [], [], []
    for p in params["layers"]:
        wq_s = p["wq"] * scale
        wqkv_blocks += [wq_s, wq_s @ rot, p["wk"], p["wk"] @ rot, p["wv"]]
        for h in range(N_HEADS):
            wo_blocks.append(p["wo"][h * HEAD_DIM:(h + 1) * HEAD_DIM, :])
        w13.append(jnp.concatenate([p["w1"], p["w3"]], axis=1))
        w2.append(p["w2"])
        v = jnp.zeros((8, DIM), jnp.float32)
        v = v.at[0].set(p["attention_norm_w"])
        v = v.at[1].set(p["ffn_norm_w"])
        v = v.at[2].set(jnp.tanh(p["gate_sa"]) * p["attention_norm2_w"])
        v = v.at[3].set(jnp.tanh(p["gate_ffn"]) * p["ffn_norm2_w"])
        vecs.append(v)
    return dict(
        patch_w=params["patch_w"],
        tok_bias=tok_bias,
        head_w=params["head_w"], head_b=params["head_b"].reshape(1, NUM_CLASSES),
        rope_cos=rope_cos, rope_sin=rope_sin,
        wqkv=jnp.stack(wqkv_blocks),           # (N_LAYERS*5, DIM, DIM)
        wo=jnp.stack(wo_blocks),               # (N_LAYERS*N_HEADS, HEAD_DIM, DIM)
        w13=jnp.stack(w13), w2=jnp.stack(w2), vecs=jnp.stack(vecs))


# ---------------- deterministic parameter init ----------------
def init_params(key):
    keys = iter(jax.random.split(key, 64))

    def nrm(shape, scale=0.05):
        return scale * jax.random.normal(next(keys), shape, jnp.float32)

    layers = []
    for _ in range(N_LAYERS):
        layers.append(dict(
            attention_norm_w=jnp.ones((DIM,), jnp.float32),
            attention_norm2_w=jnp.ones((DIM,), jnp.float32),
            ffn_norm_w=jnp.ones((DIM,), jnp.float32),
            ffn_norm2_w=jnp.ones((DIM,), jnp.float32),
            # torch init is zeros (identity blocks); randomized for a non-trivial test
            gate_sa=nrm((DIM,), 0.5),
            gate_ffn=nrm((DIM,), 0.5),
            wq=nrm((DIM, DIM)), wk=nrm((DIM, DIM)),
            wv=nrm((DIM, DIM)), wo=nrm((DIM, DIM)),
            w1=nrm((DIM, FFN_HIDDEN)), w3=nrm((DIM, FFN_HIDDEN)),
            w2=nrm((FFN_HIDDEN, DIM)),
        ))
    cos2d, sin2d = precompute_freqs_cos_sin(HEAD_DIM, INPUT_SIZE)
    return dict(
        patch_w=nrm((IN_CHANNELS, DIM)), patch_b=nrm((DIM,)),
        cls_token=nrm((1, 1, DIM)),
        head_w=nrm((DIM, NUM_CLASSES)), head_b=nrm((NUM_CLASSES,)),
        layers=layers, rope_cos2d=cos2d, rope_sin2d=sin2d)


# ---------------- unfused pure-JAX reference (for a numeric self-check) ----------------
def _rmsnorm_ref(x, w, eps=NORM_EPS):
    ms = jnp.mean(x * x, axis=-1, keepdims=True)
    return x * jax.lax.rsqrt(ms + eps) * w


def _apply_rope_ref(x, cos, sin):
    b, s, h, dh = x.shape
    cls_tok = x[:, :1]
    xr = x[:, 1:].reshape(b, s - 1, h, dh // 2, 2)
    xre, xim = xr[..., 0], xr[..., 1]
    c = cos[None, :, None, :]
    si = sin[None, :, None, :]
    rot = jnp.stack([xre * c - xim * si, xre * si + xim * c], axis=-1)
    return jnp.concatenate([cls_tok, rot.reshape(b, s - 1, h, dh)], axis=1)


def dit_llama_reference(params, x_nchw):
    hp = jax.lax.Precision.HIGHEST
    b, c, hh, ww = x_nchw.shape
    tokens = jnp.transpose(x_nchw, (0, 2, 3, 1)).reshape(b, hh * ww, c)
    x = jnp.einsum("bsc,cd->bsd", tokens, params["patch_w"], precision=hp) + params["patch_b"]
    cls = jnp.broadcast_to(params["cls_token"].reshape(1, 1, DIM), (b, 1, DIM))
    x = jnp.concatenate([cls, x], axis=1)
    cos = params["rope_cos2d"][:hh, :ww].reshape(hh * ww, HEAD_DIM // 2)
    sin = params["rope_sin2d"][:hh, :ww].reshape(hh * ww, HEAD_DIM // 2)
    for p in params["layers"]:
        xn = _rmsnorm_ref(x, p["attention_norm_w"])
        q = jnp.einsum("bsd,de->bse", xn, p["wq"], precision=hp).reshape(b, -1, N_HEADS, HEAD_DIM)
        k = jnp.einsum("bsd,de->bse", xn, p["wk"], precision=hp).reshape(b, -1, N_HEADS, HEAD_DIM)
        v = jnp.einsum("bsd,de->bse", xn, p["wv"], precision=hp).reshape(b, -1, N_HEADS, HEAD_DIM)
        q = _apply_rope_ref(q, cos, sin)
        k = _apply_rope_ref(k, cos, sin)
        s = jnp.einsum("bqhd,bkhd->bhqk", q, k, precision=hp) / math.sqrt(HEAD_DIM)
        a = jax.nn.softmax(s, axis=-1)
        o = jnp.einsum("bhqk,bkhd->bqhd", a, v, precision=hp).reshape(b, -1, DIM)
        attn = jnp.einsum("bsd,de->bse", o, p["wo"], precision=hp)
        h = x + jnp.tanh(p["gate_sa"]) * _rmsnorm_ref(attn, p["attention_norm2_w"])
        hn = _rmsnorm_ref(h, p["ffn_norm_w"])
        h1 = jnp.einsum("bsd,df->bsf", hn, p["w1"], precision=hp)
        h3 = jnp.einsum("bsd,df->bsf", hn, p["w3"], precision=hp)
        ff = jnp.einsum("bsf,fd->bsd", jax.nn.silu(h1) * h3, p["w2"], precision=hp)
        x = h + jnp.tanh(p["gate_ffn"]) * _rmsnorm_ref(ff, p["ffn_norm2_w"])
    return jnp.einsum("bd,dn->bn", x[:, 0], params["head_w"], precision=hp) + params["head_b"]


if __name__ == "__main__":
    key = jax.random.PRNGKey(0)
    pkey, xkey = jax.random.split(key)
    params = init_params(pkey)
    fused = fuse_params(params)     # one-time weight repacking (outside the hot path)
    x = jax.random.normal(xkey, (2, IN_CHANNELS, INPUT_SIZE, INPUT_SIZE), jnp.float32)

    fwd = jax.jit(dit_llama_forward)
    out = fwd(fused, x)
    jax.block_until_ready(out)
    assert out.shape == (2, NUM_CLASSES), out.shape
    assert bool(jnp.all(jnp.isfinite(out)))

    # numeric self-check against the unfused pure-JAX reference
    ref = dit_llama_reference(params, x)
    max_err = float(jnp.max(jnp.abs(out - ref)))
    assert bool(jnp.allclose(out, ref, rtol=5e-2, atol=1e-2)), max_err

    print("KERNEL_OK")
</pallas_src>

<mosaic_0001>
module attributes {stable_mosaic.version = 11 : i64} {
  func.func @_dit_fused_kernel(%arg0: i32, %arg1: i32, %arg2: memref<1x65x3xf32, #tpu.memory_space<vmem>>, %arg3: memref<3x48xf32, #tpu.memory_space<vmem>>, %arg4: memref<65x48xf32, #tpu.memory_space<vmem>>, %arg5: memref<65x48xf32, #tpu.memory_space<vmem>>, %arg6: memref<65x48xf32, #tpu.memory_space<vmem>>, %arg7: memref<10x48x48xf32, #tpu.memory_space<vmem>>, %arg8: memref<4x24x48xf32, #tpu.memory_space<vmem>>, %arg9: memref<2x48x256xf32, #tpu.memory_space<vmem>>, %arg10: memref<2x128x48xf32, #tpu.memory_space<vmem>>, %arg11: memref<2x8x48xf32, #tpu.memory_space<vmem>>, %arg12: memref<48x16xf32, #tpu.memory_space<vmem>>, %arg13: memref<1x16xf32, #tpu.memory_space<vmem>>, %arg14: memref<1x1x16xf32, #tpu.memory_space<vmem>>, %arg15: memref<65x48xf32, #tpu.memory_space<vmem>>) attributes {dimension_semantics = [#tpu.dimension_semantics<parallel>, #tpu.dimension_semantics<arbitrary>], iteration_bounds = array<i64: 2, 2>, scalar_prefetch = 0 : i64, scratch_operands = 1 : i64, tpu.core_type = #tpu.core_type<tc>, window_params = [{transform_indices = @transform_0, window_bounds = array<i64: 1, 65, 3>}, {pipeline_mode = #tpu.pipeline_mode<synchronous>, transform_indices = @transform_1, window_bounds = array<i64: 3, 48>}, {pipeline_mode = #tpu.pipeline_mode<synchronous>, transform_indices = @transform_2, window_bounds = array<i64: 65, 48>}, {pipeline_mode = #tpu.pipeline_mode<synchronous>, transform_indices = @transform_3, window_bounds = array<i64: 65, 48>}, {pipeline_mode = #tpu.pipeline_mode<synchronous>, transform_indices = @transform_4, window_bounds = array<i64: 65, 48>}, {pipeline_mode = #tpu.pipeline_mode<synchronous>, transform_indices = @transform_5, window_bounds = array<i64: 10, 48, 48>}, {pipeline_mode = #tpu.pipeline_mode<synchronous>, transform_indices = @transform_6, window_bounds = array<i64: 4, 24, 48>}, {pipeline_mode = #tpu.pipeline_mode<synchronous>, transform_indices = @transform_7, window_bounds = array<i64: 2, 48, 256>}, {pipeline_mode = #tpu.pipeline_mode<synchronous>, transform_indices = @transform_8, window_bounds = array<i64: 2, 128, 48>}, {pipeline_mode = #tpu.pipeline_mode<synchronous>, transform_indices = @transform_9, window_bounds = array<i64: 2, 8, 48>}, {pipeline_mode = #tpu.pipeline_mode<synchronous>, transform_indices = @transform_10, window_bounds = array<i64: 48, 16>}, {pipeline_mode = #tpu.pipeline_mode<synchronous>, transform_indices = @transform_11, window_bounds = array<i64: 1, 16>}, {transform_indices = @transform_12, window_bounds = array<i64: 1, 1, 16>}]} {
    %c0_i32 = arith.constant 0 : i32
    %0 = arith.cmpi eq, %arg1, %c0_i32 : i32
    %1 = arith.extui %0 : i1 to i32
    %c0_i32_0 = arith.constant 0 : i32
    %2 = arith.cmpi ne, %1, %c0_i32_0 : i32
    scf.if %2 {
      %c0_65 = arith.constant 0 : index
      %c0_66 = arith.constant 0 : index
      %c0_67 = arith.constant 0 : index
      %161 = vector.load %arg2[%c0_65, %c0_66, %c0_67] : memref<1x65x3xf32, #tpu.memory_space<vmem>>, vector<1x65x3xf32>
      %162 = vector.shape_cast %161 : vector<1x65x3xf32> to vector<65x3xf32>
      %c0_68 = arith.constant 0 : index
      %c0_69 = arith.constant 0 : index
      %163 = vector.load %arg3[%c0_68, %c0_69] : memref<3x48xf32, #tpu.memory_space<vmem>>, vector<3x48xf32>
      %cst_70 = arith.constant dense<0.000000e+00> : vector<65x48xf32>
      %164 = tpu.matmul %162, %163, %cst_70 {dimension_numbers = #tpu.dot_dimension_numbers<[1], [0], [0], [1], [0, 0, 1, 1], [], []>} : vector<65x3xf32>, vector<3x48xf32>, vector<65x48xf32> -> vector<65x48xf32>
      %c0_71 = arith.constant 0 : index
      %c0_72 = arith.constant 0 : index
      %165 = vector.load %arg4[%c0_71, %c0_72] : memref<65x48xf32, #tpu.memory_space<vmem>>, vector<65x48xf32>
      %166 = arith.addf %164, %165 : vector<65x48xf32>
      %c0_73 = arith.constant 0 : index
      %c0_74 = arith.constant 0 : index
      %167 = vector.load %arg15[%c0_73, %c0_74] : memref<65x48xf32, #tpu.memory_space<vmem>>, vector<65x48xf32>
      tpu.vector_store %arg15[%c0_73, %c0_74], %166 {strides = array<i32>} : memref<65x48xf32, #tpu.memory_space<vmem>>, vector<65x48xf32>,
    } else {
    }
    %c0 = arith.constant 0 : index
    %c0_1 = arith.constant 0 : index
    %3 = vector.load %arg15[%c0, %c0_1] : memref<65x48xf32, #tpu.memory_space<vmem>>, vector<65x48xf32>
    %4 = arith.index_cast %arg1 : i32 to index
    %c0_2 = arith.constant 0 : index
    %c0_3 = arith.constant 0 : index
    %5 = vector.load %arg11[%4, %c0_2, %c0_3] : memref<2x8x48xf32, #tpu.memory_space<vmem>>, vector<1x8x48xf32>
    %6 = vector.shape_cast %5 : vector<1x8x48xf32> to vector<8x48xf32>
    %7 = vector.extract_strided_slice %6 {offsets = [0, 0], sizes = [1, 48], strides = [1, 1]} : vector<8x48xf32> to vector<1x48xf32>
    %8 = vector.extract_strided_slice %6 {offsets = [1, 0], sizes = [1, 48], strides = [1, 1]} : vector<8x48xf32> to vector<1x48xf32>
    %9 = vector.extract_strided_slice %6 {offsets = [2, 0], sizes = [1, 48], strides = [1, 1]} : vector<8x48xf32> to vector<1x48xf32>
    %10 = vector.extract_strided_slice %6 {offsets = [3, 0], sizes = [1, 48], strides = [1, 1]} : vector<8x48xf32> to vector<1x48xf32>
    %11 = arith.mulf %3, %3 : vector<65x48xf32>
    %cst = arith.constant dense<0.000000e+00> : vector<65xf32>
    %12 = vector.multi_reduction <add>, %11, %cst [1] : vector<65x48xf32> to vector<65xf32>
    %13 = vector.shape_cast %12 : vector<65xf32> to vector<65x1xf32>
    %cst_4 = arith.constant 4.800000e+01 : f32
    %14 = vector.broadcast %cst_4 : f32 to vector<65x1xf32>
    %15 = arith.divf %13, %14 : vector<65x1xf32>
    %cst_5 = arith.constant 9.99999974E-6 : f32
    %16 = vector.broadcast %cst_5 : f32 to vector<65x1xf32>
    %17 = arith.addf %15, %16 : vector<65x1xf32>
    %18 = math.rsqrt %17 : vector<65x1xf32>
    %19 = vector.broadcast %18 : vector<65x1xf32> to vector<65x48xf32>
    %20 = arith.mulf %3, %19 : vector<65x48xf32>
    %21 = vector.broadcast %7 : vector<1x48xf32> to vector<65x48xf32>
    %22 = arith.mulf %20, %21 : vector<65x48xf32>
    %c5_i32 = arith.constant 5 : i32
    %23 = arith.muli %arg1, %c5_i32 : i32
    %c0_i32_6 = arith.constant 0 : i32
    %24 = arith.addi %23, %c0_i32_6 : i32
    %25 = arith.index_cast %24 : i32 to index
    %c0_7 = arith.constant 0 : index
    %c0_8 = arith.constant 0 : index
    %26 = vector.load %arg7[%25, %c0_7, %c0_8] : memref<10x48x48xf32, #tpu.memory_space<vmem>>, vector<1x48x48xf32>
    %27 = vector.shape_cast %26 : vector<1x48x48xf32> to vector<48x48xf32>
    %cst_9 = arith.constant dense<0.000000e+00> : vector<65x48xf32>
    %28 = tpu.matmul %22, %27, %cst_9 {dimension_numbers = #tpu.dot_dimension_numbers<[1], [0], [0], [1], [0, 0, 1, 1], [], []>} : vector<65x48xf32>, vector<48x48xf32>, vector<65x48xf32> -> vector<65x48xf32>
    %c1_i32 = arith.constant 1 : i32
    %29 = arith.addi %23, %c1_i32 : i32
    %30 = arith.index_cast %29 : i32 to index
    %c0_10 = arith.constant 0 : index
    %c0_11 = arith.constant 0 : index
    %31 = vector.load %arg7[%30, %c0_10, %c0_11] : memref<10x48x48xf32, #tpu.memory_space<vmem>>, vector<1x48x48xf32>
    %32 = vector.shape_cast %31 : vector<1x48x48xf32> to vector<48x48xf32>
    %cst_12 = arith.constant dense<0.000000e+00> : vector<65x48xf32>
    %33 = tpu.matmul %22, %32, %cst_12 {dimension_numbers = #tpu.dot_dimension_numbers<[1], [0], [0], [1], [0, 0, 1, 1], [], []>} : vector<65x48xf32>, vector<48x48xf32>, vector<65x48xf32> -> vector<65x48xf32>
    %c2_i32 = arith.constant 2 : i32
    %34 = arith.addi %23, %c2_i32 : i32
    %35 = arith.index_cast %34 : i32 to index
    %c0_13 = arith.constant 0 : index
    %c0_14 = arith.constant 0 : index
    %36 = vector.load %arg7[%35, %c0_13, %c0_14] : memref<10x48x48xf32, #tpu.memory_space<vmem>>, vector<1x48x48xf32>
    %37 = vector.shape_cast %36 : vector<1x48x48xf32> to vector<48x48xf32>
    %cst_15 = arith.constant dense<0.000000e+00> : vector<65x48xf32>
    %38 = tpu.matmul %22, %37, %cst_15 {dimension_numbers = #tpu.dot_dimension_numbers<[1], [0], [0], [1], [0, 0, 1, 1], [], []>} : vector<65x48xf32>, vector<48x48xf32>, vector<65x48xf32> -> vector<65x48xf32>
    %c3_i32 = arith.constant 3 : i32
    %39 = arith.addi %23, %c3_i32 : i32
    %40 = arith.index_cast %39 : i32 to index
    %c0_16 = arith.constant 0 : index
    %c0_17 = arith.constant 0 : index
    %41 = vector.load %arg7[%40, %c0_16, %c0_17] : memref<10x48x48xf32, #tpu.memory_space<vmem>>, vector<1x48x48xf32>
    %42 = vector.shape_cast %41 : vector<1x48x48xf32> to vector<48x48xf32>
    %cst_18 = arith.constant dense<0.000000e+00> : vector<65x48xf32>
    %43 = tpu.matmul %22, %42, %cst_18 {dimension_numbers = #tpu.dot_dimension_numbers<[1], [0], [0], [1], [0, 0, 1, 1], [], []>} : vector<65x48xf32>, vector<48x48xf32>, vector<65x48xf32> -> vector<65x48xf32>
    %c4_i32 = arith.constant 4 : i32
    %44 = arith.addi %23, %c4_i32 : i32
    %45 = arith.index_cast %44 : i32 to index
    %c0_19 = arith.constant 0 : index
    %c0_20 = arith.constant 0 : index
    %46 = vector.load %arg7[%45, %c0_19, %c0_20] : memref<10x48x48xf32, #tpu.memory_space<vmem>>, vector<1x48x48xf32>
    %47 = vector.shape_cast %46 : vector<1x48x48xf32> to vector<48x48xf32>
    %cst_21 = arith.constant dense<0.000000e+00> : vector<65x48xf32>
    %48 = tpu.matmul %22, %47, %cst_21 {dimension_numbers = #tpu.dot_dimension_numbers<[1], [0], [0], [1], [0, 0, 1, 1], [], []>} : vector<65x48xf32>, vector<48x48xf32>, vector<65x48xf32> -> vector<65x48xf32>
    %c0_22 = arith.constant 0 : index
    %c0_23 = arith.constant 0 : index
    %49 = vector.load %arg5[%c0_22, %c0_23] : memref<65x48xf32, #tpu.memory_space<vmem>>, vector<65x48xf32>
    %c0_24 = arith.constant 0 : index
    %c0_25 = arith.constant 0 : index
    %50 = vector.load %arg6[%c0_24, %c0_25] : memref<65x48xf32, #tpu.memory_space<vmem>>, vector<65x48xf32>
    %51 = arith.mulf %28, %49 : vector<65x48xf32>
    %52 = arith.mulf %33, %50 : vector<65x48xf32>
    %53 = arith.addf %51, %52 : vector<65x48xf32>
    %54 = arith.mulf %38, %49 : vector<65x48xf32>
    %55 = arith.mulf %43, %50 : vector<65x48xf32>
    %56 = arith.addf %54, %55 : vector<65x48xf32>
    %cst_26 = arith.constant 0.000000e+00 : f32
    %57 = vector.broadcast %cst_26 : f32 to vector<65x48xf32>
    %58 = vector.extract_strided_slice %53 {offsets = [0, 0], sizes = [65, 24], strides = [1, 1]} : vector<65x48xf32> to vector<65x24xf32>
    %59 = vector.extract_strided_slice %56 {offsets = [0, 0], sizes = [65, 24], strides = [1, 1]} : vector<65x48xf32> to vector<65x24xf32>
    %cst_27 = arith.constant dense<0.000000e+00> : vector<65x65xf32>
    %60 = tpu.matmul %58, %59, %cst_27 {dimension_numbers = #tpu.dot_dimension_numbers<[1], [1], [0], [0], [0, 0, 1, 0], [], []>} : vector<65x24xf32>, vector<65x24xf32>, vector<65x65xf32> -> vector<65x65xf32>
    %cst_28 = arith.constant dense<0xFF800000> : vector<65xf32>
    %61 = vector.multi_reduction <maximumf>, %60, %cst_28 [1] : vector<65x65xf32> to vector<65xf32>
    %62 = vector.shape_cast %61 : vector<65xf32> to vector<65x1xf32>
    %63 = vector.broadcast %62 : vector<65x1xf32> to vector<65x65xf32>
    %64 = arith.subf %60, %63 : vector<65x65xf32>
    %65 = math.exp %64 : vector<65x65xf32>
    %cst_29 = arith.constant dense<0.000000e+00> : vector<65xf32>
    %66 = vector.multi_reduction <add>, %65, %cst_29 [1] : vector<65x65xf32> to vector<65xf32>
    %67 = vector.shape_cast %66 : vector<65xf32> to vector<65x1xf32>
    %68 = vector.extract_strided_slice %48 {offsets = [0, 0], sizes = [65, 24], strides = [1, 1]} : vector<65x48xf32> to vector<65x24xf32>
    %cst_30 = arith.constant dense<0.000000e+00> : vector<65x24xf32>
    %69 = tpu.matmul %65, %68, %cst_30 {dimension_numbers = #tpu.dot_dimension_numbers<[1], [0], [0], [1], [0, 0, 1, 1], [], []>} : vector<65x65xf32>, vector<65x24xf32>, vector<65x24xf32> -> vector<65x24xf32>
    %70 = tpu.reciprocal %67 {approx = true} : vector<65x1xf32> -> vector<65x1xf32>
    %71 = vector.broadcast %70 : vector<65x1xf32> to vector<65x24xf32>
    %72 = arith.mulf %69, %71 : vector<65x24xf32>
    %c2_i32_31 = arith.constant 2 : i32
    %73 = arith.muli %arg1, %c2_i32_31 : i32
    %c0_i32_32 = arith.constant 0 : i32
    %74 = arith.addi %73, %c0_i32_32 : i32
    %75 = arith.index_cast %74 : i32 to index
    %c0_33 = arith.constant 0 : index
    %c0_34 = arith.constant 0 : index
    %76 = vector.load %arg8[%75, %c0_33, %c0_34] : memref<4x24x48xf32, #tpu.memory_space<vmem>>, vector<1x24x48xf32>
    %77 = vector.shape_cast %76 : vector<1x24x48xf32> to vector<24x48xf32>
    %cst_35 = arith.constant dense<0.000000e+00> : vector<65x48xf32>
    %78 = tpu.matmul %72, %77, %cst_35 {dimension_numbers = #tpu.dot_dimension_numbers<[1], [0], [0], [1], [0, 0, 1, 1], [], []>} : vector<65x24xf32>, vector<24x48xf32>, vector<65x48xf32> -> vector<65x48xf32>
    %79 = arith.addf %57, %78 : vector<65x48xf32>
    %80 = vector.extract_strided_slice %53 {offsets = [0, 24], sizes = [65, 24], strides = [1, 1]} : vector<65x48xf32> to vector<65x24xf32>
    %81 = vector.extract_strided_slice %56 {offsets = [0, 24], sizes = [65, 24], strides = [1, 1]} : vector<65x48xf32> to vector<65x24xf32>
    %cst_36 = arith.constant dense<0.000000e+00> : vector<65x65xf32>
    %82 = tpu.matmul %80, %81, %cst_36 {dimension_numbers = #tpu.dot_dimension_numbers<[1], [1], [0], [0], [0, 0, 1, 0], [], []>} : vector<65x24xf32>, vector<65x24xf32>, vector<65x65xf32> -> vector<65x65xf32>
    %cst_37 = arith.constant dense<0xFF800000> : vector<65xf32>
    %83 = vector.multi_reduction <maximumf>, %82, %cst_37 [1] : vector<65x65xf32> to vector<65xf32>
    %84 = vector.shape_cast %83 : vector<65xf32> to vector<65x1xf32>
    %85 = vector.broadcast %84 : vector<65x1xf32> to vector<65x65xf32>
    %86 = arith.subf %82, %85 : vector<65x65xf32>
    %87 = math.exp %86 : vector<65x65xf32>
    %cst_38 = arith.constant dense<0.000000e+00> : vector<65xf32>
    %88 = vector.multi_reduction <add>, %87, %cst_38 [1] : vector<65x65xf32> to vector<65xf32>
    %89 = vector.shape_cast %88 : vector<65xf32> to vector<65x1xf32>
    %90 = vector.extract_strided_slice %48 {offsets = [0, 24], sizes = [65, 24], strides = [1, 1]} : vector<65x48xf32> to vector<65x24xf32>
    %cst_39 = arith.constant dense<0.000000e+00> : vector<65x24xf32>
    %91 = tpu.matmul %87, %90, %cst_39 {dimension_numbers = #tpu.dot_dimension_numbers<[1], [0], [0], [1], [0, 0, 1, 1], [], []>} : vector<65x65xf32>, vector<65x24xf32>, vector<65x24xf32> -> vector<65x24xf32>
    %92 = tpu.reciprocal %89 {approx = true} : vector<65x1xf32> -> vector<65x1xf32>
    %93 = vector.broadcast %92 : vector<65x1xf32> to vector<65x24xf32>
    %94 = arith.mulf %91, %93 : vector<65x24xf32>
    %c2_i32_40 = arith.constant 2 : i32
    %95 = arith.muli %arg1, %c2_i32_40 : i32
    %c1_i32_41 = arith.constant 1 : i32
    %96 = arith.addi %95, %c1_i32_41 : i32
    %97 = arith.index_cast %96 : i32 to index
    %c0_42 = arith.constant 0 : index
    %c0_43 = arith.constant 0 : index
    %98 = vector.load %arg8[%97, %c0_42, %c0_43] : memref<4x24x48xf32, #tpu.memory_space<vmem>>, vector<1x24x48xf32>
    %99 = vector.shape_cast %98 : vector<1x24x48xf32> to vector<24x48xf32>
    %cst_44 = arith.constant dense<0.000000e+00> : vector<65x48xf32>
    %100 = tpu.matmul %94, %99, %cst_44 {dimension_numbers = #tpu.dot_dimension_numbers<[1], [0], [0], [1], [0, 0, 1, 1], [], []>} : vector<65x24xf32>, vector<24x48xf32>, vector<65x48xf32> -> vector<65x48xf32>
    %101 = arith.addf %79, %100 : vector<65x48xf32>
    %102 = arith.mulf %101, %101 : vector<65x48xf32>
    %cst_45 = arith.constant dense<0.000000e+00> : vector<65xf32>
    %103 = vector.multi_reduction <add>, %102, %cst_45 [1] : vector<65x48xf32> to vector<65xf32>
    %104 = vector.shape_cast %103 : vector<65xf32> to vector<65x1xf32>
    %cst_46 = arith.constant 4.800000e+01 : f32
    %105 = vector.broadcast %cst_46 : f32 to vector<65x1xf32>
    %106 = arith.divf %104, %105 : vector<65x1xf32>
    %cst_47 = arith.constant 9.99999974E-6 : f32
    %107 = vector.broadcast %cst_47 : f32 to vector<65x1xf32>
    %108 = arith.addf %106, %107 : vector<65x1xf32>
    %109 = math.rsqrt %108 : vector<65x1xf32>
    %110 = vector.broadcast %109 : vector<65x1xf32> to vector<65x48xf32>
    %111 = arith.mulf %101, %110 : vector<65x48xf32>
    %112 = vector.broadcast %9 : vector<1x48xf32> to vector<65x48xf32>
    %113 = arith.mulf %111, %112 : vector<65x48xf32>
    %114 = arith.addf %3, %113 : vector<65x48xf32>
    %115 = arith.mulf %114, %114 : vector<65x48xf32>
    %cst_48 = arith.constant dense<0.000000e+00> : vector<65xf32>
    %116 = vector.multi_reduction <add>, %115, %cst_48 [1] : vector<65x48xf32> to vector<65xf32>
    %117 = vector.shape_cast %116 : vector<65xf32> to vector<65x1xf32>
    %cst_49 = arith.constant 4.800000e+01 : f32
    %118 = vector.broadcast %cst_49 : f32 to vector<65x1xf32>
    %119 = arith.divf %117, %118 : vector<65x1xf32>
    %cst_50 = arith.constant 9.99999974E-6 : f32
    %120 = vector.broadcast %cst_50 : f32 to vector<65x1xf32>
    %121 = arith.addf %119, %120 : vector<65x1xf32>
    %122 = math.rsqrt %121 : vector<65x1xf32>
    %123 = vector.broadcast %122 : vector<65x1xf32> to vector<65x48xf32>
    %124 = arith.mulf %114, %123 : vector<65x48xf32>
    %125 = vector.broadcast %8 : vector<1x48xf32> to vector<65x48xf32>
    %126 = arith.mulf %124, %125 : vector<65x48xf32>
    %127 = arith.index_cast %arg1 : i32 to index
    %c0_51 = arith.constant 0 : index
    %c0_52 = arith.constant 0 : index
    %128 = vector.load %arg9[%127, %c0_51, %c0_52] : memref<2x48x256xf32, #tpu.memory_space<vmem>>, vector<1x48x256xf32>
    %129 = vector.shape_cast %128 : vector<1x48x256xf32> to vector<48x256xf32>
    %cst_53 = arith.constant dense<0.000000e+00> : vector<65x256xf32>
    %130 = tpu.matmul %126, %129, %cst_53 {dimension_numbers = #tpu.dot_dimension_numbers<[1], [0], [0], [1], [0, 0, 1, 1], [], []>} : vector<65x48xf32>, vector<48x256xf32>, vector<65x256xf32> -> vector<65x256xf32>
    %131 = vector.extract_strided_slice %130 {offsets = [0, 0], sizes = [65, 128], strides = [1, 1]} : vector<65x256xf32> to vector<65x128xf32>
    %132 = vector.extract_strided_slice %130 {offsets = [0, 128], sizes = [65, 128], strides = [1, 1]} : vector<65x256xf32> to vector<65x128xf32>
    %133 = arith.negf %131 : vector<65x128xf32>
    %134 = math.exp %133 : vector<65x128xf32>
    %cst_54 = arith.constant 1.000000e+00 : f32
    %135 = vector.broadcast %cst_54 : f32 to vector<65x128xf32>
    %136 = arith.addf %135, %134 : vector<65x128xf32>
    %137 = arith.divf %135, %136 : vector<65x128xf32>
    %138 = arith.mulf %131, %137 : vector<65x128xf32>
    %139 = arith.mulf %138, %132 : vector<65x128xf32>
    %140 = arith.index_cast %arg1 : i32 to index
    %c0_55 = arith.constant 0 : index
    %c0_56 = arith.constant 0 : index
    %141 = vector.load %arg10[%140, %c0_55, %c0_56] : memref<2x128x48xf32, #tpu.memory_space<vmem>>, vector<1x128x48xf32>
    %142 = vector.shape_cast %141 : vector<1x128x48xf32> to vector<128x48xf32>
    %cst_57 = arith.constant dense<0.000000e+00> : vector<65x48xf32>
    %143 = tpu.matmul %139, %142, %cst_57 {dimension_numbers = #tpu.dot_dimension_numbers<[1], [0], [0], [1], [0, 0, 1, 1], [], []>} : vector<65x128xf32>, vector<128x48xf32>, vector<65x48xf32> -> vector<65x48xf32>
    %144 = arith.mulf %143, %143 : vector<65x48xf32>
    %cst_58 = arith.constant dense<0.000000e+00> : vector<65xf32>
    %145 = vector.multi_reduction <add>, %144, %cst_58 [1] : vector<65x48xf32> to vector<65xf32>
    %146 = vector.shape_cast %145 : vector<65xf32> to vector<65x1xf32>
    %cst_59 = arith.constant 4.800000e+01 : f32
    %147 = vector.broadcast %cst_59 : f32 to vector<65x1xf32>
    %148 = arith.divf %146, %147 : vector<65x1xf32>
    %cst_60 = arith.constant 9.99999974E-6 : f32
    %149 = vector.broadcast %cst_60 : f32 to vector<65x1xf32>
    %150 = arith.addf %148, %149 : vector<65x1xf32>
    %151 = math.rsqrt %150 : vector<65x1xf32>
    %152 = vector.broadcast %151 : vector<65x1xf32> to vector<65x48xf32>
    %153 = arith.mulf %143, %152 : vector<65x48xf32>
    %154 = vector.broadcast %10 : vector<1x48xf32> to vector<65x48xf32>
    %155 = arith.mulf %153, %154 : vector<65x48xf32>
    %156 = arith.addf %114, %155 : vector<65x48xf32>
    %c0_61 = arith.constant 0 : index
    %c0_62 = arith.constant 0 : index
    %157 = vector.load %arg15[%c0_61, %c0_62] : memref<65x48xf32, #tpu.memory_space<vmem>>, vector<65x48xf32>
    tpu.vector_store %arg15[%c0_61, %c0_62], %156 {strides = array<i32>} : memref<65x48xf32, #tpu.memory_space<vmem>>, vector<65x48xf32>,
    %c1_i32_63 = arith.constant 1 : i32
    %158 = arith.cmpi eq, %arg1, %c1_i32_63 : i32
    %159 = arith.extui %158 : i1 to i32
    %c0_i32_64 = arith.constant 0 : i32
    %160 = arith.cmpi ne, %159, %c0_i32_64 : i32
    scf.if %160 {
      %161 = vector.extract_strided_slice %156 {offsets = [0, 0], sizes = [1, 48], strides = [1, 1]} : vector<65x48xf32> to vector<1x48xf32>
      %c0_65 = arith.constant 0 : index
      %c0_66 = arith.constant 0 : index
      %162 = vector.load %arg12[%c0_65, %c0_66] : memref<48x16xf32, #tpu.memory_space<vmem>>, vector<48x16xf32>
      %cst_67 = arith.constant dense<0.000000e+00> : vector<1x16xf32>
      %163 = tpu.matmul %161, %162, %cst_67 {dimension_numbers = #tpu.dot_dimension_numbers<[1], [0], [0], [1], [0, 0, 1, 1], [], []>} : vector<1x48xf32>, vector<48x16xf32>, vector<1x16xf32> -> vector<1x16xf32>
      %c0_68 = arith.constant 0 : index
      %c0_69 = arith.constant 0 : index
      %164 = vector.load %arg13[%c0_68, %c0_69] : memref<1x16xf32, #tpu.memory_space<vmem>>, vector<1x16xf32>
      %165 = arith.addf %163, %164 : vector<1x16xf32>
      %c0_70 = arith.constant 0 : index
      %c0_71 = arith.constant 0 : index
      %c0_72 = arith.constant 0 : index
      %166 = vector.load %arg14[%c0_70, %c0_71, %c0_72] : memref<1x1x16xf32, #tpu.memory_space<vmem>>, vector<1x1x16xf32>
      %167 = vector.shape_cast %166 : vector<1x1x16xf32> to vector<1x16xf32>
      %168 = vector.shape_cast %165 : vector<1x16xf32> to vector<1x1x16xf32>
      tpu.vector_store %arg14[%c0_70, %c0_71, %c0_72], %168 {strides = array<i32>} : memref<1x1x16xf32, #tpu.memory_space<vmem>>, vector<1x1x16xf32>,
    } else {
    }
    return
  }
  func.func @transform_0(%arg0: i32, %arg1: i32) -> (i32, i32, i32) {
    %c0_i32 = arith.constant 0 : i32
    %c0_i32_0 = arith.constant 0 : i32
    %c0_i32_1 = arith.constant 0 : i32
    return %arg0, %c0_i32, %c0_i32_0 : i32, i32, i32
  }
  func.func @transform_1(%arg0: i32, %arg1: i32) -> (i32, i32) {
    %c0_i32 = arith.constant 0 : i32
    %c0_i32_0 = arith.constant 0 : i32
    %c0_i32_1 = arith.constant 0 : i32
    return %c0_i32, %c0_i32_0 : i32, i32
  }
  func.func @transform_2(%arg0: i32, %arg1: i32) -> (i32, i32) {
    %c0_i32 = arith.constant 0 : i32
    %c0_i32_0 = arith.constant 0 : i32
    %c0_i32_1 = arith.constant 0 : i32
    return %c0_i32, %c0_i32_0 : i32, i32
  }
  func.func @transform_3(%arg0: i32, %arg1: i32) -> (i32, i32) {
    %c0_i32 = arith.constant 0 : i32
    %c0_i32_0 = arith.constant 0 : i32
    %c0_i32_1 = arith.constant 0 : i32
    return %c0_i32, %c0_i32_0 : i32, i32
  }
  func.func @transform_4(%arg0: i32, %arg1: i32) -> (i32, i32) {
    %c0_i32 = arith.constant 0 : i32
    %c0_i32_0 = arith.constant 0 : i32
    %c0_i32_1 = arith.constant 0 : i32
    return %c0_i32, %c0_i32_0 : i32, i32
  }
  func.func @transform_5(%arg0: i32, %arg1: i32) -> (i32, i32, i32) {
    %c0_i32 = arith.constant 0 : i32
    %c0_i32_0 = arith.constant 0 : i32
    %c0_i32_1 = arith.constant 0 : i32
    %c0_i32_2 = arith.constant 0 : i32
    return %c0_i32, %c0_i32_0, %c0_i32_1 : i32, i32, i32
  }
  func.func @transform_6(%arg0: i32, %arg1: i32) -> (i32, i32, i32) {
    %c0_i32 = arith.constant 0 : i32
    %c0_i32_0 = arith.constant 0 : i32
    %c0_i32_1 = arith.constant 0 : i32
    %c0_i32_2 = arith.constant 0 : i32
    return %c0_i32, %c0_i32_0, %c0_i32_1 : i32, i32, i32
  }
  func.func @transform_7(%arg0: i32, %arg1: i32) -> (i32, i32, i32) {
    %c0_i32 = arith.constant 0 : i32
    %c0_i32_0 = arith.constant 0 : i32
    %c0_i32_1 = arith.constant 0 : i32
    %c0_i32_2 = arith.constant 0 : i32
    return %c0_i32, %c0_i32_0, %c0_i32_1 : i32, i32, i32
  }
  func.func @transform_8(%arg0: i32, %arg1: i32) -> (i32, i32, i32) {
    %c0_i32 = arith.constant 0 : i32
    %c0_i32_0 = arith.constant 0 : i32
    %c0_i32_1 = arith.constant 0 : i32
    %c0_i32_2 = arith.constant 0 : i32
    return %c0_i32, %c0_i32_0, %c0_i32_1 : i32, i32, i32
  }
  func.func @transform_9(%arg0: i32, %arg1: i32) -> (i32, i32, i32) {
    %c0_i32 = arith.constant 0 : i32
    %c0_i32_0 = arith.constant 0 : i32
    %c0_i32_1 = arith.constant 0 : i32
    %c0_i32_2 = arith.constant 0 : i32
    return %c0_i32, %c0_i32_0, %c0_i32_1 : i32, i32, i32
  }
  func.func @transform_10(%arg0: i32, %arg1: i32) -> (i32, i32) {
    %c0_i32 = arith.constant 0 : i32
    %c0_i32_0 = arith.constant 0 : i32
    %c0_i32_1 = arith.constant 0 : i32
    return %c0_i32, %c0_i32_0 : i32, i32
  }
  func.func @transform_11(%arg0: i32, %arg1: i32) -> (i32, i32) {
    %c0_i32 = arith.constant 0 : i32
    %c0_i32_0 = arith.constant 0 : i32
    %c0_i32_1 = arith.constant 0 : i32
    return %c0_i32, %c0_i32_0 : i32, i32
  }
  func.func @transform_12(%arg0: i32, %arg1: i32) -> (i32, i32, i32) {
    %c0_i32 = arith.constant 0 : i32
    %c0_i32_0 = arith.constant 0 : i32
    %c0_i32_1 = arith.constant 0 : i32
    return %arg0, %c0_i32, %c0_i32_0 : i32, i32, i32
  }
}

</mosaic_0001>

<bundles_post_ra>
// kernel: dit_llama_forward.1
= control target key start
LH: loop header
LB: loop body
LE: loop exit
PB: predicated region body
PF: predicated region fallthrough
CT: control target
= control target key end

     0   :  { %s6237_s0 = inlined_call_operand.vmem [shape: f32[2,65,3], index: 0, kind: input, shape index: {}]   ;;  %s6238_s1 = inlined_call_operand.vmem [shape: f32[3,48], index: 1, kind: input, shape index: {}]   ;;  %s6239_s2 = inlined_call_operand.vmem [shape: f32[65,48], index: 2, kind: input, shape index: {}]   ;;  %s6240_s3 = inlined_call_operand.vmem [shape: f32[65,48], index: 3, kind: input, shape index: {}]   ;;  %s6241_s4 = inlined_call_operand.vmem [shape: f32[65,48], index: 4, kind: input, shape index: {}]   ;;  %s6242_s5 = inlined_call_operand.vmem [shape: f32[10,48,48], index: 5, kind: input, shape index: {}]   ;;  %s6243_s6 = inlined_call_operand.vmem [shape: f32[4,24,48], index: 6, kind: input, shape index: {}]   ;;  %s6244_s7 = inlined_call_operand.vmem [shape: f32[2,48,256], index: 7, kind: input, shape index: {}]   ;;  %s6245_s8 = inlined_call_operand.vmem [shape: f32[2,128,48], index: 8, kind: input, shape index: {}]   ;;  %s6246_s9 = inlined_call_operand.vmem [shape: f32[2,8,48], index: 9, kind: input, shape index: {}]   ;;  %s6247_s10 = inlined_call_operand.vmem [shape: f32[48,16], index: 10, kind: input, shape index: {}]   ;;  %s6248_s11 = inlined_call_operand.vmem [shape: f32[1,16], index: 11, kind: input, shape index: {}]   ;;  %s6249_s12 = inlined_call_operand.hbm [shape: f32[2,1,16], index: 12, kind: output, shape index: {}]  }
   0x1   :  { %6253 = sst [smem:[#allocation10_spill]] %s6237_s0 }
   0x2   :  { %6254 = sst [smem:[#allocation11_spill]] %s6238_s1 }
   0x3   :  { %17 = vsyncpa [#allocation4], 0 }
   0x4   :  { %19 = vsyncpa [#allocation4 + $0x1], 0  ;;  %s4784_s21 = smov 0   ;;  %s4786_s22 = smov 0  }
   0x5   :  { %s4788_s23 = smov 0   ;;  %s4790_s24 = smov 0  }
   0x6   :  { %s4792_s25 = smov 0   ;;  %s4794_s26 = smov 0  }
   0x7   :  { %s4796_s27 = smov 0   ;;  %s4798_s28 = smov 0  }
   0x8 LB: > { %6255 = sst [smem:[#allocation6_spill]] %s4681_s21  ;;  %s3378_s29 = sadd.s32 4294967295, %s4709_s28   ;;  %s4709_s28 = sphi %s4798_s28, %s25_s28   ;;  %s4705_s27 = sphi %s4796_s27, %s6271_s27   ;;  %s4701_s26 = sphi %s4794_s26, %s6265_s26   ;;  %s4697_s25 = sphi %s4792_s25, %s6270_s25   ;;  %s4693_s24 = sphi %s4790_s24, %s6264_s24   ;;  %s4689_s23 = sphi %s4788_s23, %s6269_s23   ;;  %s4685_s22 = sphi %s4786_s22, %s6268_s22   ;;  %s4681_s21 = sphi %s4784_s21, %s6267_s21  }
   0x9   : > { %6256 = sst [smem:[#allocation7_spill]] %s4701_s26  ;;  %s3379_s30 = sadd.s32 4294967294, %s4709_s28  }
   0xa   : > { %s34_s13 = sadd.s32 1, %s4701_s26  ;;  %s37_s14 = sadd.s32 1, %s4705_s27 }
   0xb   : > { %p35_p0 = scmp.ge.s32.totalorder %s34_s13, 2  ;;  %p311_p1 = scmp.ne.s32.totalorder %s4689_s23, %s4685_s22 }
   0xc   : > { %p312_p2 = scmp.eq.s32.totalorder %s3378_s29, 3  ;;  %p317_p4 = scmp.ne.s32.totalorder %s4685_s22, %s4681_s21 }
   0xd   : > { %s6273_s13 = smov (%p35_p0, %s34_s13), 0  ;;  %s6275_s14 = smov (!%p35_p0, %s37_s14), %s4705_s27 }
   0xe   : > { %6257 = sst [smem:[#allocation8_spill]] %s6273_s13  ;;  %p4833_p3 = por %p312_p2, %p311_p1 }
   0xf   : > { %p39_p5 = scmp.ge.s32.totalorder %s6275_s14, 2  ;;  %p318_p6 = scmp.eq.s32.totalorder %s3379_s30, 3 }
  0x10   : > { %p3382_p7 = scmp.ge.s32.totalorder %s4709_s28, 1  ;;  %p377_p8 = scmp.lt.s32.totalorder %s4709_s28, 5 }
  0x11   : > { %s6277_s14 = smov (%p39_p5, %s6275_s14), 0  ;;  %p4843_p9 = por %p318_p6, %p317_p4 }
  0x12   : > { %6259 = sst [smem:[#allocation9_spill]] %s6277_s14  ;;  %p378_p10 = pnand %p3382_p7, %p377_p8 }
  0x13   : > { %s298_s17 = ssub.s32 %s4705_s27, %s6277_s14  ;;  %s301_s18 = sadd.s32 1, %s4689_s23 }
  0x14   : > { %p299_p11 = scmp.eq.s32.totalorder %s298_s17, 0  ;;  %381 = sbr.rel (%p378_p10) target bundleno = 2806 (0xaf6), region = 68 }
  0x15   : > { %s416_s20 = sand.u32 (!%p378_p10), 1, %s4685_s22   ;;  %p418_p12 = scmp.lt.s32.totalorder (!%p378_p10), %s4697_s25, 1 }
  0x16   : > { %s4851_s19 = scalar_select %p299_p11, %s4689_s23, %s301_s18  }
  0x17   : > { %s6261_s0 = sld [smem:[#allocation10_spill]] (!%p378_p10)  ;;  %s4863_s14 = scalar_lea.vmem (!%p378_p10), [#allocation3], %s416_s20 }
  0x18   : > { %p3384_p13 = scmp.ne.s32.totalorder (!%p378_p10), %s4693_s24, 0 }
  0x19   : > { %s419_s29 = scalar_select %p418_p12, %s4697_s25, 1 }
  0x1a   : > { %426 = sbr.rel (%p3384_p13) target bundleno = 246 (0xf6), region = 72  ;;  %s6262_s1 = sld [smem:[#allocation11_spill]] (!%p3384_p13) }
  0x1b   : > { %s4348_s30 = smul.u32 72, %s419_s29 }
  0x1d   : > { %s4859_s21 = scalar_lea.vmem %s6261_s0, %s4348_s30 }
  0x1f   : > { %vm474_vm0 = vcmask 1042432   ;;  %v427_v1 = vld [vmem:[%s4859_s21] sm:$0xff]  ;;  %v4711_v2 = vmov 0.0   ;;  %vm4712_vm1 = vmmov 0   ;;  %vm446_vm2 = vcmask 23552   ;;  %v432_v3 = vld [vmem:[%s4859_s21 + $0x28] sm:$0xff] }
  0x20   : > { %v436_v0 = vld [vmem:[%s6262_s1] sm:$0x7]  ;;  %3790 = vmatprep.subr.mxu0 %v4711_v2  ;;  %3792 = vmatprep.mubr.msk.f32.mxu0 %vm4712_vm1, %v4711_v2  ;;  %v428_v4 = vld [vmem:[%s4859_s21 + $0x8] sm:$0xff]  ;;  %v433_v5 = vld [vmem:[%s4859_s21 + $0x30] sm:$0xff]  ;;  %vm588_vm3 = vcmask 392192   ;;  %vm597_vm4 = vcmask 385024  }
  0x21   : > { %3791 = vmatpush3.msk.msra.mxu0 %vm474_vm0, %v436_v0  ;;  %4334 = vmatprep.subr.mxu1 %v4711_v2  ;;  %v429_v6 = vld [vmem:[%s4859_s21 + $0x10] sm:$0xff]  ;;  %v434_v7 = vld [vmem:[%s4859_s21 + $0x38] sm:$0xff]  ;;  %v435_v9 = vld [vmem:[%s4859_s21 + $0x40] sm:$0x1] }
  0x22   : > { %3793 = vmatmul.mubr.msk.f32.vlgmr.msra.gmra.mxu0 %vm446_vm2, %v427_v1  ;;  %4335 = vmatpush3.msk.msra.mxu1 %vm474_vm0, %v436_v0  ;;  %v430_v8 = vld [vmem:[%s4859_s21 + $0x18] sm:$0xff]  ;;  %v431_v10 = vld [vmem:[%s4859_s21 + $0x20] sm:$0xff]  ;;  %v442_v13 = vld [vmem:[%s6239_s2 + $0x28] sm:$0xff] }
  0x23   : > { %3807 = vmatprep.mubr.msk.f32.mxu1 %vm4712_vm1, %v4711_v2  ;;  %3795 = vmatprep.mubr.msk.f32.mxu0 %vm4712_vm1, %v4711_v2  ;;  %v437_v11 = vld [vmem:[%s6239_s2] sm:$0xff]  ;;  %v438_v17 = vld [vmem:[%s6239_s2 + $0x8] sm:$0xff]  ;;  %v443_v21 = vld [vmem:[%s6239_s2 + $0x30] sm:$0xff] }
  0x24   : > { %3808 = vmatmul.mubr.msk.f32.vlgmr.msra.gmra.mxu1 %vm446_vm2, %v432_v3  ;;  %v439_v25 = vld [vmem:[%s6239_s2 + $0x10] sm:$0xff]  ;;  %v444_v29 = vld [vmem:[%s6239_s2 + $0x38] sm:$0xff]  ;;  %v445_v37 = vld [vmem:[%s6239_s2 + $0x40] sm:$0x1] }
  0x25   : > { %3810 = vmatprep.mubr.msk.f32.mxu1 %vm4712_vm1, %v4711_v2  ;;  %v440_v33 = vld [vmem:[%s6239_s2 + $0x18] sm:$0xff]  ;;  %v441_v41 = vld [vmem:[%s6239_s2 + $0x20] sm:$0xff] }
  0x26   : > { %3796 = vmatmul.mubr.msk.f32.gmra.mxu0 %vm446_vm2, %v428_v4 }
  0x27   : > { %3798 = vmatprep.mubr.msk.f32.mxu0 %vm4712_vm1, %v4711_v2 }
  0x28   : > { %3811 = vmatmul.mubr.msk.f32.gmra.mxu1 %vm446_vm2, %v433_v5 }
  0x29   : > { %3813 = vmatprep.mubr.msk.f32.mxu1 %vm4712_vm1, %v4711_v2 }
  0x2a   : > { %3799 = vmatmul.mubr.msk.f32.gmra.mxu0 %vm446_vm2, %v429_v6 }
  0x2b   : > { %3801 = vmatprep.mubr.msk.f32.mxu0 %vm4712_vm1, %v4711_v2 }
  0x2c   : > { %3814 = vmatmul.mubr.msk.f32.gmra.mxu1 %vm446_vm2, %v434_v7 }
  0x2d   : > { %3816 = vmatprep.mubr.msk.f32.mxu1 %vm4712_vm1, %v4711_v2 }
  0x2e   : > { %3802 = vmatmul.mubr.msk.f32.gmra.mxu0 %vm446_vm2, %v430_v8 }
  0x2f   : > { %3804 = vmatprep.mubr.msk.f32.mxu0 %vm4712_vm1, %v4711_v2 }
  0x30   : > { %3817 = vmatmul.mubr.msk.f32.gmra.mxu1 %vm446_vm2, %v435_v9 }
  0x32   : > { %3805 = vmatmul.mubr.msk.f32.gmra.mxu0 %vm446_vm2, %v431_v10 }
  0xe2   : > { %v544_v12 = vpop.f32.mrf.mxu0 }
  0xe3   : > { %v545_v14 = vadd.f32 %v544_v12, %v437_v11 }
  0xe4   : > { %v3794_v15 = vpop.f32.mrf.mxu0  ;;  %v569_v16 = vpop.f32.mrf.mxu1 }
  0xe5   : > { %589 = vst.msk [vmem:[#allocation2] sm:$0xff] %vm588_vm3, %v545_v14  ;;  %v570_v18 = vadd.f32 %v569_v16, %v442_v13 }
  0xe6   : > { %v549_v19 = vpop.f32.mrf.mxu0  ;;  %v3809_v20 = vpop.f32.mrf.mxu1 }
  0xe7   : > { %594 = vst.msk [vmem:[#allocation2 + $0x28] sm:$0xff] %vm588_vm3, %v570_v18  ;;  %v550_v22 = vadd.f32 %v549_v19, %v438_v17 }
  0xe8   : > { %v3797_v23 = vpop.f32.mrf.mxu0  ;;  %v574_v24 = vpop.f32.mrf.mxu1 }
  0xe9   : > { %590 = vst.msk [vmem:[#allocation2 + $0x8] sm:$0xff] %vm588_vm3, %v550_v22  ;;  %v575_v26 = vadd.f32 %v574_v24, %v443_v21 }
  0xea   : > { %v554_v27 = vpop.f32.mrf.mxu0  ;;  %v3812_v28 = vpop.f32.mrf.mxu1 }
  0xeb   : > { %595 = vst.msk [vmem:[#allocation2 + $0x30] sm:$0xff] %vm588_vm3, %v575_v26  ;;  %v555_v30 = vadd.f32 %v554_v27, %v439_v25 }
  0xec   : > { %v3800_v31 = vpop.f32.mrf.mxu0  ;;  %v579_v32 = vpop.f32.mrf.mxu1 }
  0xed   : > { %591 = vst.msk [vmem:[#allocation2 + $0x10] sm:$0xff] %vm588_vm3, %v555_v30  ;;  %v580_v34 = vadd.f32 %v579_v32, %v444_v29 }
  0xee   : > { %v559_v35 = vpop.f32.mrf.mxu0  ;;  %v3815_v36 = vpop.f32.mrf.mxu1 }
  0xef   : > { %596 = vst.msk [vmem:[#allocation2 + $0x38] sm:$0xff] %vm588_vm3, %v580_v34  ;;  %v560_v38 = vadd.f32 %v559_v35, %v440_v33 }
  0xf0   : > { %v3803_v39 = vpop.f32.mrf.mxu0  ;;  %v584_v40 = vpop.f32.mrf.mxu1 }
  0xf1   : > { %592 = vst.msk [vmem:[#allocation2 + $0x18] sm:$0xff] %vm588_vm3, %v560_v38  ;;  %v585_v42 = vadd.f32 %v584_v40, %v445_v37 }
  0xf2   : > { %v564_v43 = vpop.f32.mrf.mxu0  ;;  %v3818_v44 = vpop.f32.mrf.mxu1 }
  0xf3   : > { %598 = vst.msk [vmem:[#allocation2 + $0x40] sm:$0x1] %vm597_vm4, %v585_v42  ;;  %v565_v45 = vadd.f32 %v564_v43, %v441_v41 }
  0xf4   : > { %v3806_v46 = vpop.f32.mrf.mxu0 }
  0xf5   : > { %593 = vst.msk [vmem:[#allocation2 + $0x20] sm:$0xff] %vm588_vm3, %v565_v45 }
  0xf6 PF: > { %v4931_v47 = vld [vmem:[#allocation2 + $0x28] sm:$0xff]  ;;  %vm620_vm5 = vcmask 392192   ;;  %v4933_v48 = vld [vmem:[#allocation2 + $0x38] sm:$0xff]  ;;  %v4935_v49 = vld [vmem:[#allocation2 + $0x30] sm:$0xff]  ;;  %vm645_vm6 = vcmask 385024   ;;  %s3396_s17 = smul.u32 240, %s4693_s24  ;;  %v686_v27 = vlaneseq }
  0xf7   : > { %v616_v50 = vmul.f32 %v4931_v47, %v4931_v47  ;;  %v618_v51 = vmul.f32 %v4933_v48, %v4933_v48  ;;  %v617_v52 = vmul.f32 %v4935_v49, %v4935_v49  ;;  %v4947_v55 = vld [vmem:[#allocation2] sm:$0xff]  ;;  %v4949_v56 = vld [vmem:[#allocation2 + $0x8] sm:$0xff]  ;;  %v4959_v63 = vld [vmem:[#allocation2 + $0x10] sm:$0xff]  ;;  %v4713_v10 = vmov 0.0   ;;  %s3395_s13 = sshll.u32 %s4693_s24, 3  ;;  %s4715_s18 = smov 104  }
  0xf8   : > { %v611_v61 = vmul.f32 %v4947_v55, %v4947_v55  ;;  %v612_v62 = vmul.f32 %v4949_v56, %v4949_v56  ;;  %v4961_v0 = vld [vmem:[#allocation2 + $0x18] sm:$0xff]  ;;  %v613_v3 = vmul.f32 %v4959_v63, %v4959_v63  ;;  %s4980_s26 = scalar_lea.vmem %s6242_s5, %s3396_s17  ;;  %4336 = vmatprep.subr.mxu1 %v4713_v10  ;;  %3819 = vmatprep.subr.mxu0 %v4713_v10  ;;  %vm4714_vm7 = vmmov 0   ;;  %s5012_s17 = scalar_lea.vmem %s6246_s9, %s3395_s13 }
  0xf9   : > { %v636_v57 = vsel %vm620_vm5, %v616_v50, 0.0  ;;  %v642_v58 = vsel %vm620_vm5, %v618_v51, 0.0  ;;  %v639_v59 = vsel %vm620_vm5, %v617_v52, 0.0  ;;  %v614_v4 = vmul.f32 %v4961_v0, %v4961_v0  ;;  %v707_v11 = vld [vmem:[%s4980_s26 + $0x28] sm:$0xff]  ;;  %v706_v12 = vld [vmem:[%s4980_s26 + $0x20] sm:$0xff]  ;;  %v705_v13 = vld [vmem:[%s4980_s26 + $0x18] sm:$0xff]  ;;  %3846 = vmatprep.mubr.msk.f32.mxu1 %vm4714_vm7, %v4713_v10  ;;  %3831 = vmatprep.mubr.msk.f32.mxu0 %vm4714_vm7, %v4713_v10 }
  0xfa   : > { %v4943_v53 = vld [vmem:[#allocation2 + $0x40] sm:$0x1]  ;;  %637 = vadd.xlane.f32.xlu0 %v636_v57  ;;  %643 = vadd.xlane.f32.xlu1 %v642_v58  ;;  %v621_v1 = vsel %vm620_vm5, %v611_v61, 0.0  ;;  %v624_v2 = vsel %vm620_vm5, %v612_v62, 0.0  ;;  %v627_v6 = vsel %vm620_vm5, %v613_v3, 0.0  ;;  %v704_v14 = vld [vmem:[%s4980_s26 + $0x10] sm:$0xff] }
  0xfb   : > { %v619_v54 = vmul.f32 %v4943_v53, %v4943_v53  ;;  %v630_v7 = vsel %vm620_vm5, %v614_v4, 0.0  ;;  %4342 = vmatpush3.msra.mxu1 %v707_v11  ;;  %3820 = vmatpush3.msra.mxu0 %v707_v11  ;;  %v703_v15 = vld [vmem:[%s4980_s26 + $0x8] sm:$0xff]  ;;  %v702_v16 = vld [vmem:[%s4980_s26] sm:$0xff]  ;;  %v5007_v34 = vshrl.u32 %v686_v27, 7  ;;  %v3411_v62 = vld [vmem:[%s4980_s26 + $0x50] sm:$0xff]  ;;  %vm1393_vm8 = vcmask 195584  }
  0xfc   : > { %v4969_v5 = vld [vmem:[#allocation2 + $0x20] sm:$0xff]  ;;  %4337 = vmatprep.subr.mxu1 %v4713_v10  ;;  %3821 = vmatprep.subr.mxu0 %v4713_v10  ;;  %v3410_v3 = vld [vmem:[%s4980_s26 + $0x48] sm:$0xff]  ;;  %vm1668_vm9 = vcmask 1040384   ;;  %vm1558_vm10 = vcmask 531456   ;;  %vm1583_vm11 = vcmask 524288   ;;  %s3499_s21 = smul.u32 48, %s4693_s24 }
  0xfd   : > { %v646_v60 = vsel %vm645_vm6, %v619_v54, 0.0  ;;  %v615_v8 = vmul.f32 %v4969_v5, %v4969_v5  ;;  %4343 = vmatpush3.msra.mxu1 %v706_v12  ;;  %3822 = vmatpush3.msra.mxu0 %v706_v12  ;;  %v688_v41 = vsub.s32 0, %v5007_v34  ;;  %v610_v42 = vld [vmem:[%s5012_s17] sm:$0xff]  ;;  %v3428_v12 = vld [vmem:[%s4980_s26 + $0x88] sm:$0xff]  ;;  %p3571_p0 = scmp.ne.s32.totalorder %s4693_s24, 1 }
  0xfe   : > { %640 = vadd.xlane.f32.xlu0 %v639_v59  ;;  %647 = vadd.xlane.f32.xlu1 %v646_v60  ;;  %v3412_v59 = vld [vmem:[%s4980_s26 + $0x58] sm:$0xff]  ;;  %v3442_v27 = vld [vmem:[%s4980_s26 + $0xa8] sm:$0xff]  ;;  %s5773_s29 = scalar_lea.vmem %s6243_s6, %s3499_s21 }
  0xff   : > { %v633_v9 = vsel %vm620_vm5, %v615_v8, 0.0  ;;  %4338 = vmatprep.subr.mxu1 %v4713_v10  ;;  %3823 = vmatprep.subr.mxu0 %v4713_v10  ;;  %v5016_v46 = vrot.slane %v610_v42, %v688_v41 }
 0x100   : > { %4344 = vmatpush3.msra.mxu1 %v705_v13  ;;  %3824 = vmatpush3.msra.mxu0 %v705_v13  ;;  %v3408_v13 = vld [vmem:[%s4980_s26 + $0x38] sm:$0xff] }
 0x101   : > { %4339 = vmatprep.subr.mxu1 %v4713_v10  ;;  %3825 = vmatprep.subr.mxu0 %v4713_v10 }
 0x102   : > { %622 = vadd.xlane.f32.xlu0 %v621_v1  ;;  %625 = vadd.xlane.f32.xlu1 %v624_v2 }
 0x103   : > { %4345 = vmatpush3.msra.mxu1 %v704_v14  ;;  %3826 = vmatpush3.msra.mxu0 %v704_v14 }
 0x104   : > { %4340 = vmatprep.subr.mxu1 %v4713_v10  ;;  %3827 = vmatprep.subr.mxu0 %v4713_v10 }
 0x105   : > { %4346 = vmatpush3.msra.mxu1 %v703_v15  ;;  %3828 = vmatpush3.msra.mxu0 %v703_v15 }
 0x106   : > { %628 = vadd.xlane.f32.xlu0 %v627_v6  ;;  %631 = vadd.xlane.f32.xlu1 %v630_v7  ;;  %v3409_v7 = vld [vmem:[%s4980_s26 + $0x40] sm:$0xff] }
 0x107   : > { %4341 = vmatprep.subr.mxu1 %v4713_v10  ;;  %3829 = vmatprep.subr.mxu0 %v4713_v10 }
 0x108   : > { %4347 = vmatpush3.msra.mxu1 %v702_v16  ;;  %3830 = vmatpush3.msra.mxu0 %v702_v16  ;;  %v3407_v16 = vld [vmem:[%s4980_s26 + $0x30] sm:$0xff] }
 0x109   : > { %3858 = vmatprep.subr.mxu1 %v4713_v10  ;;  %3897 = vmatprep.subr.mxu0 %v4713_v10 }
 0x10a   : > { %634 = vadd.xlane.f32.xlu0 %v633_v9 }
 0x183   : > { %v638_v17 = vpop.xlane.xlu0 %637  ;;  %v644_v18 = vpop.xlane.xlu1 %643 }
 0x184   : > { %v655_v19 = vmul.f32 0.020833334, %v638_v17  ;;  %v657_v20 = vmul.f32 0.020833334, %v644_v18  ;;  %v3427_v17 = vld [vmem:[%s4980_s26 + $0x80] sm:$0xff] }
 0x186   : > { %v664_v21 = vadd.f32 1e-05, %v655_v19  ;;  %v666_v22 = vadd.f32 1e-05, %v657_v20  ;;  %v3444_v20 = vld [vmem:[%s4980_s26 + $0xb8] sm:$0xff] }
 0x187   : > { %v641_v23 = vpop.xlane.xlu0 %640  ;;  %v648_v24 = vpop.xlane.xlu1 %647 }
 0x188   : > { %4427 = vrsqrt.f32 %v664_v21  ;;  %v656_v25 = vmul.f32 0.020833334, %v641_v23  ;;  %v658_v26 = vmul.f32 0.020833334, %v648_v24  ;;  %v3426_v21 = vld [vmem:[%s4980_s26 + $0x78] sm:$0xff]  ;;  %v3425_v23 = vld [vmem:[%s4980_s26 + $0x70] sm:$0xff] }
 0x189   : > { %4429 = vrsqrt.f32 %v666_v22 }
 0x18a   : > { %v665_v28 = vadd.f32 1e-05, %v656_v25  ;;  %v667_v29 = vadd.f32 1e-05, %v658_v26  ;;  %v3424_v25 = vld [vmem:[%s4980_s26 + $0x68] sm:$0xff]  ;;  %v3423_v26 = vld [vmem:[%s4980_s26 + $0x60] sm:$0xff] }
 0x18b   : > { %v623_v30 = vpop.xlane.xlu0 %622  ;;  %v626_v31 = vpop.xlane.xlu1 %625 }
 0x18c   : > { %4431 = vrsqrt.f32 %v665_v28  ;;  %v650_v32 = vmul.f32 0.020833334, %v623_v30  ;;  %v651_v33 = vmul.f32 0.020833334, %v626_v31  ;;  %v3441_v28 = vld [vmem:[%s4980_s26 + $0xa0] sm:$0xff]  ;;  %v3440_v30 = vld [vmem:[%s4980_s26 + $0x98] sm:$0xff] }
 0x18d   : > { %4433 = vrsqrt.f32 %v667_v29  ;;  %v3460_v29 = vld [vmem:[%s4980_s26 + $0xe8] sm:$0xff]  ;;  %v3459_v31 = vld [vmem:[%s4980_s26 + $0xe0] sm:$0xff] }
 0x18e   : > { %v659_v35 = vadd.f32 1e-05, %v650_v32  ;;  %v660_v36 = vadd.f32 1e-05, %v651_v33  ;;  %v3439_v32 = vld [vmem:[%s4980_s26 + $0x90] sm:$0xff]  ;;  %v3458_v33 = vld [vmem:[%s4980_s26 + $0xd8] sm:$0xff] }
 0x18f   : > { %v629_v37 = vpop.xlane.xlu0 %628  ;;  %v632_v38 = vpop.xlane.xlu1 %631 }
 0x190   : > { %4435 = vrsqrt.f32 %v659_v35  ;;  %v652_v39 = vmul.f32 0.020833334, %v629_v37  ;;  %v653_v40 = vmul.f32 0.020833334, %v632_v38  ;;  %v3457_v35 = vld [vmem:[%s4980_s26 + $0xd0] sm:$0xff]  ;;  %v3455_v37 = vld [vmem:[%s4980_s26 + $0xc0] sm:$0xff] }
 0x191   : > { %4437 = vrsqrt.f32 %v660_v36  ;;  %v3456_v36 = vld [vmem:[%s4980_s26 + $0xc8] sm:$0xff] }
 0x192   : > { %v661_v43 = vadd.f32 1e-05, %v652_v39  ;;  %v662_v44 = vadd.f32 1e-05, %v653_v40 }
 0x193   : > { %v635_v45 = vpop.xlane.xlu0 %634 }
 0x194   : > { %4439 = vrsqrt.f32 %v661_v43  ;;  %v654_v50 = vmul.f32 0.020833334, %v635_v45 }
 0x195   : > { %v4428_v51 = vpop.eup %4427  ;;  %4441 = vrsqrt.f32 %v662_v44 }
 0x196   : > { %v682_v52 = vmul.f32 %v4428_v51, %v4931_v47  ;;  %v663_v54 = vadd.f32 1e-05, %v654_v50  ;;  %v4430_v57 = vpop.eup %4429 }
 0x197   : > { %v684_v1 = vmul.f32 %v4430_v57, %v4933_v48  ;;  %v5296_v57 = vld [vmem:[%s6241_s4] sm:$0xff] }
 0x198   : > { %v5020_v58 = vmul.f32 %v5016_v46, %v682_v52  ;;  %4443 = vrsqrt.f32 %v663_v54 }
 0x199   : > { %v4432_v60 = vpop.eup %4431 }
 0x19a   : > { %3847 = vmatmul.mubr.msk.f32.vlgmr.msra.gmra.mxu1 %vm620_vm5, %v5020_v58  ;;  %v683_v61 = vmul.f32 %v4432_v60, %v4935_v49  ;;  %v4434_v2 = vpop.eup %4433  ;;  %v5040_v49 = vmul.f32 %v5016_v46, %v684_v1 }
 0x19b   : > { %3859 = vmatpush3.msra.mxu1 %v3412_v59  ;;  %3849 = vmatprep.mubr.msk.f32.mxu1 %vm4714_vm7, %v4713_v10  ;;  %v685_v8 = vmul.f32 %v4434_v2, %v4943_v53  ;;  %v5302_v59 = vld [vmem:[%s6240_s3 + $0x8] sm:$0xff] }
 0x19c   : > { %3860 = vmatprep.subr.mxu1 %v4713_v10  ;;  %v5032_v47 = vmul.f32 %v5016_v46, %v683_v61 }
 0x19d   : > { %v4436_v4 = vpop.eup %4435  ;;  %3861 = vmatpush3.msra.mxu1 %v3411_v62 }
 0x19e   : > { %v4438_v6 = vpop.eup %4437  ;;  %3850 = vmatmul.mubr.msk.f32.gmra.mxu1 %vm620_vm5, %v5032_v47  ;;  %3862 = vmatprep.subr.mxu1 %v4713_v10  ;;  %v677_v48 = vmul.f32 %v4436_v4, %v4947_v55 }
 0x19f   : > { %3852 = vmatprep.mubr.msk.f32.mxu1 %vm4714_vm7, %v4713_v10  ;;  %3863 = vmatpush3.msra.mxu1 %v3410_v3  ;;  %v678_v9 = vmul.f32 %v4438_v6, %v4949_v56  ;;  %v5060_v56 = vmul.f32 %v5016_v46, %v685_v8  ;;  %v5316_v6 = vld [vmem:[%s6240_s3 + $0x10] sm:$0xff] }
 0x1a0   : > { %v5048_v11 = vmul.f32 %v5016_v46, %v677_v48  ;;  %3864 = vmatprep.subr.mxu1 %v4713_v10 }
 0x1a1   : > { %v4440_v55 = vpop.eup %4439  ;;  %3865 = vmatpush3.msra.mxu1 %v3409_v7  ;;  %v5057_v53 = vmul.f32 %v5016_v46, %v678_v9 }
 0x1a2   : > { %3832 = vmatmul.mubr.msk.f32.vlgmr.msra.gmra.mxu0 %vm620_vm5, %v5048_v11  ;;  %3853 = vmatmul.mubr.msk.f32.gmra.mxu1 %vm620_vm5, %v5040_v49  ;;  %v679_v14 = vmul.f32 %v4440_v55, %v4959_v63  ;;  %v4442_v15 = vpop.eup %4441 }
 0x1a3   : > { %3834 = vmatprep.mubr.msk.f32.mxu0 %vm4714_vm7, %v4713_v10  ;;  %3855 = vmatprep.mubr.msk.f32.mxu1 %vm4714_vm7, %v4713_v10  ;;  %v680_v18 = vmul.f32 %v4442_v15, %v4961_v0 }
 0x1a4   : > { %3866 = vmatprep.subr.mxu1 %v4713_v10  ;;  %3898 = vmatpush3.msra.mxu0 %v3428_v12  ;;  %v5076_v63 = vmul.f32 %v5016_v46, %v679_v14 }
 0x1a5   : > { %3867 = vmatpush3.msra.mxu1 %v3408_v13  ;;  %3899 = vmatprep.subr.mxu0 %v4713_v10  ;;  %v4444_v19 = vpop.eup %4443  ;;  %v5092_v0 = vmul.f32 %v5016_v46, %v680_v18 }
 0x1a6   : > { %3835 = vmatmul.mubr.msk.f32.gmra.mxu0 %vm620_vm5, %v5057_v53  ;;  %3856 = vmatmul.mubr.msk.f32.gmra.mxu1 %vm620_vm5, %v5060_v56  ;;  %v681_v22 = vmul.f32 %v4444_v19, %v4969_v5  ;;  %v3443_v5 = vld [vmem:[%s4980_s26 + $0xb0] sm:$0xff]  ;;  %v5344_v19 = vld [vmem:[%s6240_s3 + $0x20] sm:$0xff]  ;;  %s3570_s26 = sshll.u32 %s4693_s24, 7 }
 0x1a7   : > { %3868 = vmatprep.subr.mxu1 %v4713_v10  ;;  %3837 = vmatprep.mubr.msk.f32.mxu0 %vm4714_vm7, %v4713_v10 }
 0x1a8   : > { %3869 = vmatpush3.msra.mxu1 %v3407_v16  ;;  %3870 = vmatprep.mubr.msk.f32.mxu1 %vm4714_vm7, %v4713_v10  ;;  %v5109_v24 = vmul.f32 %v5016_v46, %v681_v22  ;;  %v5289_v46 = vld [vmem:[%s6240_s3] sm:$0xff] }
 0x1a9   : > { %3936 = vmatprep.subr.mxu1 %v4713_v10  ;;  %3900 = vmatpush3.msra.mxu0 %v3427_v17 }
 0x1aa   : > { %3838 = vmatmul.mubr.msk.f32.gmra.mxu0 %vm620_vm5, %v5076_v63  ;;  %3871 = vmatmul.mubr.msk.f32.vlgmr.msra.gmra.mxu1 %vm620_vm5, %v5048_v11 }
 0x1ab   : > { %3937 = vmatpush3.msra.mxu1 %v3444_v20  ;;  %3840 = vmatprep.mubr.msk.f32.mxu0 %vm4714_vm7, %v4713_v10 }
 0x1ac   : > { %3873 = vmatprep.mubr.msk.f32.mxu1 %vm4714_vm7, %v4713_v10  ;;  %3901 = vmatprep.subr.mxu0 %v4713_v10 }
 0x1ad   : > { %3902 = vmatpush3.msra.mxu0 %v3426_v21  ;;  %3938 = vmatprep.subr.mxu1 %v4713_v10 }
 0x1ae   : > { %3841 = vmatmul.mubr.msk.f32.gmra.mxu0 %vm620_vm5, %v5092_v0  ;;  %3874 = vmatmul.mubr.msk.f32.gmra.mxu1 %vm620_vm5, %v5057_v53 }
 0x1af   : > { %3903 = vmatprep.subr.mxu0 %v4713_v10  ;;  %3843 = vmatprep.mubr.msk.f32.mxu0 %vm4714_vm7, %v4713_v10 }
 0x1b0   : > { %3876 = vmatprep.mubr.msk.f32.mxu1 %vm4714_vm7, %v4713_v10  ;;  %3904 = vmatpush3.msra.mxu0 %v3425_v23 }
 0x1b1   : > { %3939 = vmatpush3.msra.mxu1 %v3443_v5  ;;  %3905 = vmatprep.subr.mxu0 %v4713_v10  ;;  %v5352_v5 = vld [vmem:[%s6241_s4 + $0x20] sm:$0xff] }
 0x1b2   : > { %3844 = vmatmul.mubr.msk.f32.gmra.mxu0 %vm620_vm5, %v5109_v24  ;;  %3877 = vmatmul.mubr.msk.f32.gmra.mxu1 %vm620_vm5, %v5076_v63 }
 0x1b3   : > { %3906 = vmatpush3.msra.mxu0 %v3424_v25  ;;  %3879 = vmatprep.mubr.msk.f32.mxu1 %vm4714_vm7, %v4713_v10 }
 0x1b4   : > { %3907 = vmatprep.subr.mxu0 %v4713_v10  ;;  %3909 = vmatprep.mubr.msk.f32.mxu0 %vm4714_vm7, %v4713_v10 }
 0x1b5   : > { %3908 = vmatpush3.msra.mxu0 %v3423_v26  ;;  %3940 = vmatprep.subr.mxu1 %v4713_v10 }
 0x1b6   : > { %3880 = vmatmul.mubr.msk.f32.gmra.mxu1 %vm620_vm5, %v5092_v0  ;;  %3910 = vmatmul.mubr.msk.f32.vlgmr.msra.gmra.mxu0 %vm620_vm5, %v5048_v11 }
 0x1b7   : > { %3941 = vmatpush3.msra.mxu1 %v3442_v27  ;;  %3882 = vmatprep.mubr.msk.f32.mxu1 %vm4714_vm7, %v4713_v10 }
 0x1b8   : > { %3912 = vmatprep.mubr.msk.f32.mxu0 %vm4714_vm7, %v4713_v10  ;;  %3942 = vmatprep.subr.mxu1 %v4713_v10 }
 0x1b9   : > { %3943 = vmatpush3.msra.mxu1 %v3441_v28  ;;  %3975 = vmatprep.subr.mxu0 %v4713_v10 }
 0x1ba   : > { %3883 = vmatmul.mubr.msk.f32.gmra.mxu1 %vm620_vm5, %v5109_v24  ;;  %3913 = vmatmul.mubr.msk.f32.gmra.mxu0 %vm620_vm5, %v5057_v53 }
 0x1bb   : > { %3885 = vmatprep.mubr.msk.f32.mxu1 %vm4714_vm7, %v4713_v10  ;;  %3915 = vmatprep.mubr.msk.f32.mxu0 %vm4714_vm7, %v4713_v10 }
 0x1bc   : > { %3944 = vmatprep.subr.mxu1 %v4713_v10  ;;  %3976 = vmatpush3.msra.mxu0 %v3460_v29  ;;  %v5363_v29 = vld [vmem:[%s6240_s3 + $0x28] sm:$0xff] }
 0x1bd   : > { %3945 = vmatpush3.msra.mxu1 %v3440_v30  ;;  %3977 = vmatprep.subr.mxu0 %v4713_v10 }
 0x1be   : > { %3886 = vmatmul.mubr.msk.f32.gmra.mxu1 %vm620_vm5, %v5020_v58  ;;  %3916 = vmatmul.mubr.msk.f32.gmra.mxu0 %vm620_vm5, %v5076_v63 }
 0x1bf   : > { %3888 = vmatprep.mubr.msk.f32.mxu1 %vm4714_vm7, %v4713_v10  ;;  %3918 = vmatprep.mubr.msk.f32.mxu0 %vm4714_vm7, %v4713_v10 }
 0x1c0   : > { %3946 = vmatprep.subr.mxu1 %v4713_v10  ;;  %3978 = vmatpush3.msra.mxu0 %v3459_v31 }
 0x1c1   : > { %3947 = vmatpush3.msra.mxu1 %v3439_v32  ;;  %3979 = vmatprep.subr.mxu0 %v4713_v10  ;;  %v5368_v32 = vld [vmem:[%s6241_s4 + $0x28] sm:$0xff] }
 0x1c2   : > { %3889 = vmatmul.mubr.msk.f32.gmra.mxu1 %vm620_vm5, %v5032_v47  ;;  %3919 = vmatmul.mubr.msk.f32.gmra.mxu0 %vm620_vm5, %v5092_v0 }
 0x1c3   : > { %3891 = vmatprep.mubr.msk.f32.mxu1 %vm4714_vm7, %v4713_v10  ;;  %3921 = vmatprep.mubr.msk.f32.mxu0 %vm4714_vm7, %v4713_v10 }
 0x1c4   : > { %3980 = vmatpush3.msra.mxu0 %v3458_v33  ;;  %4014 = vmatprep.subr.mxu1 %v4713_v10 }
 0x1c5   : > { %3981 = vmatprep.subr.mxu0 %v4713_v10 }
 0x1c6   : > { %3892 = vmatmul.mubr.msk.f32.gmra.mxu1 %vm620_vm5, %v5040_v49  ;;  %3922 = vmatmul.mubr.msk.f32.gmra.mxu0 %vm620_vm5, %v5109_v24 }
 0x1c7   : > { %3894 = vmatprep.mubr.msk.f32.mxu1 %vm4714_vm7, %v4713_v10  ;;  %3924 = vmatprep.mubr.msk.f32.mxu0 %vm4714_vm7, %v4713_v10 }
 0x1c8   : > { %3982 = vmatpush3.msra.mxu0 %v3457_v35 }
 0x1c9   : > { %3983 = vmatprep.subr.mxu0 %v4713_v10 }
 0x1ca   : > { %3895 = vmatmul.mubr.msk.f32.gmra.mxu1 %vm620_vm5, %v5060_v56  ;;  %3925 = vmatmul.mubr.msk.f32.gmra.mxu0 %vm620_vm5, %v5020_v58 }
 0x1cb   : > { %3927 = vmatprep.mubr.msk.f32.mxu0 %vm4714_vm7, %v4713_v10  ;;  %3948 = vmatprep.mubr.msk.f32.mxu1 %vm4714_vm7, %v4713_v10 }
 0x1cc   : > { %3984 = vmatpush3.msra.mxu0 %v3456_v36 }
 0x1cd   : > { %3985 = vmatprep.subr.mxu0 %v4713_v10 }
 0x1ce   : > { %3928 = vmatmul.mubr.msk.f32.gmra.mxu0 %vm620_vm5, %v5032_v47  ;;  %3949 = vmatmul.mubr.msk.f32.vlgmr.msra.gmra.mxu1 %vm620_vm5, %v5048_v11 }
 0x1cf   : > { %3930 = vmatprep.mubr.msk.f32.mxu0 %vm4714_vm7, %v4713_v10  ;;  %3951 = vmatprep.mubr.msk.f32.mxu1 %vm4714_vm7, %v4713_v10 }
 0x1d0   : > { %3986 = vmatpush3.msra.mxu0 %v3455_v37 }
 0x1d1   : > { %4059 = vmatprep.subr.mxu0 %v4713_v10 }
 0x1d2   : > { %3931 = vmatmul.mubr.msk.f32.gmra.mxu0 %vm620_vm5, %v5040_v49  ;;  %3952 = vmatmul.mubr.msk.f32.gmra.mxu1 %vm620_vm5, %v5057_v53 }
 0x1d3   : > { %3933 = vmatprep.mubr.msk.f32.mxu0 %vm4714_vm7, %v4713_v10  ;;  %3954 = vmatprep.mubr.msk.f32.mxu1 %vm4714_vm7, %v4713_v10 }
 0x1d6   : > { %3934 = vmatmul.mubr.msk.f32.gmra.mxu0 %vm620_vm5, %v5060_v56  ;;  %3955 = vmatmul.mubr.msk.f32.gmra.mxu1 %vm620_vm5, %v5076_v63 }
 0x1d7   : > { %3957 = vmatprep.mubr.msk.f32.mxu1 %vm4714_vm7, %v4713_v10  ;;  %3987 = vmatprep.mubr.msk.f32.mxu0 %vm4714_vm7, %v4713_v10 }
 0x1da   : > { %3958 = vmatmul.mubr.msk.f32.gmra.mxu1 %vm620_vm5, %v5092_v0  ;;  %3988 = vmatmul.mubr.msk.f32.vlgmr.msra.gmra.mxu0 %vm620_vm5, %v5048_v11  ;;  %v5322_v11 = vld [vmem:[%s6241_s4 + $0x10] sm:$0xff] }
 0x1db   : > { %3960 = vmatprep.mubr.msk.f32.mxu1 %vm4714_vm7, %v4713_v10  ;;  %3990 = vmatprep.mubr.msk.f32.mxu0 %vm4714_vm7, %v4713_v10 }
 0x1de   : > { %3961 = vmatmul.mubr.msk.f32.gmra.mxu1 %vm620_vm5, %v5109_v24  ;;  %3991 = vmatmul.mubr.msk.f32.gmra.mxu0 %vm620_vm5, %v5057_v53  ;;  %v5330_v53 = vld [vmem:[%s6240_s3 + $0x18] sm:$0xff] }
 0x1df   : > { %3963 = vmatprep.mubr.msk.f32.mxu1 %vm4714_vm7, %v4713_v10  ;;  %3993 = vmatprep.mubr.msk.f32.mxu0 %vm4714_vm7, %v4713_v10 }
 0x1e2   : > { %3964 = vmatmul.mubr.msk.f32.gmra.mxu1 %vm620_vm5, %v5020_v58  ;;  %3994 = vmatmul.mubr.msk.f32.gmra.mxu0 %vm620_vm5, %v5076_v63  ;;  %v5336_v63 = vld [vmem:[%s6241_s4 + $0x18] sm:$0xff] }
 0x1e3   : > { %3966 = vmatprep.mubr.msk.f32.mxu1 %vm4714_vm7, %v4713_v10  ;;  %3996 = vmatprep.mubr.msk.f32.mxu0 %vm4714_vm7, %v4713_v10 }
 0x1e6   : > { %3967 = vmatmul.mubr.msk.f32.gmra.mxu1 %vm620_vm5, %v5032_v47  ;;  %3997 = vmatmul.mubr.msk.f32.gmra.mxu0 %vm620_vm5, %v5092_v0 }
 0x1e7   : > { %3969 = vmatprep.mubr.msk.f32.mxu1 %vm4714_vm7, %v4713_v10  ;;  %3999 = vmatprep.mubr.msk.f32.mxu0 %vm4714_vm7, %v4713_v10 }
 0x1ea   : > { %3970 = vmatmul.mubr.msk.f32.gmra.mxu1 %vm620_vm5, %v5040_v49  ;;  %4000 = vmatmul.mubr.msk.f32.gmra.mxu0 %vm620_vm5, %v5109_v24 }
 0x1eb   : > { %3972 = vmatprep.mubr.msk.f32.mxu1 %vm4714_vm7, %v4713_v10  ;;  %4002 = vmatprep.mubr.msk.f32.mxu0 %vm4714_vm7, %v4713_v10 }
 0x1ee   : > { %3973 = vmatmul.mubr.msk.f32.gmra.mxu1 %vm620_vm5, %v5060_v56  ;;  %4003 = vmatmul.mubr.msk.f32.gmra.mxu0 %vm620_vm5, %v5020_v58 }
 0x1ef   : > { %4005 = vmatprep.mubr.msk.f32.mxu0 %vm4714_vm7, %v4713_v10  ;;  %4032 = vmatprep.mubr.msk.f32.mxu1 %vm4714_vm7, %v4713_v10 }
 0x1f2   : > { %4006 = vmatmul.mubr.msk.f32.gmra.mxu0 %vm620_vm5, %v5032_v47  ;;  %v5308_v47 = vld [vmem:[%s6241_s4 + $0x8] sm:$0xff] }
 0x1f3   : > { %4008 = vmatprep.mubr.msk.f32.mxu0 %vm4714_vm7, %v4713_v10 }
 0x1f6   : > { %4009 = vmatmul.mubr.msk.f32.gmra.mxu0 %vm620_vm5, %v5040_v49 }
 0x1f7   : > { %4011 = vmatprep.mubr.msk.f32.mxu0 %vm4714_vm7, %v4713_v10 }
 0x1fa   : > { %4012 = vmatmul.mubr.msk.f32.gmra.mxu0 %vm620_vm5, %v5060_v56 }
 0x1fb   : > { %4077 = vmatprep.mubr.msk.f32.mxu0 %vm4714_vm7, %v4713_v10 }
 0x25a   : > { %v826_v38 = vpop.f32.mrf.mxu1 }
 0x25b   : > { %v1344_v37 = vmul.f32 %v5363_v29, %v826_v38 }
 0x25c   : > { %v3848_v39 = vpop.f32.mrf.mxu1 }
 0x25e   : > { %v5282_v40 = vpop.f32.mrf.mxu1 }
 0x260   : > { %v3851_v41 = vpop.f32.mrf.mxu1 }
 0x261   : > { %v5379_v41 = vld [vmem:[%s6240_s3 + $0x30] sm:$0xff] }
 0x262   : > { %v801_v42 = vpop.f32.mrf.mxu0  ;;  %v5284_v43 = vpop.f32.mrf.mxu1  ;;  %v1345_v38 = vmul.f32 %v5379_v41, %v5282_v40 }
 0x263   : > { %v1339_v58 = vmul.f32 %v5289_v46, %v801_v42 }
 0x264   : > { %v3833_v44 = vpop.f32.mrf.mxu0  ;;  %v3854_v45 = vpop.f32.mrf.mxu1 }
 0x265   : > { %v5384_v45 = vld [vmem:[%s6241_s4 + $0x30] sm:$0xff] }
 0x266   : > { %v806_v50 = vpop.f32.mrf.mxu0  ;;  %v5291_v51 = vpop.f32.mrf.mxu1 }
 0x267   : > { %v1340_v3 = vmul.f32 %v5302_v59, %v806_v50 }
 0x268   : > { %v3836_v52 = vpop.f32.mrf.mxu0  ;;  %v3857_v54 = vpop.f32.mrf.mxu1 }
 0x26a   : > { %v811_v60 = vpop.f32.mrf.mxu0  ;;  %v920_v61 = vpop.f32.mrf.mxu1 }
 0x26b   : > { %v1348_v62 = vmul.f32 %v5296_v57, %v920_v61  ;;  %v1341_v55 = vmul.f32 %v5316_v6, %v811_v60  ;;  %v1328_v60 = vld [vmem:[%s6240_s3 + $0x38] sm:$0xff] }
 0x26c   : > { %v3839_v1 = vpop.f32.mrf.mxu0  ;;  %v3872_v2 = vpop.f32.mrf.mxu1 }
 0x26d   : > { %v5311_v4 = vadd.f32 %v1348_v62, %v1339_v58  ;;  %v1337_v1 = vld [vmem:[%s6241_s4 + $0x38] sm:$0xff] }
 0x26e   : > { %v816_v48 = vpop.f32.mrf.mxu0  ;;  %v925_v49 = vpop.f32.mrf.mxu1 }
 0x26f   : > { %v1349_v7 = vmul.f32 %v5308_v47, %v925_v49  ;;  %v1342_v17 = vmul.f32 %v5330_v53, %v816_v48  ;;  %v1346_v49 = vmul.f32 %v1328_v60, %v5284_v43 }
 0x270   : > { %v3842_v8 = vpop.f32.mrf.mxu0  ;;  %v3875_v9 = vpop.f32.mrf.mxu1 }
 0x271   : > { %v5325_v12 = vadd.f32 %v1349_v7, %v1340_v3 }
 0x272   : > { %v821_v56 = vpop.f32.mrf.mxu0  ;;  %v930_v13 = vpop.f32.mrf.mxu1 }
 0x273   : > { %v1350_v14 = vmul.f32 %v5322_v11, %v930_v13  ;;  %v1343_v24 = vmul.f32 %v5344_v19, %v821_v56 }
 0x274   : > { %v3845_v15 = vpop.f32.mrf.mxu0  ;;  %v3878_v16 = vpop.f32.mrf.mxu1 }
 0x275   : > { %v5339_v18 = vadd.f32 %v1350_v14, %v1341_v55 }
 0x276   : > { %v935_v20 = vpop.f32.mrf.mxu1  ;;  %v5346_v0 = vpop.f32.mrf.mxu0 }
 0x277   : > { %v1351_v21 = vmul.f32 %v5336_v63, %v935_v20 }
 0x278   : > { %v3881_v22 = vpop.f32.mrf.mxu1  ;;  %v3911_v23 = vpop.f32.mrf.mxu0 }
 0x279   : > { %v5355_v25 = vadd.f32 %v1351_v21, %v1342_v17 }
 0x27a   : > { %v940_v26 = vpop.f32.mrf.mxu1  ;;  %v5357_v27 = vpop.f32.mrf.mxu0 }
 0x27b   : > { %v1352_v28 = vmul.f32 %v5352_v5, %v940_v26 }
 0x27c   : > { %v3884_v30 = vpop.f32.mrf.mxu1  ;;  %v3914_v31 = vpop.f32.mrf.mxu0 }
 0x27d   : > { %v5370_v33 = vadd.f32 %v1352_v28, %v1343_v24 }
 0x27e   : > { %v945_v35 = vpop.f32.mrf.mxu1  ;;  %v5372_v36 = vpop.f32.mrf.mxu0 }
 0x27f   : > { %v1353_v39 = vmul.f32 %v5368_v32, %v945_v35 }
 0x280   : > { %v3887_v42 = vpop.f32.mrf.mxu1  ;;  %v3917_v44 = vpop.f32.mrf.mxu0 }
 0x281   : > { %v5386_v50 = vadd.f32 %v1353_v39, %v1344_v37 }
 0x282   : > { %v950_v52 = vpop.f32.mrf.mxu1  ;;  %v1054_v54 = vpop.f32.mrf.mxu0 }
 0x283   : > { %v1354_v58 = vmul.f32 %v5384_v45, %v950_v52 }
 0x284   : > { %v3890_v61 = vpop.f32.mrf.mxu1  ;;  %v3920_v62 = vpop.f32.mrf.mxu0 }
 0x285   : > { %v5397_v2 = vadd.f32 %v1354_v58, %v1345_v38 }
 0x286   : > { %v955_v3 = vpop.f32.mrf.mxu1  ;;  %v5399_v48 = vpop.f32.mrf.mxu0 }
 0x287   : > { %v1355_v40 = vmul.f32 %v1337_v1, %v955_v3 }
 0x288   : > { %v3893_v7 = vpop.f32.mrf.mxu1  ;;  %v3923_v8 = vpop.f32.mrf.mxu0 }
 0x289   : > { %v5402_v9 = vadd.f32 %v1355_v40, %v1346_v49 }
 0x28a   : > { %v5404_v55 = vpop.f32.mrf.mxu1  ;;  %v5406_v56 = vpop.f32.mrf.mxu0 }
 0x28c   : > { %v3896_v13 = vpop.f32.mrf.mxu1  ;;  %v3926_v14 = vpop.f32.mrf.mxu0 }
 0x28e   : > { %v1069_v15 = vpop.f32.mrf.mxu0  ;;  %v5408_v16 = vpop.f32.mrf.mxu1 }
 0x290   : > { %v3929_v17 = vpop.f32.mrf.mxu0  ;;  %v3950_v20 = vpop.f32.mrf.mxu1 }
 0x292   : > { %v1074_v21 = vpop.f32.mrf.mxu0  ;;  %v1163_v22 = vpop.f32.mrf.mxu1 }
 0x293   : > { %v1373_v17 = vmul.f32 %v1328_v60, %v1074_v21  ;;  %v1369_v60 = vmul.f32 %v5330_v53, %v1054_v54  ;;  %v1367_v53 = vmul.f32 %v5302_v59, %v5357_v27  ;;  %v1372_v54 = vmul.f32 %v5379_v41, %v1069_v15 }
 0x294   : > { %v3932_v23 = vpop.f32.mrf.mxu0  ;;  %v3953_v43 = vpop.f32.mrf.mxu1  ;;  %v1371_v59 = vmul.f32 %v5363_v29, %v5406_v56  ;;  %v1370_v29 = vmul.f32 %v5344_v19, %v5399_v48  ;;  %v1368_v19 = vmul.f32 %v5316_v6, %v5372_v36  ;;  %v1366_v6 = vmul.f32 %v5289_v46, %v5346_v0 }
 0x296   : > { %v1079_v24 = vpop.f32.mrf.mxu0  ;;  %v5410_v26 = vpop.f32.mrf.mxu1 }
 0x298   : > { %v3935_v28 = vpop.f32.mrf.mxu0  ;;  %v3956_v30 = vpop.f32.mrf.mxu1 }
 0x29a   : > { %v1173_v31 = vpop.f32.mrf.mxu1  ;;  %v5412_v35 = vpop.f32.mrf.mxu0 }
 0x29b   : > { %v1378_v28 = vmul.f32 %v5336_v63, %v1173_v31 }
 0x29c   : > { %v3959_v37 = vpop.f32.mrf.mxu1  ;;  %v3989_v39 = vpop.f32.mrf.mxu0 }
 0x29d   : > { %v5426_v37 = vld [vmem:[%s6240_s3 + $0x40] sm:$0x1] }
 0x29e   : > { %v1178_v42 = vpop.f32.mrf.mxu1  ;;  %v5414_v44 = vpop.f32.mrf.mxu0  ;;  %v5431_v39 = vld [vmem:[%s6241_s4 + $0x40] sm:$0x1] }
 0x29f   : > { %v1356_v36 = vmul.f32 %v5431_v39, %v5404_v55 }
 0x2a0   : > { %v3962_v52 = vpop.f32.mrf.mxu1  ;;  %v3992_v38 = vpop.f32.mrf.mxu0 }
 0x2a2   : > { %v1183_v58 = vpop.f32.mrf.mxu1  ;;  %v5416_v61 = vpop.f32.mrf.mxu0 }
 0x2a4   : > { %v3965_v62 = vpop.f32.mrf.mxu1  ;;  %v3995_v3 = vpop.f32.mrf.mxu0 }
 0x2a5   : > { %v1376_v62 = vmul.f32 %v5308_v47, %v1163_v22  ;;  %v5440_v3 = vadd.f32 %v1378_v28, %v1369_v60 }
 0x2a6   : > { %v1188_v49 = vpop.f32.mrf.mxu1  ;;  %v5418_v40 = vpop.f32.mrf.mxu0 }
 0x2a7   : > { %v5452_v22 = vadd.f32 %v1376_v62, %v1367_v53 }
 0x2a8   : > { %v3968_v7 = vpop.f32.mrf.mxu1  ;;  %v3998_v8 = vpop.f32.mrf.mxu0 }
 0x2a9   : > { %v1381_v7 = vmul.f32 %v5384_v45, %v1188_v49  ;;  %v1380_v45 = vmul.f32 %v5368_v32, %v1183_v58  ;;  %v1379_v32 = vmul.f32 %v5352_v5, %v1178_v42  ;;  %v1377_v5 = vmul.f32 %v5322_v11, %v5410_v26 }
 0x2aa   : > { %v1193_v13 = vpop.f32.mrf.mxu1  ;;  %v5420_v14 = vpop.f32.mrf.mxu0  ;;  %v1375_v11 = vmul.f32 %v5296_v57, %v5408_v16  ;;  %v1347_v16 = vmul.f32 %v5426_v37, %v5291_v51 }
 0x2ab   : > { %v1382_v20 = vmul.f32 %v1337_v1, %v1193_v13  ;;  %v1374_v1 = vmul.f32 %v5426_v37, %v1079_v24  ;;  %v1390_v24 = vadd.f32 %v1381_v7, %v1372_v54  ;;  %v1389_v41 = vadd.f32 %v1380_v45, %v1371_v59 }
 0x2ac   : > { %v3971_v23 = vpop.f32.mrf.mxu1  ;;  %v4001_v43 = vpop.f32.mrf.mxu0  ;;  %v1388_v42 = vadd.f32 %v1379_v32, %v1370_v29  ;;  %v1386_v48 = vadd.f32 %v1377_v5, %v1368_v19  ;;  %v1384_v57 = vadd.f32 %v1375_v11, %v1366_v6  ;;  %v1365_v46 = vadd.f32 %v1356_v36, %v1347_v16 }
 0x2ad   : > { %v1391_v30 = vadd.f32 %v1382_v20, %v1373_v17 }
 0x2ae   : > { %v1198_v52 = vpop.f32.mrf.mxu1  ;;  %v5433_v38 = vpop.f32.mrf.mxu0 }
 0x2af   : > { %v1383_v63 = vmul.f32 %v5431_v39, %v1198_v52  ;;  %1838 = vrot.lane.b32.xlu0 %v1391_v30, %s4715_s18 }
 0x2b0   : > { %v3974_v21 = vpop.f32.mrf.mxu1  ;;  %v4004_v31 = vpop.f32.mrf.mxu0 }
 0x2b1   : > { %v1392_v8 = vadd.f32 %v1383_v63, %v1374_v1 }
 0x2b2   : > { %v5443_v13 = vpop.f32.mrf.mxu0 }
 0x2b3   : > { %1830 = vrot.lane.b32.xlu0 %v5440_v3, %s4715_s18  ;;  %1840 = vrot.lane.b32.xlu1 %v1392_v8, %s4715_s18 }
 0x2b4   : > { %4015 = vmatpush3.xpose.msk.msra.mxu1 %vm1393_vm8, %v1392_v8  ;;  %v4007_v47 = vpop.f32.mrf.mxu0 }
 0x2b5   : > { %4016 = vmatprep.subr.mxu1 %v4713_v10 }
 0x2b6   : > { %v5456_v49 = vpop.f32.mrf.mxu0 }
 0x2b7   : > { %1826 = vrot.lane.b32.xlu0 %v5452_v22, %s4715_s18  ;;  %1836 = vrot.lane.b32.xlu1 %v1390_v24, %s4715_s18 }
 0x2b8   : > { %4017 = vmatpush3.xpose.msk.msra.mxu1 %vm1393_vm8, %v1391_v30  ;;  %v4010_v27 = vpop.f32.mrf.mxu0 }
 0x2b9   : > { %4018 = vmatprep.subr.mxu1 %v4713_v10 }
 0x2ba   : > { %v1317_v15 = vpop.f32.mrf.mxu0 }
 0x2bb   : > { %1806 = vrot.lane.b32.xlu0 %v5311_v4, %s4715_s18  ;;  %1834 = vrot.lane.b32.xlu1 %v1389_v41, %s4715_s18 }
 0x2bc   : > { %4019 = vmatpush3.xpose.msk.msra.mxu1 %vm1393_vm8, %v1390_v24  ;;  %4060 = vmatpush3.msk.msra.mxu0 %vm1668_vm9, %v1317_v15  ;;  %v4013_v56 = vpop.f32.mrf.mxu0 }
 0x2bd   : > { %4061 = vmatprep.subr.mxu0 %v4713_v10  ;;  %4020 = vmatprep.subr.mxu1 %v4713_v10 }
 0x2be   : > { %4062 = vmatpush3.msra.mxu0 %v5456_v49 }
 0x2bf   : > { %4063 = vmatprep.subr.mxu0 %v4713_v10  ;;  %1810 = vrot.lane.b32.xlu0 %v5339_v18, %s4715_s18 }
 0x2c0   : > { %1832 = vrot.lane.b32.xlu1 %v1388_v42, %s4715_s18  ;;  %4021 = vmatpush3.xpose.msk.msra.mxu1 %vm1393_vm8, %v1389_v41 }
 0x2c1   : > { %4064 = vmatpush3.msra.mxu0 %v5443_v13  ;;  %4022 = vmatprep.subr.mxu1 %v4713_v10 }
 0x2c2   : > { %4065 = vmatprep.subr.mxu0 %v4713_v10 }
 0x2c3   : > { %4066 = vmatpush3.msra.mxu0 %v5433_v38  ;;  %1814 = vrot.lane.b32.xlu0 %v5370_v33, %s4715_s18 }
 0x2c4   : > { %4067 = vmatprep.subr.mxu0 %v4713_v10  ;;  %1828 = vrot.lane.b32.xlu1 %v1386_v48, %s4715_s18 }
 0x2c5   : > { %4023 = vmatpush3.xpose.msk.msra.mxu1 %vm1393_vm8, %v1388_v42  ;;  %4068 = vmatpush3.msra.mxu0 %v5420_v14 }
 0x2c6   : > { %4069 = vmatprep.subr.mxu0 %v4713_v10  ;;  %4024 = vmatprep.subr.mxu1 %v4713_v10 }
 0x2c7   : > { %4070 = vmatpush3.msra.mxu0 %v5418_v40  ;;  %1818 = vrot.lane.b32.xlu0 %v5397_v2, %s4715_s18 }
 0x2c8   : > { %4071 = vmatprep.subr.mxu0 %v4713_v10  ;;  %1824 = vrot.lane.b32.xlu1 %v1384_v57, %s4715_s18 }
 0x2c9   : > { %4025 = vmatpush3.xpose.msk.msra.mxu1 %vm1393_vm8, %v5440_v3  ;;  %4072 = vmatpush3.msra.mxu0 %v5416_v61 }
 0x2ca   : > { %4073 = vmatprep.subr.mxu0 %v4713_v10  ;;  %4026 = vmatprep.subr.mxu1 %v4713_v10 }
 0x2cb   : > { %4074 = vmatpush3.msra.mxu0 %v5414_v44  ;;  %1822 = vrot.lane.b32.xlu0 %v1365_v46, %s4715_s18 }
 0x2cc   : > { %4075 = vmatprep.subr.mxu0 %v4713_v10  ;;  %1808 = vrot.lane.b32.xlu1 %v5325_v12, %s4715_s18 }
 0x2cd   : > { %4027 = vmatpush3.xpose.msk.msra.mxu1 %vm1393_vm8, %v1386_v48  ;;  %4076 = vmatpush3.msra.mxu0 %v5412_v35 }
 0x2ce   : > { %4028 = vmatprep.subr.mxu1 %v4713_v10  ;;  %4149 = vmatprep.subr.mxu0 %v4713_v10 }
 0x2cf   : > { %2089 = vrot.lane.b32.xlu0 %v5443_v13, %s4715_s18 }
 0x2d0   : > { %1812 = vrot.lane.b32.xlu1 %v5355_v25, %s4715_s18 }
 0x2d1   : > { %4029 = vmatpush3.xpose.msk.msra.mxu1 %vm1393_vm8, %v5452_v22 }
 0x2d2   : > { %4030 = vmatprep.subr.mxu1 %v4713_v10 }
 0x2d3   : > { %2087 = vrot.lane.b32.xlu0 %v5433_v38, %s4715_s18 }
 0x2d4   : > { %1816 = vrot.lane.b32.xlu1 %v5386_v50, %s4715_s18 }
 0x2d5   : > { %4031 = vmatpush3.xpose.msk.msra.mxu1 %vm1393_vm8, %v1384_v57 }
 0x2d6   : > { %4104 = vmatprep.subr.mxu1 %v4713_v10 }
 0x2d7   : > { %2093 = vrot.lane.b32.xlu0 %v1317_v15, %s4715_s18 }
 0x2d8   : > { %4033 = vmatmul.mubr.msk.f32.vlgmr.msra.gmra.mxu1 %vm1393_vm8, %v5311_v4  ;;  %1820 = vrot.lane.b32.xlu1 %v5402_v9, %s4715_s18 }
 0x2d9   : > { %4035 = vmatprep.mubr.msk.f32.mxu1 %vm4714_vm7, %v4713_v10 }
 0x2db   : > { %2083 = vrot.lane.b32.xlu0 %v5418_v40, %s4715_s18 }
 0x2dc   : > { %4036 = vmatmul.mubr.msk.f32.gmra.mxu1 %vm1393_vm8, %v5325_v12  ;;  %2091 = vrot.lane.b32.xlu1 %v5456_v49, %s4715_s18 }
 0x2dd   : > { %4038 = vmatprep.mubr.msk.f32.mxu1 %vm4714_vm7, %v4713_v10 }
 0x2df   : > { %2081 = vrot.lane.b32.xlu0 %v5416_v61, %s4715_s18 }
 0x2e0   : > { %4039 = vmatmul.mubr.msk.f32.gmra.mxu1 %vm1393_vm8, %v5339_v18 }
 0x2e1   : > { %4041 = vmatprep.mubr.msk.f32.mxu1 %vm4714_vm7, %v4713_v10 }
 0x2e4   : > { %4042 = vmatmul.mubr.msk.f32.gmra.mxu1 %vm1393_vm8, %v5355_v25 }
 0x2e5   : > { %4044 = vmatprep.mubr.msk.f32.mxu1 %vm4714_vm7, %v4713_v10 }
 0x2e8   : > { %4045 = vmatmul.mubr.msk.f32.gmra.mxu1 %vm1393_vm8, %v5370_v33 }
 0x2e9   : > { %4047 = vmatprep.mubr.msk.f32.mxu1 %vm4714_vm7, %v4713_v10 }
 0x2ec   : > { %4048 = vmatmul.mubr.msk.f32.gmra.mxu1 %vm1393_vm8, %v5386_v50 }
 0x2ed   : > { %4050 = vmatprep.mubr.msk.f32.mxu1 %vm4714_vm7, %v4713_v10 }
 0x2f0   : > { %4051 = vmatmul.mubr.msk.f32.gmra.mxu1 %vm1393_vm8, %v5397_v2 }
 0x2f1   : > { %4053 = vmatprep.mubr.msk.f32.mxu1 %vm4714_vm7, %v4713_v10 }
 0x2f4   : > { %4054 = vmatmul.mubr.msk.f32.gmra.mxu1 %vm1393_vm8, %v5402_v9 }
 0x2f5   : > { %4056 = vmatprep.mubr.msk.f32.mxu1 %vm4714_vm7, %v4713_v10 }
 0x2f8   : > { %4057 = vmatmul.mubr.msk.f32.gmra.mxu1 %vm1393_vm8, %v1365_v46 }
 0x2f9   : > { %4122 = vmatprep.mubr.msk.f32.mxu1 %vm4714_vm7, %v4713_v10 }
 0x321   : > { %v1839_v4 = vpop.permute.xlu0 %1838 }
 0x325   : > { %v1841_v51 = vpop.permute.xlu1 %1840  ;;  %v1831_v25 = vpop.permute.xlu0 %1830 }
 0x326   : > { %4105 = vmatpush3.xpose.msk.msra.mxu1 %vm1393_vm8, %v1841_v51 }
 0x327   : > { %4106 = vmatprep.subr.mxu1 %v4713_v10 }
 0x329   : > { %v1837_v12 = vpop.permute.xlu1 %1836  ;;  %v1827_v50 = vpop.permute.xlu0 %1826 }
 0x32a   : > { %4107 = vmatpush3.xpose.msk.msra.mxu1 %vm1393_vm8, %v1839_v4 }
 0x32b   : > { %4108 = vmatprep.subr.mxu1 %v4713_v10 }
 0x32d   : > { %v1835_v18 = vpop.permute.xlu1 %1834  ;;  %v1807_v9 = vpop.permute.xlu0 %1806 }
 0x32e   : > { %4109 = vmatpush3.xpose.msk.msra.mxu1 %vm1393_vm8, %v1837_v12 }
 0x32f   : > { %4110 = vmatprep.subr.mxu1 %v4713_v10 }
 0x331   : > { %v1811_v26 = vpop.permute.xlu0 %1810 }
 0x332   : > { %4111 = vmatpush3.xpose.msk.msra.mxu1 %vm1393_vm8, %v1835_v18  ;;  %v1833_v0 = vpop.permute.xlu1 %1832 }
 0x333   : > { %4112 = vmatprep.subr.mxu1 %v4713_v10 }
 0x335   : > { %v1815_v61 = vpop.permute.xlu0 %1814 }
 0x336   : > { %4113 = vmatpush3.xpose.msk.msra.mxu1 %vm1393_vm8, %v1833_v0  ;;  %v1829_v33 = vpop.permute.xlu1 %1828 }
 0x337   : > { %4114 = vmatprep.subr.mxu1 %v4713_v10 }
 0x339   : > { %v1819_v17 = vpop.permute.xlu0 %1818 }
 0x33a   : > { %4115 = vmatpush3.xpose.msk.msra.mxu1 %vm1393_vm8, %v1831_v25  ;;  %v1825_v2 = vpop.permute.xlu1 %1824 }
 0x33b   : > { %4116 = vmatprep.subr.mxu1 %v4713_v10 }
 0x33d   : > { %v1823_v23 = vpop.permute.xlu0 %1822 }
 0x33e   : > { %4117 = vmatpush3.xpose.msk.msra.mxu1 %vm1393_vm8, %v1829_v33  ;;  %v1809_v55 = vpop.permute.xlu1 %1808 }
 0x33f   : > { %4118 = vmatprep.subr.mxu1 %v4713_v10 }
 0x341   : > { %v5666_v32 = vpop.permute.xlu0 %2089 }
 0x342   : > { %4119 = vmatpush3.xpose.msk.msra.mxu1 %vm1393_vm8, %v1827_v50  ;;  %v1813_v58 = vpop.permute.xlu1 %1812 }
 0x343   : > { %4120 = vmatprep.subr.mxu1 %v4713_v10 }
 0x345   : > { %v2088_v19 = vpop.permute.xlu0 %2087 }
 0x346   : > { %4121 = vmatpush3.xpose.msk.msra.mxu1 %vm1393_vm8, %v1825_v2  ;;  %v1817_v40 = vpop.permute.xlu1 %1816 }
 0x347   : > { %4194 = vmatprep.subr.mxu1 %v4713_v10 }
 0x349   : > { %4123 = vmatmul.mubr.msk.f32.vlgmr.msra.gmra.mxu1 %vm1393_vm8, %v1807_v9  ;;  %v2094_v57 = vpop.permute.xlu0 %2093 }
 0x34a   : > { %4125 = vmatprep.mubr.msk.f32.mxu1 %vm4714_vm7, %v4713_v10  ;;  %v1821_v20 = vpop.permute.xlu1 %1820 }
 0x34d   : > { %4126 = vmatmul.mubr.msk.f32.gmra.mxu1 %vm1393_vm8, %v1809_v55  ;;  %v2084_v18 = vpop.permute.xlu0 %2083 }
 0x34e   : > { %4128 = vmatprep.mubr.msk.f32.mxu1 %vm4714_vm7, %v4713_v10  ;;  %v2092_v33 = vpop.permute.xlu1 %2091 }
 0x351   : > { %4129 = vmatmul.mubr.msk.f32.gmra.mxu1 %vm1393_vm8, %v1811_v26  ;;  %v2082_v9 = vpop.permute.xlu0 %2081 }
 0x352   : > { %4131 = vmatprep.mubr.msk.f32.mxu1 %vm4714_vm7, %v4713_v10 }
 0x355   : > { %4132 = vmatmul.mubr.msk.f32.gmra.mxu1 %vm1393_vm8, %v1813_v58 }
 0x356   : > { %4134 = vmatprep.mubr.msk.f32.mxu1 %vm4714_vm7, %v4713_v10 }
 0x359   : > { %4135 = vmatmul.mubr.msk.f32.gmra.mxu1 %vm1393_vm8, %v1815_v61 }
 0x35a   : > { %4137 = vmatprep.mubr.msk.f32.mxu1 %vm4714_vm7, %v4713_v10 }
 0x35d   : > { %4138 = vmatmul.mubr.msk.f32.gmra.mxu1 %vm1393_vm8, %v1817_v40 }
 0x35e   : > { %4140 = vmatprep.mubr.msk.f32.mxu1 %vm4714_vm7, %v4713_v10 }
 0x361   : > { %4141 = vmatmul.mubr.msk.f32.gmra.mxu1 %vm1393_vm8, %v1819_v17 }
 0x362   : > { %4143 = vmatprep.mubr.msk.f32.mxu1 %vm4714_vm7, %v4713_v10 }
 0x365   : > { %4144 = vmatmul.mubr.msk.f32.gmra.mxu1 %vm1393_vm8, %v1821_v20 }
 0x366   : > { %4146 = vmatprep.mubr.msk.f32.mxu1 %vm4714_vm7, %v4713_v10 }
 0x369   : > { %4147 = vmatmul.mubr.msk.f32.gmra.mxu1 %vm1393_vm8, %v1823_v23 }
 0x36a   : > { %4200 = vmatprep.mubr.msk.f32.mxu1 %vm4714_vm7, %v4713_v10 }
 0x398   : > { %v5626_v43 = vpop.f32.mrf.mxu1 }
 0x399   : > { %v1559_v28 = vsel %vm1558_vm10, %v5626_v43, -inf }
 0x39a   : > { %v4034_v30 = vpop.f32.mrf.mxu1  ;;  %1560 = vmax.xlane.f32.xlu1 %v1559_v28 }
 0x39c   : > { %v5630_v37 = vpop.f32.mrf.mxu1 }
 0x39d   : > { %v1562_v39 = vsel %vm1558_vm10, %v5630_v37, -inf }
 0x39e   : > { %v4037_v52 = vpop.f32.mrf.mxu1  ;;  %1563 = vmax.xlane.f32.xlu0 %v1562_v39 }
 0x3a0   : > { %v5634_v38 = vpop.f32.mrf.mxu1 }
 0x3a1   : > { %v1565_v60 = vsel %vm1558_vm10, %v5634_v38, -inf }
 0x3a2   : > { %v4040_v1 = vpop.f32.mrf.mxu1  ;;  %1566 = vmax.xlane.f32.xlu0 %v1565_v60 }
 0x3a4   : > { %v5638_v63 = vpop.f32.mrf.mxu1 }
 0x3a5   : > { %v1568_v21 = vsel %vm1558_vm10, %v5638_v63, -inf }
 0x3a6   : > { %v4043_v31 = vpop.f32.mrf.mxu1  ;;  %1569 = vmax.xlane.f32.xlu0 %v1568_v21 }
 0x3a8   : > { %v5642_v62 = vpop.f32.mrf.mxu1 }
 0x3a9   : > { %v1571_v49 = vsel %vm1558_vm10, %v5642_v62, -inf }
 0x3aa   : > { %v4046_v3 = vpop.f32.mrf.mxu1 }
 0x3ab   : > { %2085 = vrot.lane.b32.xlu1 %v5420_v14, %s4715_s18 }
 0x3ac   : > { %v5646_v7 = vpop.f32.mrf.mxu1 }
 0x3ad   : > { %v1574_v8 = vsel %vm1558_vm10, %v5646_v7, -inf }
 0x3ae   : > { %v4049_v13 = vpop.f32.mrf.mxu1  ;;  %1575 = vmax.xlane.f32.xlu0 %v1574_v8 }
 0x3b0   : > { %v5650_v53 = vpop.f32.mrf.mxu1 }
 0x3b1   : > { %v1577_v59 = vsel %vm1558_vm10, %v5650_v53, -inf }
 0x3b2   : > { %v4052_v54 = vpop.f32.mrf.mxu1 }
 0x3b4   : > { %v5652_v47 = vpop.f32.mrf.mxu1 }
 0x3b5   : > { %v1580_v22 = vsel %vm1558_vm10, %v5652_v47, -inf }
 0x3b6   : > { %v4055_v45 = vpop.f32.mrf.mxu1  ;;  %1581 = vmax.xlane.f32.xlu0 %v1580_v22 }
 0x3b8   : > { %v5656_v24 = vpop.f32.mrf.mxu1 }
 0x3b9   : > { %v1584_v27 = vsel %vm1583_vm11, %v5656_v24, -inf }
 0x3ba   : > { %v4058_v14 = vpop.f32.mrf.mxu1 }
 0x3cf   : > { %1572 = vmax.xlane.f32.xlu1 %v1571_v49 }
 0x3d3   : > { %1578 = vmax.xlane.f32.xlu1 %v1577_v59 }
 0x3d7   : > { %1585 = vmax.xlane.f32.xlu1 %v1584_v27 }
 0x409   : > { %v5664_v41 = vpop.f32.mrf.mxu1 }
 0x40a   : > { %v1988_v15 = vsel %vm1558_vm10, %v5664_v41, -inf }
 0x40b   : > { %v4124_v29 = vpop.f32.mrf.mxu1  ;;  %1989 = vmax.xlane.f32.xlu0 %v1988_v15 }
 0x40d   : > { %v5670_v56 = vpop.f32.mrf.mxu1 }
 0x40e   : > { %v1991_v5 = vsel %vm1558_vm10, %v5670_v56, -inf }
 0x40f   : > { %v4127_v42 = vpop.f32.mrf.mxu1  ;;  %1992 = vmax.xlane.f32.xlu1 %v1991_v5 }
 0x411   : > { %v5674_v11 = vpop.f32.mrf.mxu1 }
 0x412   : > { %v1994_v48 = vsel %vm1558_vm10, %v5674_v11, -inf }
 0x413   : > { %v4130_v6 = vpop.f32.mrf.mxu1  ;;  %1995 = vmax.xlane.f32.xlu0 %v1994_v48 }
 0x415   : > { %v5678_v36 = vpop.f32.mrf.mxu1 }
 0x416   : > { %v1997_v16 = vsel %vm1558_vm10, %v5678_v36, -inf }
 0x417   : > { %v4133_v46 = vpop.f32.mrf.mxu1  ;;  %1998 = vmax.xlane.f32.xlu1 %v1997_v16 }
 0x419   : > { %v5682_v51 = vpop.f32.mrf.mxu1 }
 0x41a   : > { %v2000_v4 = vsel %vm1558_vm10, %v5682_v51, -inf }
 0x41b   : > { %v4136_v12 = vpop.f32.mrf.mxu1  ;;  %2001 = vmax.xlane.f32.xlu1 %v2000_v4 }
 0x41d   : > { %v5686_v0 = vpop.f32.mrf.mxu1 }
 0x41e   : > { %v2003_v25 = vsel %vm1558_vm10, %v5686_v0, -inf }
 0x41f   : > { %v4139_v50 = vpop.f32.mrf.mxu1  ;;  %2004 = vmax.xlane.f32.xlu0 %v2003_v25 }
 0x421   : > { %v5690_v2 = vpop.f32.mrf.mxu1 }
 0x422   : > { %v2006_v55 = vsel %vm1558_vm10, %v5690_v2, -inf }
 0x423   : > { %v1561_v26 = vpop.xlane.xlu1 %1560  ;;  %v4142_v58 = vpop.f32.mrf.mxu1  ;;  %2007 = vmax.xlane.f32.xlu1 %v2006_v55 }
 0x424   : > { %v1587_v61 = vsub.f32 %v5626_v43, %v1561_v26 }
 0x425   : > { %v5695_v40 = vpop.f32.mrf.mxu1 }
 0x426   : > { %v1596_v17 = vmul.f32 1.442695, %v1587_v61  ;;  %v2009_v22 = vsel %vm1558_vm10, %v5695_v40, -inf }
 0x427   : > { %v1564_v20 = vpop.xlane.xlu0 %1563  ;;  %v4145_v28 = vpop.f32.mrf.mxu1 }
 0x428   : > { %4445 = vpow2.f32 %v1596_v17  ;;  %v1588_v23 = vsub.f32 %v5630_v37, %v1564_v20 }
 0x429   : > { %v5698_v39 = vpop.f32.mrf.mxu1 }
 0x42a   : > { %v1598_v30 = vmul.f32 1.442695, %v1588_v23  ;;  %v2012_v14 = vsel %vm1583_vm11, %v5698_v39, -inf }
 0x42b   : > { %v1567_v52 = vpop.xlane.xlu0 %1566  ;;  %v4148_v1 = vpop.f32.mrf.mxu1 }
 0x42c   : > { %4447 = vpow2.f32 %v1598_v30  ;;  %v1589_v60 = vsub.f32 %v5634_v38, %v1567_v52 }
 0x42e   : > { %v1600_v21 = vmul.f32 1.442695, %v1589_v60 }
 0x42f   : > { %v1570_v31 = vpop.xlane.xlu0 %1569 }
 0x430   : > { %4449 = vpow2.f32 %v1600_v21  ;;  %v1590_v43 = vsub.f32 %v5638_v63, %v1570_v31 }
 0x432   : > { %v1602_v3 = vmul.f32 1.442695, %v1590_v43 }
 0x434   : > { %4451 = vpow2.f32 %v1602_v3  ;;  %2077 = vrot.lane.b32.xlu1 %v5412_v35, %s4715_s18 }
 0x435   : > { %v4446_v37 = vpop.eup %4445  ;;  %2079 = vrot.lane.b32.xlu0 %v5414_v44, %s4715_s18  ;;  %v2086_v44 = vpop.permute.xlu1 %2085 }
 0x436   : > { %4078 = vmatmul.mubr.msk.f32.vlgmr.msra.gmra.mxu0 %vm1558_vm10, %v4446_v37  ;;  %v1614_v45 = vsel %vm1558_vm10, %v4446_v37, 0.0 }
 0x437   : > { %4150 = vmatpush3.msk.msra.mxu0 %vm1668_vm9, %v2094_v57  ;;  %4080 = vmatprep.mubr.msk.f32.mxu0 %vm4714_vm7, %v4713_v10  ;;  %v1576_v63 = vpop.xlane.xlu0 %1575 }
 0x438   : > { %4151 = vmatprep.subr.mxu0 %v4713_v10  ;;  %v1592_v13 = vsub.f32 %v5646_v7, %v1576_v63 }
 0x439   : > { %v4448_v38 = vpop.eup %4447  ;;  %4152 = vmatpush3.msra.mxu0 %v2092_v33 }
 0x43a   : > { %4153 = vmatprep.subr.mxu0 %v4713_v10  ;;  %4081 = vmatmul.mubr.msk.f32.gmra.mxu0 %vm1558_vm10, %v4448_v38  ;;  %v1606_v54 = vmul.f32 1.442695, %v1592_v13  ;;  %v1617_v29 = vsel %vm1558_vm10, %v4448_v38, 0.0  ;;  %v1805_v13 = vld [vmem:[%s5773_s29 + $0x10] sm:$0xff] }
 0x43b   : > { %4154 = vmatpush3.msra.mxu0 %v5666_v32  ;;  %4083 = vmatprep.mubr.msk.f32.mxu0 %vm4714_vm7, %v4713_v10 }
 0x43c   : > { %4155 = vmatprep.subr.mxu0 %v4713_v10  ;;  %4453 = vpow2.f32 %v1606_v54  ;;  %v1804_v54 = vld [vmem:[%s5773_s29 + $0x8] sm:$0xff] }
 0x43d   : > { %v4450_v35 = vpop.eup %4449  ;;  %4156 = vmatpush3.msra.mxu0 %v2088_v19 }
 0x43e   : > { %4157 = vmatprep.subr.mxu0 %v4713_v10  ;;  %4084 = vmatmul.mubr.msk.f32.gmra.mxu0 %vm1558_vm10, %v4450_v35  ;;  %v1620_v57 = vsel %vm1558_vm10, %v4450_v35, 0.0 }
 0x43f   : > { %4158 = vmatpush3.msra.mxu0 %v2086_v44  ;;  %4086 = vmatprep.mubr.msk.f32.mxu0 %vm4714_vm7, %v4713_v10  ;;  %v1582_v59 = vpop.xlane.xlu0 %1581 }
 0x440   : > { %4159 = vmatprep.subr.mxu0 %v4713_v10  ;;  %v1594_v32 = vsub.f32 %v5652_v47, %v1582_v59 }
 0x441   : > { %v4452_v8 = vpop.eup %4451  ;;  %4160 = vmatpush3.msra.mxu0 %v2084_v18 }
 0x442   : > { %4161 = vmatprep.subr.mxu0 %v4713_v10  ;;  %4087 = vmatmul.mubr.msk.f32.gmra.mxu0 %vm1558_vm10, %v4452_v8  ;;  %v1610_v48 = vmul.f32 1.442695, %v1594_v32  ;;  %v1623_v46 = vsel %vm1558_vm10, %v4452_v8, 0.0 }
 0x443   : > { %4162 = vmatpush3.msra.mxu0 %v2082_v9  ;;  %4089 = vmatprep.mubr.msk.f32.mxu0 %vm4714_vm7, %v4713_v10 }
 0x444   : > { %4163 = vmatprep.subr.mxu0 %v4713_v10 }
 0x449   : > { %v4454_v49 = vpop.eup %4453 }
 0x44a   : > { %v1629_v5 = vsel %vm1558_vm10, %v4454_v49, 0.0 }
 0x454   : > { %2010 = vmax.xlane.f32.xlu0 %v2009_v22 }
 0x458   : > { %v1573_v7 = vpop.xlane.xlu1 %1572  ;;  %1615 = vadd.xlane.f32.xlu1 %v1614_v45  ;;  %2013 = vmax.xlane.f32.xlu0 %v2012_v14  ;;  %v1803_v45 = vld [vmem:[%s5773_s29] sm:$0xff] }
 0x459   : > { %v1591_v27 = vsub.f32 %v5642_v62, %v1573_v7 }
 0x45b   : > { %v1604_v15 = vmul.f32 1.442695, %v1591_v27 }
 0x45c   : > { %v1579_v42 = vpop.xlane.xlu1 %1578  ;;  %1618 = vadd.xlane.f32.xlu0 %v1617_v29  ;;  %1630 = vadd.xlane.f32.xlu1 %v1629_v5 }
 0x45d   : > { %4455 = vpow2.f32 %v1604_v15  ;;  %v1593_v19 = vsub.f32 %v5650_v53, %v1579_v42  ;;  %v3532_v15 = vld [vmem:[%s5773_s29 + $0x28] sm:$0xff] }
 0x45e   : > { %4195 = vmatpush3.msra.mxu1 %v3532_v15 }
 0x45f   : > { %v1608_v6 = vmul.f32 1.442695, %v1593_v19  ;;  %4196 = vmatprep.subr.mxu1 %v4713_v10 }
 0x460   : > { %v1586_v16 = vpop.xlane.xlu1 %1585  ;;  %1621 = vadd.xlane.f32.xlu0 %v1620_v57 }
 0x461   : > { %4457 = vpow2.f32 %v1608_v6  ;;  %v1595_v62 = vsub.f32 %v5656_v24, %v1586_v16 }
 0x462   : > { %4459 = vpow2.f32 %v1610_v48 }
 0x463   : > { %v1612_v47 = vmul.f32 1.442695, %v1595_v62 }
 0x464   : > { %1624 = vadd.xlane.f32.xlu0 %v1623_v46 }
 0x465   : > { %4461 = vpow2.f32 %v1612_v47 }
 0x46a   : > { %v4456_v4 = vpop.eup %4455 }
 0x46b   : > { %4090 = vmatmul.mubr.msk.f32.gmra.mxu0 %vm1558_vm10, %v4456_v4  ;;  %v1626_v53 = vsel %vm1558_vm10, %v4456_v4, 0.0  ;;  %v3531_v4 = vld [vmem:[%s5773_s29 + $0x20] sm:$0xff] }
 0x46c   : > { %1627 = vadd.xlane.f32.xlu0 %v1626_v53  ;;  %4092 = vmatprep.mubr.msk.f32.mxu0 %vm4714_vm7, %v4713_v10 }
 0x46d   : > { %4197 = vmatpush3.msra.mxu1 %v3531_v4 }
 0x46e   : > { %v4458_v12 = vpop.eup %4457  ;;  %4198 = vmatprep.subr.mxu1 %v4713_v10 }
 0x46f   : > { %4093 = vmatmul.mubr.msk.f32.gmra.mxu0 %vm1558_vm10, %v4454_v49  ;;  %v1632_v24 = vsel %vm1558_vm10, %v4458_v12, 0.0  ;;  %v4460_v18 = vpop.eup %4459 }
 0x470   : > { %1633 = vadd.xlane.f32.xlu1 %v1632_v24  ;;  %4095 = vmatprep.mubr.msk.f32.mxu0 %vm4714_vm7, %v4713_v10  ;;  %v1635_v25 = vsel %vm1558_vm10, %v4460_v18, 0.0 }
 0x472   : > { %v4462_v33 = vpop.eup %4461 }
 0x473   : > { %4096 = vmatmul.mubr.msk.f32.gmra.mxu0 %vm1558_vm10, %v4458_v12  ;;  %v1638_v50 = vsel %vm1583_vm11, %v4462_v33, 0.0  ;;  %v3530_v12 = vld [vmem:[%s5773_s29 + $0x18] sm:$0xff] }
 0x474   : > { %1636 = vadd.xlane.f32.xlu1 %v1635_v25  ;;  %4098 = vmatprep.mubr.msk.f32.mxu0 %vm4714_vm7, %v4713_v10 }
 0x475   : > { %4199 = vmatpush3.msra.mxu1 %v3530_v12 }
 0x477   : > { %4099 = vmatmul.mubr.msk.f32.gmra.mxu0 %vm1558_vm10, %v4460_v18 }
 0x478   : > { %1639 = vadd.xlane.f32.xlu1 %v1638_v50  ;;  %4101 = vmatprep.mubr.msk.f32.mxu0 %vm4714_vm7, %v4713_v10 }
 0x47b   : > { %4102 = vmatmul.mubr.msk.f32.gmra.mxu0 %vm1558_vm10, %v4462_v33 }
 0x47c   : > { %4167 = vmatprep.mubr.msk.f32.mxu0 %vm4714_vm7, %v4713_v10 }
 0x494   : > { %v1990_v9 = vpop.xlane.xlu0 %1989 }
 0x495   : > { %v2015_v55 = vsub.f32 %v5664_v41, %v1990_v9 }
 0x497   : > { %v2024_v26 = vmul.f32 1.442695, %v2015_v55 }
 0x498   : > { %v1993_v58 = vpop.xlane.xlu1 %1992 }
 0x499   : > { %4463 = vpow2.f32 %v2024_v26  ;;  %v2016_v61 = vsub.f32 %v5670_v56, %v1993_v58 }
 0x49b   : > { %v2026_v17 = vmul.f32 1.442695, %v2016_v61 }
 0x49c   : > { %v1996_v20 = vpop.xlane.xlu0 %1995 }
 0x49d   : > { %4465 = vpow2.f32 %v2026_v17  ;;  %v2017_v23 = vsub.f32 %v5674_v11, %v1996_v20 }
 0x49f   : > { %v2028_v28 = vmul.f32 1.442695, %v2017_v23 }
 0x4a0   : > { %v1999_v30 = vpop.xlane.xlu1 %1998 }
 0x4a1   : > { %4467 = vpow2.f32 %v2028_v28  ;;  %v2018_v52 = vsub.f32 %v5678_v36, %v1999_v30 }
 0x4a3   : > { %v2030_v60 = vmul.f32 1.442695, %v2018_v52 }
 0x4a4   : > { %v2002_v1 = vpop.xlane.xlu1 %2001 }
 0x4a5   : > { %4469 = vpow2.f32 %v2030_v60  ;;  %v2019_v41 = vsub.f32 %v5682_v51, %v2002_v1 }
 0x4a6   : > { %v4464_v21 = vpop.eup %4463 }
 0x4a7   : > { %v2032_v31 = vmul.f32 1.442695, %v2019_v41  ;;  %v2042_v56 = vsel %vm1558_vm10, %v4464_v21, 0.0 }
 0x4a8   : > { %2043 = vadd.xlane.f32.xlu0 %v2042_v56  ;;  %v2005_v43 = vpop.xlane.xlu0 %2004 }
 0x4a9   : > { %4471 = vpow2.f32 %v2032_v31  ;;  %v2020_v11 = vsub.f32 %v5686_v0, %v2005_v43 }
 0x4aa   : > { %v4466_v3 = vpop.eup %4465 }
 0x4ab   : > { %v2034_v37 = vmul.f32 1.442695, %v2020_v11  ;;  %v2045_v38 = vsel %vm1558_vm10, %v4466_v3, 0.0 }
 0x4ac   : > { %v2008_v36 = vpop.xlane.xlu1 %2007  ;;  %2046 = vadd.xlane.f32.xlu0 %v2045_v38  ;;  %v2080_v35 = vpop.permute.xlu0 %2079 }
 0x4ad   : > { %4473 = vpow2.f32 %v2034_v37  ;;  %v2021_v51 = vsub.f32 %v5690_v2, %v2008_v36  ;;  %4164 = vmatpush3.msra.mxu0 %v2080_v35 }
 0x4ae   : > { %v4468_v0 = vpop.eup %4467  ;;  %4165 = vmatprep.subr.mxu0 %v4713_v10 }
 0x4af   : > { %v2036_v44 = vmul.f32 1.442695, %v2021_v51  ;;  %v2048_v63 = vsel %vm1558_vm10, %v4468_v0, 0.0 }
 0x4b0   : > { %v2078_v8 = vpop.permute.xlu1 %2077  ;;  %2049 = vadd.xlane.f32.xlu0 %v2048_v63 }
 0x4b1   : > { %4475 = vpow2.f32 %v2036_v44  ;;  %4166 = vmatpush3.msra.mxu0 %v2078_v8 }
 0x4b2   : > { %v4470_v2 = vpop.eup %4469  ;;  %4168 = vmatmul.mubr.msk.f32.vlgmr.msra.gmra.mxu0 %vm1558_vm10, %v4464_v21  ;;  %4227 = vmatprep.subr.mxu0 %v4713_v10 }
 0x4b3   : > { %v2051_v22 = vsel %vm1558_vm10, %v4470_v2, 0.0  ;;  %4170 = vmatprep.mubr.msk.f32.mxu0 %vm4714_vm7, %v4713_v10  ;;  %4228 = vmatpush3.msra.mxu0 %v1805_v13 }
 0x4b4   : > { %2052 = vadd.xlane.f32.xlu0 %v2051_v22  ;;  %4229 = vmatprep.subr.mxu0 %v4713_v10 }
 0x4b5   : > { %4230 = vmatpush3.msra.mxu0 %v1804_v54 }
 0x4b6   : > { %v4472_v14 = vpop.eup %4471  ;;  %4171 = vmatmul.mubr.msk.f32.gmra.mxu0 %vm1558_vm10, %v4466_v3  ;;  %4231 = vmatprep.subr.mxu0 %v4713_v10 }
 0x4b7   : > { %v2054_v49 = vsel %vm1558_vm10, %v4472_v14, 0.0  ;;  %4173 = vmatprep.mubr.msk.f32.mxu0 %vm4714_vm7, %v4713_v10  ;;  %4232 = vmatpush3.msra.mxu0 %v1803_v45 }
 0x4b8   : > { %2055 = vadd.xlane.f32.xlu0 %v2054_v49  ;;  %4260 = vmatprep.subr.mxu0 %v4713_v10 }
 0x4ba   : > { %v4474_v59 = vpop.eup %4473  ;;  %4174 = vmatmul.mubr.msk.f32.gmra.mxu0 %vm1558_vm10, %v4468_v0 }
 0x4bb   : > { %v2057_v7 = vsel %vm1558_vm10, %v4474_v59, 0.0  ;;  %4176 = vmatprep.mubr.msk.f32.mxu0 %vm4714_vm7, %v4713_v10 }
 0x4bc   : > { %2058 = vadd.xlane.f32.xlu0 %v2057_v7 }
 0x4be   : > { %v4476_v27 = vpop.eup %4475  ;;  %4177 = vmatmul.mubr.msk.f32.gmra.mxu0 %vm1558_vm10, %v4470_v2 }
 0x4bf   : > { %v2060_v32 = vsel %vm1558_vm10, %v4476_v27, 0.0  ;;  %4179 = vmatprep.mubr.msk.f32.mxu0 %vm4714_vm7, %v4713_v10 }
 0x4c0   : > { %2061 = vadd.xlane.f32.xlu0 %v2060_v32 }
 0x4c2   : > { %4180 = vmatmul.mubr.msk.f32.gmra.mxu0 %vm1558_vm10, %v4472_v14 }
 0x4c3   : > { %4182 = vmatprep.mubr.msk.f32.mxu0 %vm4714_vm7, %v4713_v10 }
 0x4c6   : > { %4183 = vmatmul.mubr.msk.f32.gmra.mxu0 %vm1558_vm10, %v4474_v59 }
 0x4c7   : > { %4185 = vmatprep.mubr.msk.f32.mxu0 %vm4714_vm7, %v4713_v10 }
 0x4ca   : > { %4186 = vmatmul.mubr.msk.f32.gmra.mxu0 %vm1558_vm10, %v4476_v27 }
 0x4cb   : > { %4188 = vmatprep.mubr.msk.f32.mxu0 %vm4714_vm7, %v4713_v10 }
 0x4dd   : > { %v2011_v29 = vpop.xlane.xlu0 %2010 }
 0x4de   : > { %v2022_v5 = vsub.f32 %v5695_v40, %v2011_v29 }
 0x4e0   : > { %v2038_v42 = vmul.f32 1.442695, %v2022_v5 }
 0x4e1   : > { %v2014_v19 = vpop.xlane.xlu0 %2013  ;;  %v1616_v57 = vpop.xlane.xlu1 %1615 }
 0x4e2   : > { %4477 = vpow2.f32 %v2038_v42  ;;  %v2023_v48 = vsub.f32 %v5698_v39, %v2014_v19 }
 0x4e4   : > { %v2040_v6 = vmul.f32 1.442695, %v2023_v48 }
 0x4e5   : > { %v1619_v16 = vpop.xlane.xlu0 %1618  ;;  %v1631_v60 = vpop.xlane.xlu1 %1630 }
 0x4e6   : > { %4479 = vpow2.f32 %v2040_v6 }
 0x4e7   : > { %4481 = vrcp.f32 %v1616_v57 }
 0x4e8   : > { %4483 = vrcp.f32 %v1619_v16 }
 0x4e9   : > { %v1622_v62 = vpop.xlane.xlu0 %1621 }
 0x4ea   : > { %4485 = vrcp.f32 %v1622_v62 }
 0x4ed   : > { %v1625_v40 = vpop.xlane.xlu0 %1624 }
 0x4ee   : > { %4487 = vrcp.f32 %v1625_v40 }
 0x4ef   : > { %v4478_v47 = vpop.eup %4477 }
 0x4f0   : > { %4189 = vmatmul.mubr.msk.f32.gmra.mxu0 %vm1558_vm10, %v4478_v47  ;;  %v2063_v46 = vsel %vm1558_vm10, %v4478_v47, 0.0 }
 0x4f1   : > { %2064 = vadd.xlane.f32.xlu0 %v2063_v46  ;;  %4191 = vmatprep.mubr.msk.f32.mxu0 %vm4714_vm7, %v4713_v10 }
 0x4f3   : > { %v4480_v39 = vpop.eup %4479 }
 0x4f4   : > { %4192 = vmatmul.mubr.msk.f32.gmra.mxu0 %vm1558_vm10, %v4480_v39  ;;  %v2066_v53 = vsel %vm1583_vm11, %v4480_v39, 0.0  ;;  %v4482_v24 = vpop.eup %4481 }
 0x4f5   : > { %2067 = vadd.xlane.f32.xlu0 %v2066_v53  ;;  %4233 = vmatprep.mubr.msk.f32.mxu0 %vm4714_vm7, %v4713_v10  ;;  %v4484_v50 = vpop.eup %4483  ;;  %v1628_v1 = vpop.xlane.xlu0 %1627 }
 0x4f6   : > { %v1738_v18 = vpop.f32.mrf.mxu0  ;;  %4489 = vrcp.f32 %v1628_v1 }
 0x4f7   : > { %v1791_v25 = vmul.f32 %v4482_v24, %v1738_v18  ;;  %v4486_v58 = vpop.eup %4485  ;;  %4491 = vrcp.f32 %v1631_v60 }
 0x4f8   : > { %v4079_v33 = vpop.f32.mrf.mxu0 }
 0x4f9   : > { %4234 = vmatmul.mubr.msk.f32.vlgmr.msra.gmra.mxu0 %vm1393_vm8, %v1791_v25  ;;  %v1634_v41 = vpop.xlane.xlu1 %1633 }
 0x4fa   : > { %v1743_v9 = vpop.f32.mrf.mxu0  ;;  %4236 = vmatprep.mubr.msk.f32.mxu0 %vm4714_vm7, %v4713_v10  ;;  %4493 = vrcp.f32 %v1634_v41 }
 0x4fb   : > { %v1792_v55 = vmul.f32 %v4484_v50, %v1743_v9  ;;  %v4488_v23 = vpop.eup %4487 }
 0x4fc   : > { %v4082_v26 = vpop.f32.mrf.mxu0 }
 0x4fd   : > { %4237 = vmatmul.mubr.msk.f32.gmra.mxu0 %vm1393_vm8, %v1792_v55  ;;  %v1637_v21 = vpop.xlane.xlu1 %1636 }
 0x4fe   : > { %v1748_v61 = vpop.f32.mrf.mxu0  ;;  %4239 = vmatprep.mubr.msk.f32.mxu0 %vm4714_vm7, %v4713_v10  ;;  %4495 = vrcp.f32 %v1637_v21 }
 0x4ff   : > { %v1793_v17 = vmul.f32 %v4486_v58, %v1748_v61 }
 0x500   : > { %v4085_v20 = vpop.f32.mrf.mxu0 }
 0x501   : > { %4240 = vmatmul.mubr.msk.f32.gmra.mxu0 %vm1393_vm8, %v1793_v17  ;;  %v1640_v56 = vpop.xlane.xlu1 %1639 }
 0x502   : > { %v1753_v28 = vpop.f32.mrf.mxu0  ;;  %4242 = vmatprep.mubr.msk.f32.mxu0 %vm4714_vm7, %v4713_v10  ;;  %4497 = vrcp.f32 %v1640_v56 }
 0x503   : > { %v1794_v30 = vmul.f32 %v4488_v23, %v1753_v28  ;;  %v4490_v31 = vpop.eup %4489 }
 0x504   : > { %v4088_v52 = vpop.f32.mrf.mxu0  ;;  %v4492_v37 = vpop.eup %4491 }
 0x505   : > { %4243 = vmatmul.mubr.msk.f32.gmra.mxu0 %vm1393_vm8, %v1794_v30 }
 0x506   : > { %4245 = vmatprep.mubr.msk.f32.mxu0 %vm4714_vm7, %v4713_v10 }
 0x507   : > { %v4494_v51 = vpop.eup %4493 }
 0x50b   : > { %v4496_v8 = vpop.eup %4495 }
 0x50f   : > { %v4498_v22 = vpop.eup %4497 }
 0x52b   : > { %v1758_v43 = vpop.f32.mrf.mxu0 }
 0x52c   : > { %v1795_v11 = vmul.f32 %v4490_v31, %v1758_v43 }
 0x52d   : > { %v4091_v3 = vpop.f32.mrf.mxu0 }
 0x52e   : > { %4246 = vmatmul.mubr.msk.f32.gmra.mxu0 %vm1393_vm8, %v1795_v11 }
 0x52f   : > { %v1763_v38 = vpop.f32.mrf.mxu0  ;;  %4248 = vmatprep.mubr.msk.f32.mxu0 %vm4714_vm7, %v4713_v10 }
 0x530   : > { %v1796_v36 = vmul.f32 %v4492_v37, %v1763_v38 }
 0x531   : > { %v4094_v35 = vpop.f32.mrf.mxu0  ;;  %v2044_v59 = vpop.xlane.xlu0 %2043 }
 0x532   : > { %4249 = vmatmul.mubr.msk.f32.gmra.mxu0 %vm1393_vm8, %v1796_v36  ;;  %4499 = vrcp.f32 %v2044_v59 }
 0x533   : > { %v1768_v0 = vpop.f32.mrf.mxu0  ;;  %4251 = vmatprep.mubr.msk.f32.mxu0 %vm4714_vm7, %v4713_v10 }
 0x534   : > { %v1797_v44 = vmul.f32 %v4494_v51, %v1768_v0 }
 0x535   : > { %v4097_v63 = vpop.f32.mrf.mxu0  ;;  %v2047_v7 = vpop.xlane.xlu0 %2046 }
 0x536   : > { %4252 = vmatmul.mubr.msk.f32.gmra.mxu0 %vm1393_vm8, %v1797_v44  ;;  %4501 = vrcp.f32 %v2047_v7 }
 0x537   : > { %v1773_v13 = vpop.f32.mrf.mxu0  ;;  %4254 = vmatprep.mubr.msk.f32.mxu0 %vm4714_vm7, %v4713_v10 }
 0x538   : > { %v1798_v2 = vmul.f32 %v4496_v8, %v1773_v13 }
 0x539   : > { %v4100_v54 = vpop.f32.mrf.mxu0  ;;  %v2050_v27 = vpop.xlane.xlu0 %2049 }
 0x53a   : > { %4255 = vmatmul.mubr.msk.f32.gmra.mxu0 %vm1393_vm8, %v1798_v2  ;;  %4503 = vrcp.f32 %v2050_v27 }
 0x53b   : > { %v1778_v45 = vpop.f32.mrf.mxu0  ;;  %4257 = vmatprep.mubr.msk.f32.mxu0 %vm4714_vm7, %v4713_v10 }
 0x53c   : > { %v1799_v14 = vmul.f32 %v4498_v22, %v1778_v45 }
 0x53d   : > { %v4103_v49 = vpop.f32.mrf.mxu0  ;;  %v2053_v32 = vpop.xlane.xlu0 %2052 }
 0x53e   : > { %4258 = vmatmul.mubr.msk.f32.gmra.mxu0 %vm1393_vm8, %v1799_v14  ;;  %4505 = vrcp.f32 %v2053_v32 }
 0x53f   : > { %4292 = vmatprep.mubr.msk.f32.mxu0 %vm4714_vm7, %v4713_v10  ;;  %v4500_v29 = vpop.eup %4499 }
 0x541   : > { %v2056_v15 = vpop.xlane.xlu0 %2055 }
 0x542   : > { %4507 = vrcp.f32 %v2056_v15 }
 0x543   : > { %v4502_v6 = vpop.eup %4501 }
 0x545   : > { %v2059_v19 = vpop.xlane.xlu0 %2058 }
 0x546   : > { %4509 = vrcp.f32 %v2059_v19 }
 0x547   : > { %v4504_v47 = vpop.eup %4503 }
 0x549   : > { %v2062_v46 = vpop.xlane.xlu0 %2061 }
 0x54a   : > { %4511 = vrcp.f32 %v2062_v46 }
 0x54b   : > { %v4506_v53 = vpop.eup %4505 }
 0x54f   : > { %v4508_v25 = vpop.eup %4507 }
 0x553   : > { %v4510_v55 = vpop.eup %4509 }
 0x557   : > { %v4512_v17 = vpop.eup %4511 }
 0x572   : > { %v2198_v5 = vpop.f32.mrf.mxu0 }
 0x573   : > { %v2251_v42 = vmul.f32 %v4500_v29, %v2198_v5 }
 0x574   : > { %v4169_v48 = vpop.f32.mrf.mxu0 }
 0x575   : > { %4201 = vmatmul.mubr.msk.f32.vlgmr.msra.gmra.mxu1 %vm1393_vm8, %v2251_v42 }
 0x576   : > { %v2203_v57 = vpop.f32.mrf.mxu0  ;;  %4203 = vmatprep.mubr.msk.f32.mxu1 %vm4714_vm7, %v4713_v10 }
 0x577   : > { %v2252_v16 = vmul.f32 %v4502_v6, %v2203_v57 }
 0x578   : > { %v4172_v62 = vpop.f32.mrf.mxu0 }
 0x579   : > { %4204 = vmatmul.mubr.msk.f32.gmra.mxu1 %vm1393_vm8, %v2252_v16 }
 0x57a   : > { %v2208_v40 = vpop.f32.mrf.mxu0  ;;  %4206 = vmatprep.mubr.msk.f32.mxu1 %vm4714_vm7, %v4713_v10  ;;  %v2065_v30 = vpop.xlane.xlu0 %2064 }
 0x57b   : > { %v2253_v39 = vmul.f32 %v4504_v47, %v2208_v40  ;;  %4513 = vrcp.f32 %v2065_v30 }
 0x57c   : > { %v4175_v4 = vpop.f32.mrf.mxu0 }
 0x57d   : > { %4207 = vmatmul.mubr.msk.f32.gmra.mxu1 %vm1393_vm8, %v2253_v39 }
 0x57e   : > { %v2213_v12 = vpop.f32.mrf.mxu0  ;;  %4209 = vmatprep.mubr.msk.f32.mxu1 %vm4714_vm7, %v4713_v10  ;;  %v2068_v52 = vpop.xlane.xlu0 %2067 }
 0x57f   : > { %v2254_v24 = vmul.f32 %v4506_v53, %v2213_v12  ;;  %4515 = vrcp.f32 %v2068_v52 }
 0x580   : > { %v4178_v18 = vpop.f32.mrf.mxu0 }
 0x581   : > { %4210 = vmatmul.mubr.msk.f32.gmra.mxu1 %vm1393_vm8, %v2254_v24 }
 0x582   : > { %v2218_v33 = vpop.f32.mrf.mxu0  ;;  %4212 = vmatprep.mubr.msk.f32.mxu1 %vm4714_vm7, %v4713_v10 }
 0x583   : > { %v2255_v50 = vmul.f32 %v4508_v25, %v2218_v33 }
 0x584   : > { %v4181_v9 = vpop.f32.mrf.mxu0 }
 0x585   : > { %4213 = vmatmul.mubr.msk.f32.gmra.mxu1 %vm1393_vm8, %v2255_v50 }
 0x586   : > { %v2223_v26 = vpop.f32.mrf.mxu0  ;;  %4215 = vmatprep.mubr.msk.f32.mxu1 %vm4714_vm7, %v4713_v10 }
 0x587   : > { %v2256_v58 = vmul.f32 %v4510_v55, %v2223_v26 }
 0x588   : > { %v4184_v61 = vpop.f32.mrf.mxu0  ;;  %v4514_v60 = vpop.eup %4513 }
 0x589   : > { %4216 = vmatmul.mubr.msk.f32.gmra.mxu1 %vm1393_vm8, %v2256_v58 }
 0x58a   : > { %v2228_v20 = vpop.f32.mrf.mxu0  ;;  %4218 = vmatprep.mubr.msk.f32.mxu1 %vm4714_vm7, %v4713_v10 }
 0x58b   : > { %v2257_v23 = vmul.f32 %v4512_v17, %v2228_v20 }
 0x58c   : > { %v4187_v28 = vpop.f32.mrf.mxu0  ;;  %v4516_v31 = vpop.eup %4515 }
 0x58d   : > { %4219 = vmatmul.mubr.msk.f32.gmra.mxu1 %vm1393_vm8, %v2257_v23 }
 0x58e   : > { %4221 = vmatprep.mubr.msk.f32.mxu1 %vm4714_vm7, %v4713_v10 }
 0x5b0   : > { %v2233_v1 = vpop.f32.mrf.mxu0 }
 0x5b1   : > { %v2258_v41 = vmul.f32 %v4514_v60, %v2233_v1 }
 0x5b2   : > { %v4190_v21 = vpop.f32.mrf.mxu0 }
 0x5b3   : > { %4222 = vmatmul.mubr.msk.f32.gmra.mxu1 %vm1393_vm8, %v2258_v41 }
 0x5b4   : > { %v2238_v56 = vpop.f32.mrf.mxu0  ;;  %4224 = vmatprep.mubr.msk.f32.mxu1 %vm4714_vm7, %v4713_v10 }
 0x5b5   : > { %v2259_v43 = vmul.f32 %v4516_v31, %v2238_v56 }
 0x5b6   : > { %v4193_v11 = vpop.f32.mrf.mxu0 }
 0x5b7   : > { %4225 = vmatmul.mubr.msk.f32.gmra.mxu1 %vm1393_vm8, %v2259_v43 }
 0x5b8   : > { %2825 = vmatprep.mubr.f32.mxu1 %v4713_v10 }
 0x5b9   : > { %v2496_v3 = vpop.f32.mrf.mxu0 }
 0x5bb   : > { %v4235_v37 = vpop.f32.mrf.mxu0 }
 0x5bd   : > { %v2501_v38 = vpop.f32.mrf.mxu0 }
 0x5bf   : > { %v4238_v36 = vpop.f32.mrf.mxu0 }
 0x5c1   : > { %v2506_v35 = vpop.f32.mrf.mxu0 }
 0x5c3   : > { %v4241_v51 = vpop.f32.mrf.mxu0 }
 0x5c5   : > { %v2511_v0 = vpop.f32.mrf.mxu0 }
 0x5c7   : > { %v4244_v44 = vpop.f32.mrf.mxu0 }
 0x5ee   : > { %v2516_v63 = vpop.f32.mrf.mxu0 }
 0x5f0   : > { %v4247_v8 = vpop.f32.mrf.mxu0 }
 0x5f2   : > { %v2521_v13 = vpop.f32.mrf.mxu0 }
 0x5f4   : > { %v4250_v2 = vpop.f32.mrf.mxu0 }
 0x5f6   : > { %v2526_v54 = vpop.f32.mrf.mxu0 }
 0x5f8   : > { %v4253_v22 = vpop.f32.mrf.mxu0 }
 0x5fa   : > { %v2531_v45 = vpop.f32.mrf.mxu0 }
 0x5fc   : > { %v4256_v14 = vpop.f32.mrf.mxu0 }
 0x5fe   : > { %v2536_v49 = vpop.f32.mrf.mxu0 }
 0x600   : > { %v4259_v59 = vpop.f32.mrf.mxu0 }
 0x635   : > { %v2359_v7 = vpop.f32.mrf.mxu1 }
 0x636   : > { %v5877_v27 = vadd.f32 %v2496_v3, %v2359_v7 }
 0x637   : > { %v4202_v32 = vpop.f32.mrf.mxu1 }
 0x638   : > { %v2540_v15 = vmul.f32 %v5877_v27, %v5877_v27 }
 0x639   : > { %v2364_v29 = vpop.f32.mrf.mxu1 }
 0x63a   : > { %v5881_v5 = vadd.f32 %v2501_v38, %v2364_v29  ;;  %v2549_v42 = vsel %vm620_vm5, %v2540_v15, 0.0 }
 0x63b   : > { %v4205_v19 = vpop.f32.mrf.mxu1  ;;  %2550 = vadd.xlane.f32.xlu1 %v2549_v42 }
 0x63c   : > { %v2541_v48 = vmul.f32 %v5881_v5, %v5881_v5 }
 0x63d   : > { %v2369_v6 = vpop.f32.mrf.mxu1 }
 0x63e   : > { %v5886_v57 = vadd.f32 %v2506_v35, %v2369_v6  ;;  %v2552_v16 = vsel %vm620_vm5, %v2541_v48, 0.0 }
 0x63f   : > { %v4208_v62 = vpop.f32.mrf.mxu1  ;;  %2553 = vadd.xlane.f32.xlu0 %v2552_v16  ;;  %v4608_v16 = vld [vmem:[#allocation2] sm:$0xff] }
 0x640   : > { %v2542_v47 = vmul.f32 %v5886_v57, %v5886_v57 }
 0x641   : > { %v2374_v46 = vpop.f32.mrf.mxu1 }
 0x642   : > { %v5891_v40 = vadd.f32 %v2511_v0, %v2374_v46  ;;  %v2555_v39 = vsel %vm620_vm5, %v2542_v47, 0.0 }
 0x643   : > { %v4211_v4 = vpop.f32.mrf.mxu1  ;;  %2556 = vadd.xlane.f32.xlu1 %v2555_v39 }
 0x644   : > { %v2543_v53 = vmul.f32 %v5891_v40, %v5891_v40 }
 0x645   : > { %v2379_v12 = vpop.f32.mrf.mxu1 }
 0x646   : > { %v5896_v24 = vadd.f32 %v2516_v63, %v2379_v12  ;;  %v2558_v18 = vsel %vm620_vm5, %v2543_v53, 0.0 }
 0x647   : > { %v4214_v25 = vpop.f32.mrf.mxu1  ;;  %2559 = vadd.xlane.f32.xlu0 %v2558_v18 }
 0x648   : > { %v2544_v33 = vmul.f32 %v5896_v24, %v5896_v24  ;;  %v4609_v25 = vld [vmem:[#allocation2 + $0x8] sm:$0xff] }
 0x649   : > { %v2384_v50 = vpop.f32.mrf.mxu1 }
 0x64a   : > { %v5901_v9 = vadd.f32 %v2521_v13, %v2384_v50  ;;  %v2561_v55 = vsel %vm620_vm5, %v2544_v33, 0.0 }
 0x64b   : > { %v4217_v26 = vpop.f32.mrf.mxu1  ;;  %2562 = vadd.xlane.f32.xlu1 %v2561_v55 }
 0x64c   : > { %v2545_v58 = vmul.f32 %v5901_v9, %v5901_v9 }
 0x64d   : > { %v2389_v61 = vpop.f32.mrf.mxu1 }
 0x64e   : > { %v5906_v17 = vadd.f32 %v2526_v54, %v2389_v61  ;;  %v2564_v20 = vsel %vm620_vm5, %v2545_v58, 0.0  ;;  %v2614_v54 = vsub.s32 2, %v5007_v34  ;;  %v4610_v61 = vld [vmem:[#allocation2 + $0x10] sm:$0xff] }
 0x64f   : > { %v4220_v23 = vpop.f32.mrf.mxu1  ;;  %2565 = vadd.xlane.f32.xlu0 %v2564_v20 }
 0x650   : > { %v2546_v28 = vmul.f32 %v5906_v17, %v5906_v17 }
 0x652   : > { %v2567_v30 = vsel %vm620_vm5, %v2546_v28, 0.0 }
 0x653   : > { %2568 = vadd.xlane.f32.xlu1 %v2567_v30 }
 0x673   : > { %v2394_v52 = vpop.f32.mrf.mxu1 }
 0x674   : > { %v5912_v60 = vadd.f32 %v2531_v45, %v2394_v52 }
 0x675   : > { %v4223_v1 = vpop.f32.mrf.mxu1 }
 0x676   : > { %v2547_v41 = vmul.f32 %v5912_v60, %v5912_v60  ;;  %v4611_v1 = vld [vmem:[#allocation2 + $0x18] sm:$0xff] }
 0x677   : > { %v2399_v21 = vpop.f32.mrf.mxu1 }
 0x678   : > { %v5916_v31 = vadd.f32 %v2536_v49, %v2399_v21  ;;  %v2570_v56 = vsel %vm620_vm5, %v2547_v41, 0.0  ;;  %v5924_v49 = vld [vmem:[%s5012_s17] sm:$0xff]  ;;  %s3576_s17 = smul.u32 96, %s4693_s24 }
 0x679   : > { %v4226_v43 = vpop.f32.mrf.mxu1  ;;  %2571 = vadd.xlane.f32.xlu0 %v2570_v56  ;;  %v5927_v59 = vrot.slane %v5924_v49, %v2614_v54 }
 0x67a   : > { %v2548_v11 = vmul.f32 %v5916_v31, %v5916_v31  ;;  %s2721_s21 = scalar_lea.vmem %s6244_s7, %s3576_s17  ;;  %s6028_s17 = scalar_lea.vmem %s6245_s8, %s3570_s26 }
 0x67c   : > { %v2573_v3 = vsel %vm645_vm6, %v2548_v11, 0.0 }
 0x67d   : > { %2574 = vadd.xlane.f32.xlu1 %v2573_v3  ;;  %v4612_v3 = vld [vmem:[#allocation2 + $0x20] sm:$0xff] }
 0x6c4   : > { %v2551_v37 = vpop.xlane.xlu1 %2550 }
 0x6c5   : > { %v2576_v38 = vmul.f32 0.020833334, %v2551_v37 }
 0x6c7   : > { %v2585_v36 = vadd.f32 1e-05, %v2576_v38 }
 0x6c8   : > { %v2554_v35 = vpop.xlane.xlu0 %2553 }
 0x6c9   : > { %4517 = vrsqrt.f32 %v2585_v36  ;;  %v2577_v51 = vmul.f32 0.020833334, %v2554_v35 }
 0x6cb   : > { %v2586_v0 = vadd.f32 1e-05, %v2577_v51 }
 0x6cc   : > { %v2557_v44 = vpop.xlane.xlu1 %2556 }
 0x6cd   : > { %4519 = vrsqrt.f32 %v2586_v0  ;;  %v2578_v63 = vmul.f32 0.020833334, %v2557_v44  ;;  %v4613_v0 = vld [vmem:[#allocation2 + $0x28] sm:$0xff] }
 0x6cf   : > { %v2587_v8 = vadd.f32 1e-05, %v2578_v63 }
 0x6d0   : > { %v2560_v13 = vpop.xlane.xlu0 %2559 }
 0x6d1   : > { %4521 = vrsqrt.f32 %v2587_v8  ;;  %v2579_v2 = vmul.f32 0.020833334, %v2560_v13 }
 0x6d3   : > { %v2588_v22 = vadd.f32 1e-05, %v2579_v2  ;;  %v4614_v2 = vld [vmem:[#allocation2 + $0x30] sm:$0xff] }
 0x6d4   : > { %v2563_v45 = vpop.xlane.xlu1 %2562 }
 0x6d5   : > { %4523 = vrsqrt.f32 %v2588_v22  ;;  %v2580_v14 = vmul.f32 0.020833334, %v2563_v45 }
 0x6d6   : > { %v4518_v7 = vpop.eup %4517 }
 0x6d7   : > { %v2589_v32 = vadd.f32 1e-05, %v2580_v14  ;;  %v2603_v15 = vmul.f32 %v4518_v7, %v5877_v27  ;;  %v2732_v14 = vld [vmem:[%s2721_s21 + $0x50] sm:$0xff]  ;;  %v2731_v7 = vld [vmem:[%s2721_s21 + $0x48] sm:$0xff] }
 0x6d8   : > { %v2566_v29 = vpop.xlane.xlu0 %2565 }
 0x6d9   : > { %4525 = vrsqrt.f32 %v2589_v32  ;;  %v2581_v42 = vmul.f32 0.020833334, %v2566_v29  ;;  %v2616_v19 = vmul.f32 %v5927_v59, %v2603_v15  ;;  %v2730_v32 = vld [vmem:[%s2721_s21 + $0x40] sm:$0xff]  ;;  %v2729_v15 = vld [vmem:[%s2721_s21 + $0x38] sm:$0xff]  ;;  %v2728_v29 = vld [vmem:[%s2721_s21 + $0x30] sm:$0xff] }
 0x6da   : > { %v4520_v48 = vpop.eup %4519 }
 0x6db   : > { %v2590_v6 = vadd.f32 1e-05, %v2581_v42  ;;  %v5931_v62 = vadd.f32 %v4608_v16, %v2616_v19  ;;  %v2604_v47 = vmul.f32 %v4520_v48, %v5881_v5  ;;  %v2727_v42 = vld [vmem:[%s2721_s21 + $0x28] sm:$0xff]  ;;  %v2726_v19 = vld [vmem:[%s2721_s21 + $0x20] sm:$0xff]  ;;  %v2725_v48 = vld [vmem:[%s2721_s21 + $0x18] sm:$0xff] }
 0x6dc   : > { %v2569_v46 = vpop.xlane.xlu1 %2568  ;;  %v2723_v16 = vld [vmem:[%s2721_s21 + $0x8] sm:$0xff] }
 0x6dd   : > { %4527 = vrsqrt.f32 %v2590_v6  ;;  %v2582_v39 = vmul.f32 0.020833334, %v2569_v46  ;;  %v2634_v4 = vmul.f32 %v5931_v62, %v5931_v62  ;;  %v2617_v27 = vmul.f32 %v5927_v59, %v2604_v47  ;;  %v2724_v6 = vld [vmem:[%s2721_s21 + $0x10] sm:$0xff]  ;;  %v2722_v47 = vld [vmem:[%s2721_s21] sm:$0xff] }
 0x6de   : > { %v4522_v53 = vpop.eup %4521 }
 0x6df   : > { %v2591_v12 = vadd.f32 1e-05, %v2582_v39  ;;  %v2643_v18 = vsel %vm620_vm5, %v2634_v4, 0.0  ;;  %v5938_v33 = vadd.f32 %v4609_v25, %v2617_v27  ;;  %v2605_v50 = vmul.f32 %v4522_v53, %v5886_v57 }
 0x6e0   : > { %2644 = vadd.xlane.f32.xlu0 %v2643_v18 }
 0x6e1   : > { %4529 = vrsqrt.f32 %v2591_v12  ;;  %v2635_v5 = vmul.f32 %v5938_v33, %v5938_v33  ;;  %v2618_v55 = vmul.f32 %v5927_v59, %v2605_v50 }
 0x6e2   : > { %v4524_v26 = vpop.eup %4523 }
 0x6e3   : > { %v2646_v58 = vsel %vm620_vm5, %v2635_v5, 0.0  ;;  %v5945_v20 = vadd.f32 %v4610_v61, %v2618_v55  ;;  %v2606_v23 = vmul.f32 %v4524_v26, %v5891_v40  ;;  %v4615_v55 = vld [vmem:[#allocation2 + $0x38] sm:$0xff] }
 0x6e4   : > { %2647 = vadd.xlane.f32.xlu1 %v2646_v58 }
 0x6e5   : > { %v2636_v28 = vmul.f32 %v5945_v20, %v5945_v20  ;;  %v2619_v57 = vmul.f32 %v5927_v59, %v2606_v23 }
 0x6e6   : > { %v4526_v30 = vpop.eup %4525 }
 0x6e7   : > { %v2649_v52 = vsel %vm620_vm5, %v2636_v28, 0.0  ;;  %v5952_v41 = vadd.f32 %v4611_v1, %v2619_v57  ;;  %v2607_v21 = vmul.f32 %v4526_v30, %v5896_v24  ;;  %v4616_v57 = vld [vmem:[#allocation2 + $0x40] sm:$0x1] }
 0x6e8   : > { %2650 = vadd.xlane.f32.xlu0 %v2649_v52 }
 0x6e9   : > { %v2637_v56 = vmul.f32 %v5952_v41, %v5952_v41  ;;  %v2620_v40 = vmul.f32 %v5927_v59, %v2607_v21 }
 0x6ea   : > { %v4528_v43 = vpop.eup %4527 }
 0x6eb   : > { %v2652_v11 = vsel %vm620_vm5, %v2637_v56, 0.0  ;;  %v5959_v37 = vadd.f32 %v4612_v3, %v2620_v40  ;;  %v2608_v38 = vmul.f32 %v4528_v43, %v5901_v9 }
 0x6ec   : > { %2653 = vadd.xlane.f32.xlu1 %v2652_v11 }
 0x6ed   : > { %v2638_v36 = vmul.f32 %v5959_v37, %v5959_v37  ;;  %v2621_v24 = vmul.f32 %v5927_v59, %v2608_v38 }
 0x6ee   : > { %v4530_v35 = vpop.eup %4529 }
 0x6ef   : > { %v2655_v51 = vsel %vm620_vm5, %v2638_v36, 0.0  ;;  %v5966_v44 = vadd.f32 %v4613_v0, %v2621_v24  ;;  %v2609_v63 = vmul.f32 %v4530_v35, %v5906_v17  ;;  %v2733_v17 = vld [vmem:[%s2721_s21 + $0x58] sm:$0xff]  ;;  %v2708_v24 = vsub.s32 1, %v5007_v34 }
 0x6f0   : > { %2656 = vadd.xlane.f32.xlu0 %v2655_v51  ;;  %2781 = vmatprep.subr.mxu1 %v2733_v17 }
 0x6f1   : > { %v2639_v8 = vmul.f32 %v5966_v44, %v5966_v44  ;;  %v2622_v9 = vmul.f32 %v5927_v59, %v2609_v63  ;;  %2782 = vmatpush1.msra.mxu1 %v2732_v14  ;;  %v2709_v63 = vrot.slane %v5924_v49, %v2708_v24  ;;  %v2962_v24 = vld [vmem:[%s6028_s17 + $0x40] sm:$0xff] }
 0x6f2   : > { %2783 = vmatprep.subr.mxu1 %v2731_v7 }
 0x6f3   : > { %v2658_v13 = vsel %vm620_vm5, %v2639_v8, 0.0  ;;  %v5973_v54 = vadd.f32 %v4614_v2, %v2622_v9  ;;  %2784 = vmatpush1.msra.mxu1 %v2730_v32 }
 0x6f4   : > { %2659 = vadd.xlane.f32.xlu1 %v2658_v13  ;;  %2785 = vmatprep.subr.mxu1 %v2729_v15 }
 0x6f5   : > { %v2640_v22 = vmul.f32 %v5973_v54, %v5973_v54  ;;  %2786 = vmatpush1.msra.mxu1 %v2728_v29 }
 0x6f6   : > { %2787 = vmatprep.subr.mxu1 %v2727_v42 }
 0x6f7   : > { %v2661_v45 = vsel %vm620_vm5, %v2640_v22, 0.0  ;;  %2788 = vmatpush1.msra.mxu1 %v2726_v19 }
 0x6f8   : > { %2662 = vadd.xlane.f32.xlu0 %v2661_v45  ;;  %2789 = vmatprep.subr.mxu1 %v2725_v48 }
 0x6f9   : > { %2790 = vmatpush1.msra.mxu1 %v2724_v6 }
 0x6fa   : > { %2791 = vmatprep.subr.mxu1 %v2723_v16 }
 0x6fb   : > { %2792 = vmatpush1.msra.mxu1 %v2722_v47 }
 0x702   : > { %v2572_v46 = vpop.xlane.xlu0 %2571 }
 0x703   : > { %v2583_v39 = vmul.f32 0.020833334, %v2572_v46 }
 0x705   : > { %v2592_v4 = vadd.f32 1e-05, %v2583_v39 }
 0x706   : > { %v2575_v27 = vpop.xlane.xlu1 %2574 }
 0x707   : > { %4531 = vrsqrt.f32 %v2592_v4  ;;  %v2584_v53 = vmul.f32 0.020833334, %v2575_v27 }
 0x709   : > { %v2593_v12 = vadd.f32 1e-05, %v2584_v53 }
 0x70b   : > { %4533 = vrsqrt.f32 %v2593_v12 }
 0x714   : > { %v4532_v18 = vpop.eup %4531 }
 0x715   : > { %v2610_v25 = vmul.f32 %v4532_v18, %v5912_v60 }
 0x717   : > { %v2623_v50 = vmul.f32 %v5927_v59, %v2610_v25 }
 0x718   : > { %v4534_v5 = vpop.eup %4533 }
 0x719   : > { %v5984_v26 = vadd.f32 %v4615_v55, %v2623_v50  ;;  %v2611_v58 = vmul.f32 %v4534_v5, %v5916_v31 }
 0x71b   : > { %v2641_v61 = vmul.f32 %v5984_v26, %v5984_v26  ;;  %v2624_v23 = vmul.f32 %v5927_v59, %v2611_v58 }
 0x71d   : > { %v2664_v28 = vsel %vm620_vm5, %v2641_v61, 0.0  ;;  %v5991_v30 = vadd.f32 %v4616_v57, %v2624_v23 }
 0x71e   : > { %2665 = vadd.xlane.f32.xlu1 %v2664_v28 }
 0x71f   : > { %v2642_v60 = vmul.f32 %v5991_v30, %v5991_v30 }
 0x721   : > { %v2667_v52 = vsel %vm645_vm6, %v2642_v60, 0.0 }
 0x722   : > { %2668 = vadd.xlane.f32.xlu0 %v2667_v52 }
 0x769   : > { %v2645_v1 = vpop.xlane.xlu0 %2644 }
 0x76a   : > { %v2670_v21 = vmul.f32 0.020833334, %v2645_v1 }
 0x76c   : > { %v2679_v31 = vadd.f32 1e-05, %v2670_v21 }
 0x76d   : > { %v2648_v56 = vpop.xlane.xlu1 %2647 }
 0x76e   : > { %4535 = vrsqrt.f32 %v2679_v31  ;;  %v2671_v40 = vmul.f32 0.020833334, %v2648_v56 }
 0x770   : > { %v2680_v43 = vadd.f32 1e-05, %v2671_v40  ;;  %v2969_v40 = vld [vmem:[%s6028_s17 + $0x78] sm:$0xff] }
 0x771   : > { %v2651_v59 = vpop.xlane.xlu0 %2650  ;;  %4261 = vmatpush3.msra.mxu0 %v2969_v40 }
 0x772   : > { %4537 = vrsqrt.f32 %v2680_v43  ;;  %v2672_v11 = vmul.f32 0.020833334, %v2651_v59  ;;  %4262 = vmatprep.subr.mxu0 %v4713_v10  ;;  %v2968_v43 = vld [vmem:[%s6028_s17 + $0x70] sm:$0xff]  ;;  %v2967_v59 = vld [vmem:[%s6028_s17 + $0x68] sm:$0xff] }
 0x773   : > { %4263 = vmatpush3.msra.mxu0 %v2968_v43 }
 0x774   : > { %v2681_v3 = vadd.f32 1e-05, %v2672_v11  ;;  %4264 = vmatprep.subr.mxu0 %v4713_v10  ;;  %v2966_v11 = vld [vmem:[%s6028_s17 + $0x60] sm:$0xff] }
 0x775   : > { %v2654_v38 = vpop.xlane.xlu1 %2653  ;;  %4265 = vmatpush3.msra.mxu0 %v2967_v59 }
 0x776   : > { %4539 = vrsqrt.f32 %v2681_v3  ;;  %v2673_v36 = vmul.f32 0.020833334, %v2654_v38  ;;  %4266 = vmatprep.subr.mxu0 %v4713_v10  ;;  %v2965_v3 = vld [vmem:[%s6028_s17 + $0x58] sm:$0xff]  ;;  %v2964_v38 = vld [vmem:[%s6028_s17 + $0x50] sm:$0xff] }
 0x777   : > { %4267 = vmatpush3.msra.mxu0 %v2966_v11 }
 0x778   : > { %v2682_v35 = vadd.f32 1e-05, %v2673_v36  ;;  %4268 = vmatprep.subr.mxu0 %v4713_v10  ;;  %v2963_v36 = vld [vmem:[%s6028_s17 + $0x48] sm:$0xff] }
 0x779   : > { %v2657_v51 = vpop.xlane.xlu0 %2656  ;;  %4269 = vmatpush3.msra.mxu0 %v2965_v3 }
 0x77a   : > { %4541 = vrsqrt.f32 %v2682_v35  ;;  %v2674_v0 = vmul.f32 0.020833334, %v2657_v51  ;;  %4270 = vmatprep.subr.mxu0 %v4713_v10  ;;  %v2961_v35 = vld [vmem:[%s6028_s17 + $0x38] sm:$0xff]  ;;  %v2960_v51 = vld [vmem:[%s6028_s17 + $0x30] sm:$0xff] }
 0x77b   : > { %v4536_v8 = vpop.eup %4535  ;;  %4271 = vmatpush3.msra.mxu0 %v2964_v38 }
 0x77c   : > { %v2697_v9 = vmul.f32 %v4536_v8, %v5931_v62  ;;  %v2683_v13 = vadd.f32 1e-05, %v2674_v0  ;;  %4272 = vmatprep.subr.mxu0 %v4713_v10  ;;  %v2959_v0 = vld [vmem:[%s6028_s17 + $0x28] sm:$0xff]  ;;  %v2957_v8 = vld [vmem:[%s6028_s17 + $0x18] sm:$0xff] }
 0x77d   : > { %v2660_v2 = vpop.xlane.xlu1 %2659  ;;  %4273 = vmatpush3.msra.mxu0 %v2963_v36 }
 0x77e   : > { %4543 = vrsqrt.f32 %v2683_v13  ;;  %v2675_v22 = vmul.f32 0.020833334, %v2660_v2  ;;  %v2710_v17 = vmul.f32 %v2709_v63, %v2697_v9  ;;  %4274 = vmatprep.subr.mxu0 %v4713_v10  ;;  %v2956_v9 = vld [vmem:[%s6028_s17 + $0x10] sm:$0xff]  ;;  %v2955_v13 = vld [vmem:[%s6028_s17 + $0x8] sm:$0xff]  ;;  %v2954_v2 = vld [vmem:[%s6028_s17] sm:$0xff] }
 0x77f   : > { %v4538_v45 = vpop.eup %4537  ;;  %4275 = vmatpush3.msra.mxu0 %v2962_v24 }
 0x780   : > { %v2684_v14 = vadd.f32 1e-05, %v2675_v22  ;;  %3552 = vmatmul.mubr.msk.f32.vlgmr.msra.gmra.mxu1 %vm620_vm5, %v2710_v17  ;;  %v2698_v7 = vmul.f32 %v4538_v45, %v5938_v33  ;;  %4276 = vmatprep.subr.mxu0 %v4713_v10 }
 0x781   : > { %v2663_v32 = vpop.xlane.xlu0 %2662  ;;  %2831 = vmatprep.mubr.f32.mxu1 %v4713_v10  ;;  %4277 = vmatpush3.msra.mxu0 %v2961_v35 }
 0x782   : > { %4545 = vrsqrt.f32 %v2684_v14  ;;  %v2676_v15 = vmul.f32 0.020833334, %v2663_v32  ;;  %v2711_v29 = vmul.f32 %v2709_v63, %v2698_v7  ;;  %4278 = vmatprep.subr.mxu0 %v4713_v10 }
 0x783   : > { %v4540_v42 = vpop.eup %4539  ;;  %4279 = vmatpush3.msra.mxu0 %v2960_v51 }
 0x784   : > { %v2685_v19 = vadd.f32 1e-05, %v2676_v15  ;;  %3553 = vmatmul.mubr.msk.f32.gmra.mxu1 %vm620_vm5, %v2711_v29  ;;  %v2699_v48 = vmul.f32 %v4540_v42, %v5945_v20  ;;  %4280 = vmatprep.subr.mxu0 %v4713_v10 }
 0x785   : > { %2837 = vmatprep.mubr.f32.mxu1 %v4713_v10  ;;  %4281 = vmatpush3.msra.mxu0 %v2959_v0 }
 0x786   : > { %4547 = vrsqrt.f32 %v2685_v19  ;;  %v2712_v6 = vmul.f32 %v2709_v63, %v2699_v48  ;;  %4282 = vmatprep.subr.mxu0 %v4713_v10 }
 0x787   : > { %v4542_v16 = vpop.eup %4541 }
 0x788   : > { %3554 = vmatmul.mubr.msk.f32.gmra.mxu1 %vm620_vm5, %v2712_v6  ;;  %v2700_v47 = vmul.f32 %v4542_v16, %v5952_v41 }
 0x789   : > { %2843 = vmatprep.mubr.f32.mxu1 %v4713_v10 }
 0x78a   : > { %v2713_v46 = vmul.f32 %v2709_v63, %v2700_v47 }
 0x78b   : > { %v4544_v39 = vpop.eup %4543 }
 0x78c   : > { %3555 = vmatmul.mubr.msk.f32.gmra.mxu1 %vm620_vm5, %v2713_v46  ;;  %v2701_v4 = vmul.f32 %v4544_v39, %v5959_v37 }
 0x78d   : > { %2849 = vmatprep.mubr.f32.mxu1 %v4713_v10 }
 0x78e   : > { %v2714_v27 = vmul.f32 %v2709_v63, %v2701_v4 }
 0x78f   : > { %v4546_v53 = vpop.eup %4545 }
 0x790   : > { %3556 = vmatmul.mubr.msk.f32.gmra.mxu1 %vm620_vm5, %v2714_v27  ;;  %v2702_v12 = vmul.f32 %v4546_v53, %v5966_v44 }
 0x791   : > { %2855 = vmatprep.mubr.f32.mxu1 %v4713_v10 }
 0x792   : > { %v2715_v18 = vmul.f32 %v2709_v63, %v2702_v12 }
 0x793   : > { %v4548_v25 = vpop.eup %4547 }
 0x794   : > { %3557 = vmatmul.mubr.msk.f32.gmra.mxu1 %vm620_vm5, %v2715_v18  ;;  %v2703_v50 = vmul.f32 %v4548_v25, %v5973_v54 }
 0x795   : > { %2861 = vmatprep.mubr.f32.mxu1 %v4713_v10 }
 0x796   : > { %v2716_v5 = vmul.f32 %v2709_v63, %v2703_v50 }
 0x798   : > { %3558 = vmatmul.mubr.msk.f32.gmra.mxu1 %vm620_vm5, %v2716_v5 }
 0x799   : > { %2867 = vmatprep.mubr.f32.mxu1 %v4713_v10 }
 0x7a7   : > { %v2666_v55 = vpop.xlane.xlu1 %2665 }
 0x7a8   : > { %v2677_v58 = vmul.f32 0.020833334, %v2666_v55 }
 0x7aa   : > { %v2686_v61 = vadd.f32 1e-05, %v2677_v58 }
 0x7ab   : > { %v2669_v23 = vpop.xlane.xlu0 %2668 }
 0x7ac   : > { %4549 = vrsqrt.f32 %v2686_v61  ;;  %v2678_v28 = vmul.f32 0.020833334, %v2669_v23 }
 0x7ae   : > { %v2687_v57 = vadd.f32 1e-05, %v2678_v28 }
 0x7b0   : > { %4551 = vrsqrt.f32 %v2687_v57 }
 0x7b9   : > { %v4550_v60 = vpop.eup %4549 }
 0x7ba   : > { %v2704_v52 = vmul.f32 %v4550_v60, %v5984_v26 }
 0x7bc   : > { %v2717_v1 = vmul.f32 %v2709_v63, %v2704_v52 }
 0x7bd   : > { %v4552_v21 = vpop.eup %4551 }
 0x7be   : > { %3559 = vmatmul.mubr.msk.f32.gmra.mxu1 %vm620_vm5, %v2717_v1  ;;  %v2705_v31 = vmul.f32 %v4552_v21, %v5991_v30 }
 0x7bf   : > { %2873 = vmatprep.mubr.f32.mxu1 %v4713_v10 }
 0x7c0   : > { %v2718_v56 = vmul.f32 %v2709_v63, %v2705_v31  ;;  %v2958_v63 = vld [vmem:[%s6028_s17 + $0x20] sm:$0xff] }
 0x7c1   : > { %4283 = vmatpush3.msra.mxu0 %v2958_v63 }
 0x7c2   : > { %3560 = vmatmul.mubr.msk.f32.gmra.mxu1 %vm620_vm5, %v2718_v56  ;;  %4284 = vmatprep.subr.mxu0 %v4713_v10 }
 0x7c3   : > { %4285 = vmatpush3.msra.mxu0 %v2957_v8 }
 0x7c4   : > { %4286 = vmatprep.subr.mxu0 %v4713_v10 }
 0x7c5   : > { %4287 = vmatpush3.msra.mxu0 %v2956_v9 }
 0x7c6   : > { %4288 = vmatprep.subr.mxu0 %v4713_v10 }
 0x7c7   : > { %4289 = vmatpush3.msra.mxu0 %v2955_v13 }
 0x7c8   : > { %4290 = vmatprep.subr.mxu0 %v4713_v10 }
 0x7c9   : > { %4291 = vmatpush3.msra.mxu0 %v2954_v2 }
 0x840   : > { %v2827_v22 = vpop.f32.mrf.mxu1 }
 0x841   : > { %v3561_v17 = vmul.f32 -1.442695, %v2827_v22 }
 0x842   : > { %v2829_v45 = vpop.f32.mrf.mxu1 }
 0x843   : > { %4553 = vpow2.f32 %v3561_v17 }
 0x844   : > { %v2833_v14 = vpop.f32.mrf.mxu1 }
 0x845   : > { %v3562_v7 = vmul.f32 -1.442695, %v2833_v14 }
 0x846   : > { %v2835_v32 = vpop.f32.mrf.mxu1 }
 0x847   : > { %4555 = vpow2.f32 %v3562_v7 }
 0x848   : > { %v2839_v15 = vpop.f32.mrf.mxu1 }
 0x849   : > { %v3563_v29 = vmul.f32 -1.442695, %v2839_v15 }
 0x84a   : > { %v2841_v42 = vpop.f32.mrf.mxu1 }
 0x84b   : > { %4557 = vpow2.f32 %v3563_v29 }
 0x84c   : > { %v2845_v19 = vpop.f32.mrf.mxu1 }
 0x84d   : > { %v3564_v48 = vmul.f32 -1.442695, %v2845_v19 }
 0x84e   : > { %v2847_v6 = vpop.f32.mrf.mxu1 }
 0x84f   : > { %4559 = vpow2.f32 %v3564_v48 }
 0x850   : > { %v4554_v16 = vpop.eup %4553  ;;  %v2851_v47 = vpop.f32.mrf.mxu1 }
 0x851   : > { %v2907_v46 = vadd.f32 1.0, %v4554_v16  ;;  %v3565_v39 = vmul.f32 -1.442695, %v2851_v47 }
 0x852   : > { %v2853_v4 = vpop.f32.mrf.mxu1 }
 0x853   : > { %4561 = vrcp.f32 %v2907_v46 }
 0x854   : > { %v4556_v27 = vpop.eup %4555  ;;  %4563 = vpow2.f32 %v3565_v39  ;;  %v2857_v53 = vpop.f32.mrf.mxu1 }
 0x855   : > { %v2908_v12 = vadd.f32 1.0, %v4556_v27  ;;  %v3566_v18 = vmul.f32 -1.442695, %v2857_v53 }
 0x856   : > { %v2859_v25 = vpop.f32.mrf.mxu1 }
 0x857   : > { %4565 = vrcp.f32 %v2908_v12 }
 0x858   : > { %v4558_v50 = vpop.eup %4557  ;;  %4567 = vpow2.f32 %v3566_v18  ;;  %v2863_v5 = vpop.f32.mrf.mxu1 }
 0x859   : > { %v2909_v55 = vadd.f32 1.0, %v4558_v50  ;;  %v3567_v58 = vmul.f32 -1.442695, %v2863_v5 }
 0x85b   : > { %4569 = vrcp.f32 %v2909_v55 }
 0x85c   : > { %v4560_v61 = vpop.eup %4559  ;;  %4571 = vpow2.f32 %v3567_v58 }
 0x85d   : > { %v2910_v23 = vadd.f32 1.0, %v4560_v61 }
 0x85f   : > { %4573 = vrcp.f32 %v2910_v23 }
 0x860   : > { %v4562_v28 = vpop.eup %4561 }
 0x861   : > { %v4564_v57 = vpop.eup %4563  ;;  %v2934_v60 = vmul.f32 %v4562_v28, %v2827_v22 }
 0x862   : > { %v2911_v52 = vadd.f32 1.0, %v4564_v57 }
 0x863   : > { %v2943_v1 = vmul.f32 %v2934_v60, %v2829_v45  ;;  %v2865_v45 = vpop.f32.mrf.mxu1 }
 0x864   : > { %v4566_v21 = vpop.eup %4565  ;;  %4575 = vrcp.f32 %v2911_v52 }
 0x865   : > { %v4568_v31 = vpop.eup %4567  ;;  %v2935_v56 = vmul.f32 %v4566_v21, %v2833_v14  ;;  %4293 = vmatmul.mubr.f32.vlgmr.msra.gmra.mxu0 %v2943_v1 }
 0x866   : > { %v2912_v40 = vadd.f32 1.0, %v4568_v31  ;;  %4295 = vmatprep.mubr.msk.f32.mxu0 %vm4714_vm7, %v4713_v10 }
 0x867   : > { %v2944_v43 = vmul.f32 %v2935_v56, %v2835_v32 }
 0x868   : > { %v4570_v59 = vpop.eup %4569  ;;  %4577 = vrcp.f32 %v2912_v40 }
 0x869   : > { %v4572_v11 = vpop.eup %4571  ;;  %v2936_v3 = vmul.f32 %v4570_v59, %v2839_v15  ;;  %4296 = vmatmul.mubr.f32.gmra.mxu0 %v2944_v43 }
 0x86a   : > { %v2913_v38 = vadd.f32 1.0, %v4572_v11  ;;  %4298 = vmatprep.mubr.msk.f32.mxu0 %vm4714_vm7, %v4713_v10 }
 0x86b   : > { %v2945_v36 = vmul.f32 %v2936_v3, %v2841_v42 }
 0x86c   : > { %v4574_v24 = vpop.eup %4573  ;;  %4579 = vrcp.f32 %v2913_v38 }
 0x86d   : > { %v2937_v35 = vmul.f32 %v4574_v24, %v2845_v19  ;;  %4299 = vmatmul.mubr.f32.gmra.mxu0 %v2945_v36 }
 0x86e   : > { %4301 = vmatprep.mubr.msk.f32.mxu0 %vm4714_vm7, %v4713_v10 }
 0x86f   : > { %v2946_v51 = vmul.f32 %v2937_v35, %v2847_v6 }
 0x871   : > { %v4576_v0 = vpop.eup %4575  ;;  %4302 = vmatmul.mubr.f32.gmra.mxu0 %v2946_v51 }
 0x872   : > { %v2938_v63 = vmul.f32 %v4576_v0, %v2851_v47  ;;  %4304 = vmatprep.mubr.msk.f32.mxu0 %vm4714_vm7, %v4713_v10 }
 0x874   : > { %v2947_v8 = vmul.f32 %v2938_v63, %v2853_v4 }
 0x875   : > { %v4578_v9 = vpop.eup %4577 }
 0x876   : > { %v2939_v13 = vmul.f32 %v4578_v9, %v2857_v53  ;;  %4305 = vmatmul.mubr.f32.gmra.mxu0 %v2947_v8 }
 0x877   : > { %4307 = vmatprep.mubr.msk.f32.mxu0 %vm4714_vm7, %v4713_v10 }
 0x878   : > { %v2948_v2 = vmul.f32 %v2939_v13, %v2859_v25 }
 0x879   : > { %v4580_v22 = vpop.eup %4579 }
 0x87a   : > { %v2940_v17 = vmul.f32 %v4580_v22, %v2863_v5  ;;  %4308 = vmatmul.mubr.f32.gmra.mxu0 %v2948_v2 }
 0x87b   : > { %4310 = vmatprep.mubr.msk.f32.mxu0 %vm4714_vm7, %v4713_v10 }
 0x87c   : > { %v2949_v14 = vmul.f32 %v2940_v17, %v2865_v45 }
 0x87e   : > { %4311 = vmatmul.mubr.f32.gmra.mxu0 %v2949_v14  ;;  %v2869_v7 = vpop.f32.mrf.mxu1 }
 0x87f   : > { %v3568_v32 = vmul.f32 -1.442695, %v2869_v7  ;;  %4313 = vmatprep.mubr.msk.f32.mxu0 %vm4714_vm7, %v4713_v10 }
 0x880   : > { %v2871_v15 = vpop.f32.mrf.mxu1 }
 0x881   : > { %4581 = vpow2.f32 %v3568_v32 }
 0x882   : > { %v2875_v29 = vpop.f32.mrf.mxu1 }
 0x883   : > { %v3569_v42 = vmul.f32 -1.442695, %v2875_v29 }
 0x884   : > { %v2877_v53 = vpop.f32.mrf.mxu1 }
 0x885   : > { %4583 = vpow2.f32 %v3569_v42 }
 0x88e   : > { %v4582_v19 = vpop.eup %4581 }
 0x88f   : > { %v2914_v48 = vadd.f32 1.0, %v4582_v19 }
 0x891   : > { %4585 = vrcp.f32 %v2914_v48 }
 0x892   : > { %v4584_v6 = vpop.eup %4583 }
 0x893   : > { %v2915_v16 = vadd.f32 1.0, %v4584_v6 }
 0x895   : > { %4587 = vrcp.f32 %v2915_v16 }
 0x89e   : > { %v4586_v47 = vpop.eup %4585 }
 0x89f   : > { %v2941_v46 = vmul.f32 %v4586_v47, %v2869_v7  ;;  %v3154_v47 = vsub.s32 3, %v5007_v34 }
 0x8a1   : > { %v2950_v39 = vmul.f32 %v2941_v46, %v2871_v15 }
 0x8a2   : > { %v4588_v4 = vpop.eup %4587 }
 0x8a3   : > { %v2942_v27 = vmul.f32 %v4588_v4, %v2875_v29  ;;  %4314 = vmatmul.mubr.f32.gmra.mxu0 %v2950_v39  ;;  %v6124_v4 = vrot.slane %v5924_v49, %v3154_v47 }
 0x8a4   : > { %4316 = vmatprep.mubr.msk.f32.mxu0 %vm4714_vm7, %v4713_v10 }
 0x8a5   : > { %v2951_v12 = vmul.f32 %v2942_v27, %v2877_v53 }
 0x8a7   : > { %4317 = vmatmul.mubr.f32.gmra.mxu0 %v2951_v12 }
 0x925   : > { %v6077_v18 = vpop.f32.mrf.mxu0 }
 0x926   : > { %v3080_v25 = vmul.f32 %v6077_v18, %v6077_v18 }
 0x927   : > { %v4294_v50 = vpop.f32.mrf.mxu0 }
 0x928   : > { %v3089_v5 = vsel %vm620_vm5, %v3080_v25, 0.0 }
 0x929   : > { %3090 = vadd.xlane.f32.xlu1 %v3089_v5  ;;  %v6082_v55 = vpop.f32.mrf.mxu0 }
 0x92a   : > { %v3081_v58 = vmul.f32 %v6082_v55, %v6082_v55 }
 0x92b   : > { %v4297_v61 = vpop.f32.mrf.mxu0 }
 0x92c   : > { %v3092_v23 = vsel %vm620_vm5, %v3081_v58, 0.0 }
 0x92d   : > { %3093 = vadd.xlane.f32.xlu0 %v3092_v23  ;;  %v6087_v10 = vpop.f32.mrf.mxu0 }
 0x92e   : > { %v3082_v28 = vmul.f32 %v6087_v10, %v6087_v10 }
 0x92f   : > { %v4300_v57 = vpop.f32.mrf.mxu0 }
 0x930   : > { %v3095_v60 = vsel %vm620_vm5, %v3082_v28, 0.0 }
 0x931   : > { %3096 = vadd.xlane.f32.xlu1 %v3095_v60  ;;  %v6092_v52 = vpop.f32.mrf.mxu0 }
 0x932   : > { %v3083_v1 = vmul.f32 %v6092_v52, %v6092_v52 }
 0x933   : > { %v4303_v21 = vpop.f32.mrf.mxu0 }
 0x934   : > { %v3098_v31 = vsel %vm620_vm5, %v3083_v1, 0.0 }
 0x935   : > { %3099 = vadd.xlane.f32.xlu0 %v3098_v31 }
 0x936   : > { %v6097_v56 = vpop.f32.mrf.mxu0 }
 0x937   : > { %v3084_v40 = vmul.f32 %v6097_v56, %v6097_v56 }
 0x938   : > { %v4306_v43 = vpop.f32.mrf.mxu0 }
 0x939   : > { %v3101_v59 = vsel %vm620_vm5, %v3084_v40, 0.0 }
 0x93a   : > { %3102 = vadd.xlane.f32.xlu1 %v3101_v59  ;;  %v6102_v11 = vpop.f32.mrf.mxu0 }
 0x93b   : > { %v3085_v3 = vmul.f32 %v6102_v11, %v6102_v11 }
 0x93c   : > { %v4309_v38 = vpop.f32.mrf.mxu0 }
 0x93d   : > { %v3104_v36 = vsel %vm620_vm5, %v3085_v3, 0.0 }
 0x93e   : > { %3105 = vadd.xlane.f32.xlu0 %v3104_v36  ;;  %v6107_v24 = vpop.f32.mrf.mxu0 }
 0x93f   : > { %v3086_v35 = vmul.f32 %v6107_v24, %v6107_v24 }
 0x940   : > { %v4312_v51 = vpop.f32.mrf.mxu0 }
 0x941   : > { %v3107_v0 = vsel %vm620_vm5, %v3086_v35, 0.0 }
 0x942   : > { %3108 = vadd.xlane.f32.xlu1 %v3107_v0 }
 0x963   : > { %v6112_v63 = vpop.f32.mrf.mxu0 }
 0x964   : > { %v3087_v8 = vmul.f32 %v6112_v63, %v6112_v63 }
 0x965   : > { %v4315_v9 = vpop.f32.mrf.mxu0 }
 0x966   : > { %v3110_v13 = vsel %vm620_vm5, %v3087_v8, 0.0 }
 0x967   : > { %3111 = vadd.xlane.f32.xlu0 %v3110_v13  ;;  %v6117_v2 = vpop.f32.mrf.mxu0 }
 0x968   : > { %v3088_v22 = vmul.f32 %v6117_v2, %v6117_v2 }
 0x969   : > { %v4318_v17 = vpop.f32.mrf.mxu0 }
 0x96a   : > { %v3113_v45 = vsel %vm645_vm6, %v3088_v22, 0.0 }
 0x96b   : > { %3114 = vadd.xlane.f32.xlu1 %v3113_v45 }
 0x9b2   : > { %v3091_v14 = vpop.xlane.xlu1 %3090 }
 0x9b3   : > { %v3116_v7 = vmul.f32 0.020833334, %v3091_v14 }
 0x9b5   : > { %v3125_v32 = vadd.f32 1e-05, %v3116_v7 }
 0x9b6   : > { %v3094_v15 = vpop.xlane.xlu0 %3093 }
 0x9b7   : > { %4589 = vrsqrt.f32 %v3125_v32  ;;  %v3117_v29 = vmul.f32 0.020833334, %v3094_v15 }
 0x9b9   : > { %v3126_v42 = vadd.f32 1e-05, %v3117_v29 }
 0x9ba   : > { %v3097_v19 = vpop.xlane.xlu1 %3096 }
 0x9bb   : > { %4591 = vrsqrt.f32 %v3126_v42  ;;  %v3118_v48 = vmul.f32 0.020833334, %v3097_v19 }
 0x9bd   : > { %v3127_v6 = vadd.f32 1e-05, %v3118_v48 }
 0x9be   : > { %v3100_v16 = vpop.xlane.xlu0 %3099 }
 0x9bf   : > { %4593 = vrsqrt.f32 %v3127_v6  ;;  %v3119_v46 = vmul.f32 0.020833334, %v3100_v16 }
 0x9c1   : > { %v3128_v39 = vadd.f32 1e-05, %v3119_v46 }
 0x9c3   : > { %4595 = vrsqrt.f32 %v3128_v39  ;;  %v3103_v27 = vpop.xlane.xlu1 %3102 }
 0x9c4   : > { %v4590_v53 = vpop.eup %4589  ;;  %v3120_v12 = vmul.f32 0.020833334, %v3103_v27 }
 0x9c5   : > { %v3143_v25 = vmul.f32 %v4590_v53, %v6077_v18 }
 0x9c6   : > { %v3129_v50 = vadd.f32 1e-05, %v3120_v12 }
 0x9c7   : > { %v3156_v5 = vmul.f32 %v6124_v4, %v3143_v25  ;;  %v3106_v58 = vpop.xlane.xlu0 %3105 }
 0x9c8   : > { %v4592_v61 = vpop.eup %4591  ;;  %4597 = vrsqrt.f32 %v3129_v50  ;;  %v3121_v23 = vmul.f32 0.020833334, %v3106_v58 }
 0x9c9   : > { %v6129_v34 = vadd.f32 %v3156_v5, %v5931_v62  ;;  %v3144_v28 = vmul.f32 %v4592_v61, %v6082_v55 }
 0x9ca   : > { %v3130_v49 = vadd.f32 1e-05, %v3121_v23 }
 0x9cb   : > { %3174 = vst.msk [vmem:[#allocation2] sm:$0xff] %vm620_vm5, %v6129_v34  ;;  %v3157_v57 = vmul.f32 %v6124_v4, %v3144_v28  ;;  %v3109_v60 = vpop.xlane.xlu1 %3108 }
 0x9cc   : > { %v4594_v18 = vpop.eup %4593  ;;  %4599 = vrsqrt.f32 %v3130_v49  ;;  %v3122_v1 = vmul.f32 0.020833334, %v3109_v60 }
 0x9cd   : > { %v3166_v21 = vadd.f32 %v3157_v57, %v5938_v33  ;;  %v3145_v31 = vmul.f32 %v4594_v18, %v6087_v10 }
 0x9ce   : > { %v3131_v40 = vadd.f32 1e-05, %v3122_v1 }
 0x9cf   : > { %3175 = vst.msk [vmem:[#allocation2 + $0x8] sm:$0xff] %vm620_vm5, %v3166_v21  ;;  %v3158_v62 = vmul.f32 %v6124_v4, %v3145_v31 }
 0x9d0   : > { %v4596_v55 = vpop.eup %4595  ;;  %4601 = vrsqrt.f32 %v3131_v40 }
 0x9d1   : > { %v3167_v43 = vadd.f32 %v3158_v62, %v5945_v20  ;;  %v3146_v59 = vmul.f32 %v4596_v55, %v6092_v52 }
 0x9d3   : > { %3176 = vst.msk [vmem:[#allocation2 + $0x10] sm:$0xff] %vm620_vm5, %v3167_v43  ;;  %v3159_v3 = vmul.f32 %v6124_v4, %v3146_v59 }
 0x9d5   : > { %v4598_v38 = vpop.eup %4597  ;;  %v3168_v33 = vadd.f32 %v3159_v3, %v5952_v41 }
 0x9d6   : > { %v3147_v10 = vmul.f32 %v4598_v38, %v6097_v56 }
 0x9d7   : > { %3177 = vst.msk [vmem:[#allocation2 + $0x18] sm:$0xff] %vm620_vm5, %v3168_v33 }
 0x9d8   : > { %v3160_v36 = vmul.f32 %v6124_v4, %v3147_v10 }
 0x9d9   : > { %v4600_v35 = vpop.eup %4599 }
 0x9da   : > { %v3169_v51 = vadd.f32 %v3160_v36, %v5959_v37  ;;  %v3148_v20 = vmul.f32 %v4600_v35, %v6102_v11 }
 0x9dc   : > { %3178 = vst.msk [vmem:[#allocation2 + $0x20] sm:$0xff] %vm620_vm5, %v3169_v51  ;;  %v3161_v52 = vmul.f32 %v6124_v4, %v3148_v20 }
 0x9dd   : > { %v4602_v0 = vpop.eup %4601 }
 0x9de   : > { %v3170_v8 = vadd.f32 %v3161_v52, %v5966_v44  ;;  %v3149_v41 = vmul.f32 %v4602_v0, %v6107_v24 }
 0x9e0   : > { %3179 = vst.msk [vmem:[#allocation2 + $0x28] sm:$0xff] %vm620_vm5, %v3170_v8  ;;  %v3162_v56 = vmul.f32 %v6124_v4, %v3149_v41 }
 0x9e2   : > { %v3171_v9 = vadd.f32 %v3162_v56, %v5973_v54 }
 0x9e4   : > { %3180 = vst.msk [vmem:[#allocation2 + $0x30] sm:$0xff] %vm620_vm5, %v3171_v9 }
 0x9f0   : > { %v3112_v37 = vpop.xlane.xlu0 %3111 }
 0x9f1   : > { %v3123_v13 = vmul.f32 0.020833334, %v3112_v37 }
 0x9f3   : > { %v3132_v11 = vadd.f32 1e-05, %v3123_v13 }
 0x9f4   : > { %v3115_v22 = vpop.xlane.xlu1 %3114 }
 0x9f5   : > { %4603 = vrsqrt.f32 %v3132_v11  ;;  %v3124_v17 = vmul.f32 0.020833334, %v3115_v22 }
 0x9f7   : > { %v3133_v45 = vadd.f32 1e-05, %v3124_v17 }
 0x9f9   : > { %4605 = vrsqrt.f32 %v3133_v45 }
 0xa02   : > { %v4604_v14 = vpop.eup %4603 }
 0xa03   : > { %v3150_v44 = vmul.f32 %v4604_v14, %v6112_v63 }
 0xa05   : > { %v3163_v24 = vmul.f32 %v6124_v4, %v3150_v44 }
 0xa06   : > { %v4606_v7 = vpop.eup %4605 }
 0xa07   : > { %v3172_v32 = vadd.f32 %v3163_v24, %v5984_v26  ;;  %v3151_v54 = vmul.f32 %v4606_v7, %v6117_v2 }
 0xa09   : > { %3181 = vst.msk [vmem:[#allocation2 + $0x38] sm:$0xff] %vm620_vm5, %v3172_v32  ;;  %v3164_v15 = vmul.f32 %v6124_v4, %v3151_v54  ;;  %3186 = sbr.rel (%p3571_p0) target bundleno = 2783 (0xadf), region = 76 }
 0xa0b   : > { %v3173_v29 = vadd.f32 %v3164_v15, %v5991_v30 }
 0xa0d   : > { %3182 = vst.msk [vmem:[#allocation2 + $0x40] sm:$0x1] %vm645_vm6, %v3173_v29 }
 0xa0e   : > { %v3192_v63 = vld [vmem:[%s6247_s10 + $0x28] sm:$0xff]  ;;  %v4716_v42 = vmov 0.0   ;;  %v3191_v26 = vld [vmem:[%s6247_s10 + $0x20] sm:$0xff]  ;;  %vm4717_vm12 = vmmov 0   ;;  %v3190_v30 = vld [vmem:[%s6247_s10 + $0x18] sm:$0xff]  ;;  %vm3267_vm13 = vcmask 122880  }
 0xa0f   : > { %4319 = vmatprep.subr.mxu0 %v4716_v42  ;;  %4331 = vmatprep.mubr.msk.f32.mxu0 %vm4717_vm12, %v4716_v42  ;;  %v3189_v2 = vld [vmem:[%s6247_s10 + $0x10] sm:$0xff]  ;;  %v3188_v19 = vld [vmem:[%s6247_s10 + $0x8] sm:$0xff]  ;;  %v3187_v48 = vld [vmem:[%s6247_s10] sm:$0xff] }
 0xa10   : > { %4320 = vmatpush3.msra.mxu0 %v3192_v63  ;;  %v3193_v6 = vld [vmem:[%s6248_s11] sm:$0x1] }
 0xa11   : > { %4321 = vmatprep.subr.mxu0 %v4716_v42 }
 0xa12   : > { %4322 = vmatpush3.msra.mxu0 %v3191_v26 }
 0xa13   : > { %4323 = vmatprep.subr.mxu0 %v4716_v42 }
 0xa14   : > { %4324 = vmatpush3.msra.mxu0 %v3190_v30 }
 0xa15   : > { %4325 = vmatprep.subr.mxu0 %v4716_v42 }
 0xa16   : > { %4326 = vmatpush3.msra.mxu0 %v3189_v2 }
 0xa17   : > { %4327 = vmatprep.subr.mxu0 %v4716_v42 }
 0xa18   : > { %4328 = vmatpush3.msra.mxu0 %v3188_v19 }
 0xa19   : > { %4329 = vmatprep.subr.mxu0 %v4716_v42 }
 0xa1a   : > { %4330 = vmatpush3.msra.mxu0 %v3187_v48 }
 0xa1b   : > { %4332 = vmatmul.mubr.msk.f32.vlgmr.msra.gmra.mxu0 %vm620_vm5, %v6129_v34 }
 0xadb   : > { %v3263_v16 = vpop.f32.mrf.mxu0 }
 0xadc   : > { %v3264_v47 = vadd.f32 %v3263_v16, %v3193_v6 }
 0xadd   : > { %v4333_v46 = vpop.f32.mrf.mxu0 }
 0xade   : > { %3268 = vst.msk [vmem:[%s4863_s14] sm:$0x1] %vm3267_vm13, %v3264_v47 }
 0xadf PF: > { %s3573_s24 = sshll.u32 %s4697_s25, 4  ;;  %s3282_s21 = sshll.u32 %s4863_s14, 4  ;;  %s3283_s21 = int_to_ptr.vmem [resolvable:$true] %s3282_s21 }
 0xae0   : > { %s3280_s18 = scalar_lea.hbm %s6249_s12, %s3573_s24  ;;  %s3270_s26 = scalar_lea.sflag [#allocation4], %s416_s20 }
 0xae1   : > { %s4617_s13 = scalar_lea.vmem %s3283_s21, 16  ;;  %s4718_s29 = smov [#allocation3]  }
 0xae2   : > { %p4618_p1 = scmp.ne.s32.totalorder %s3283_s21, %s4617_s13  ;;  %s4621_s0 = sshll.u32 %s4718_s29, 4  ;;  %s4622_s0 = int_to_ptr.vmem [resolvable:$false] %s4621_s0 }
 0xae3   : > { %s4623_s1 = scalar_lea.vmem %s4622_s0, 32  ;;  %p4624_p5 = scmp.lt.s32.totalorder %s3283_s21, %s4622_s0 }
 0xae4   : > { %p4619_p2 = pnand %p4618_p1, %p4833_p3  ;;  %p4625_p6 = scmp.lt.s32.totalorder %s4623_s1, %s4617_s13 }
 0xae6   : > { %p4620_p4 = pneg %p4619_p2  ;;  %p4626_p7 = por %p4625_p6, %p4624_p5 }
 0xae8   : > { %p4627_p8 = pnand %p4626_p7, %p4620_p4 }
 0xaea   : > { %4630 = shalt.err (!%p4627_p8)
}
 0xaeb   : > { %s4631_s25 = scalar_lea.hbm %s3280_s18, 16  ;;  %s4635_s24 = scalar_lea.hbm %s6249_s12, 32 }
 0xaec   : > { %p4632_p10 = scmp.ne.s32.totalorder %s3280_s18, %s4631_s25  ;;  %p4636_p13 = scmp.lt.s32.totalorder %s3280_s18, %s6249_s12 }
 0xaed   : > { %p4637_p0 = scmp.lt.s32.totalorder %s4635_s24, %s4631_s25 }
 0xaee   : > { %p4633_p11 = pnand %p4632_p10, %p4833_p3 }
 0xaef   : > { %p4638_p1 = por %p4637_p0, %p4636_p13 }
 0xaf0   : > { %p4634_p12 = pneg %p4633_p11 }
 0xaf2   : > { %p4639_p2 = pnand %p4638_p1, %p4634_p12 }
 0xaf4   : > { %4642 = shalt.err (!%p4639_p2)
}
 0xaf5   : > { %4349 = dma.vmem_to_hbm [thread:$0]  (%p4833_p3), %s3283_s21, 16, %s3280_s18, %s3270_s26  }
 0xaf6 PF: > { %s6263_s0 = sld [smem:[#allocation6_spill]]  ;;  %p4355_p4 = scmp.ge.s32.totalorder %s4709_s28, 2 }
 0xaf8   : > { %p4352_p5 = pnand %p4355_p4, %p4843_p9 }
 0xafa   : > { %p4353_p6 = pneg %p4352_p5 }
 0xafc   : > { %s3294_s1 = sand.u32 1, %s6263_s0  }
 0xafd   : > { %s3295_s13 = scalar_lea.sflag [#allocation4], %s3294_s1 }
 0xafe   : > { %4676 = dma.done.wait (%p4353_p6), %s3295_s13, 16  }
 0xaff   : > { %4678 = vsyncadd (%p4353_p6), %s3295_s13, 4294967280  ;;  %s25_s28 = sadd.s32 1, %s4709_s28   ;;  %s6264_s24 = sld [smem:[#allocation7_spill]] }
 0xb00   : > { %p22_p7 = scmp.ge.s32.totalorder %s25_s28, 6   ;;  %s6265_s26 = sld [smem:[#allocation8_spill]] }
 0xb01   : > { %s6266_s15 = sld [smem:[#allocation9_spill]]  ;;  %s6267_s21 = smov %s4685_s22 }
 0xb02   : > { %s6268_s22 = smov %s4689_s23  ;;  %s6269_s23 = smov %s4851_s19 }
 0xb03   : > { %s6270_s25 = smov %s4705_s27  ;;  %24 = sbr.rel (!%p22_p7) target bundleno = 8 (0x8), region = 121 }
 0xb07   : > { %s6271_s27 = smov %s6266_s15 }
 0xb08   :  { %3299 = vsyncpa [#allocation4], 1 }
 0xb09   :  { %3301 = vsyncpa [#allocation4 + $0x1], 1 }

</bundles_post_ra>
